<compile_context>
chip_gen: v6e
topology: v6e:2x2x1
jax: 0.10.0
libtpu: 0.0.40
codegen_flags: <defaults>
</compile_context>

<pallas_src>
import jax
import jax.numpy as jnp
from jax.experimental import pallas as pl
from jax.experimental.pallas import tpu as pltpu


def _discriminator_kernel(x_ref, w1_ref, b1_ref, w2_ref, b2_ref, w3_ref, b3_ref,
                          out_ref, acc_ref):
    # x_ref:  (TM, TK)          w1_ref: (TK, 512) bf16   b1_ref: (1, 512) f32
    # w2_ref: (512, 256) bf16   b2_ref: (1, 256) f32
    # w3_ref: (8, 256)  bf16    b3_ref: (1, 1)   f32
    # out_ref: (8, TM) f32 (lane-dense; row 0 = logits)
    # acc_ref: (TM, 512) f32 scratch (fc1 accumulator across K tiles)
    k = pl.program_id(1)

    @pl.when(k == 0)
    def _init():
        acc_ref[...] = jnp.zeros_like(acc_ref)

    # fc1 partial: bf16 MXU operands, f32 accumulation.
    acc_ref[...] += jnp.dot(x_ref[...].astype(jnp.bfloat16), w1_ref[...],
                            preferred_element_type=jnp.float32)

    @pl.when(k == pl.num_programs(1) - 1)
    def _finalize():
        # fc1 bias + LeakyReLU(0.2)  (f32 VPU)
        h1 = acc_ref[...] + b1_ref[...]
        h1 = jnp.maximum(h1, 0.2 * h1)

        # fc2 + LeakyReLU(0.2)
        h2 = jnp.dot(h1.astype(jnp.bfloat16), w2_ref[...],
                     preferred_element_type=jnp.float32) + b2_ref[...]
        h2 = jnp.maximum(h2, 0.2 * h2)

        # fc3 as w3 @ h2^T (attention-style transposed-RHS matmul) so the
        # result is (8, TM) == lane-dense straight off the MXU (which has
        # plenty of slack here); rows 1..7 of w3 are zero padding.
        logits = jax.lax.dot_general(
            w3_ref[...], h2.astype(jnp.bfloat16),
            dimension_numbers=(((1,), (1,)), ((), ())),
            preferred_element_type=jnp.float32) + b3_ref[...]
        out_ref[...] = logits.astype(out_ref.dtype)


def _round_up(x, m):
    return (x + m - 1) // m * m


def _vmem_config():
    """(scoped VMEM limit bytes, has-two-tensorcores) for the local TPU."""
    try:
        kind = jax.devices()[0].device_kind.lower()
    except Exception:
        kind = ""
    is_v7 = ("v7" in kind) or ("7x" in kind)
    # v7x: 64 MiB VMEM per TensorCore (2 TCs/chip); v5e/v6e: 128 MiB, 1 TC.
    vmem_limit = (48 << 20) if is_v7 else (96 << 20)
    return vmem_limit, is_v7


def _choose_tiles(B, Dp, tm, tk, vmem_limit, two_cores):
    """Pick (TM, TK).  Dp is already a multiple of 128."""
    # --- K tile over the fc1 contraction dim (streams w1 when D is large) ---
    cap = tk if tk is not None else 8192
    cap = min(max(128, _round_up(cap, 128)), Dp)
    TK = cap - cap % 128
    while Dp % TK:                       # Dp % 128 == 0 -> terminates (at 128)
        TK -= 128

    # --- M (batch) tile: as large as the VMEM budget allows ---
    budget = int(vmem_limit * 0.8)
    resident = 2 * TK * 512 * 2 + 512 * 256 * 2 + 8 * 256 * 2 + 4096  # w1(x2) + w2 + w3 + biases
    per_row = 2 * TK * 4 + 512 * 4 + 2 * 8 * 4   # x (double-buffered, f32 worst case) + acc + out
    tm_cap = max(128, (budget - resident) // per_row // 128 * 128)
    n_target = 2 if two_cores else 1
    TM = max(128, min(_round_up(tm, 128), tm_cap,
                      _round_up(pl.cdiv(B, n_target), 128)))
    if two_cores:
        # Keep the "parallel" batch axis balanced across the two TensorCores.
        n_m = pl.cdiv(B, TM)
        if n_m > 1 and n_m % 2:
            TM = max(128, min(TM, _round_up(pl.cdiv(B, n_m + 1), 128)))
    return TM, TK


def discriminator_forward(x, params, *, tm=1024, tk=None):
    """WGAN-GP critic forward.  x: (B, ...) is flattened to (B, D)."""
    x_flat = x.reshape(x.shape[0], -1)          # matches x.view(x.shape[0], -1)
    B, D = x_flat.shape

    vmem_limit, two_cores = _vmem_config()
    Dp = _round_up(D, 128)                      # lane-pad D (zeros contribute 0)
    TM, TK = _choose_tiles(B, Dp, tm, tk, vmem_limit, two_cores)
    n_m = pl.cdiv(B, TM)
    n_k = Dp // TK
    Bp = n_m * TM

    # Parameters: bf16 MXU operands, f32 biases.  w3's unit output dim is
    # padded to 8 rows (row 0 real, rows 1..7 zero) for a dense MXU/store.
    w1 = jnp.pad(params["w1"].astype(jnp.bfloat16), ((0, Dp - D), (0, 0)))
    b1 = params["b1"].reshape(1, 512).astype(jnp.float32)
    w2 = params["w2"].astype(jnp.bfloat16)
    b2 = params["b2"].reshape(1, 256).astype(jnp.float32)
    w3 = jnp.zeros((8, 256), jnp.bfloat16).at[0].set(
        params["w3"].reshape(-1).astype(jnp.bfloat16))
    b3 = params["b3"].reshape(1, 1).astype(jnp.float32)

    # Keep x's dtype (bf16 producers feed straight through); pad batch / D.
    if Bp != B or Dp != D:
        x_in = jnp.pad(x_flat, ((0, Bp - B), (0, Dp - D)))
    else:
        x_in = x_flat

    resident = lambda shape: pl.BlockSpec(shape, lambda i, k: (0, 0))

    out8 = pl.pallas_call(
        _discriminator_kernel,
        out_shape=jax.ShapeDtypeStruct((8, Bp), jnp.float32),
        grid=(n_m, n_k),
        in_specs=[
            pl.BlockSpec((TM, TK), lambda i, k: (i, k)),    # x tile, pipelined
            pl.BlockSpec((TK, 512), lambda i, k: (k, 0)),   # w1 K-streamed
            resident((1, 512)),                             # b1
            resident((512, 256)),                           # w2 (VMEM-resident)
            resident((1, 256)),                             # b2
            resident((8, 256)),                             # w3 (padded rows)
            resident((1, 1)),                               # b3
        ],
        out_specs=pl.BlockSpec((8, TM), lambda i, k: (0, i)),   # lane-dense
        scratch_shapes=[pltpu.VMEM((TM, 512), jnp.float32)],    # fc1 accumulator
        compiler_params=pltpu.CompilerParams(
            dimension_semantics=("parallel", "arbitrary"),
            vmem_limit_bytes=vmem_limit,
        ),
    )(x_in, w1, b1, w2, b2, w3, b3)

    return out8[0, :B].reshape(B, 1)


def init_params(key, in_features):
    """nn.Linear-style U(-1/sqrt(fan_in), 1/sqrt(fan_in)) init.

    Weights are stored (in_features, out_features) — transposed vs PyTorch.
    """
    dims = [(in_features, 512), (512, 256), (256, 1)]
    params = {}
    for i, (fan_in, fan_out) in enumerate(dims, start=1):
        key, kw, kb = jax.random.split(key, 3)
        bound = 1.0 / (fan_in ** 0.5)
        params[f"w{i}"] = jax.random.uniform(
            kw, (fan_in, fan_out), jnp.float32, -bound, bound)
        params[f"b{i}"] = jax.random.uniform(
            kb, (1, fan_out), jnp.float32, -bound, bound)
    return params


def _reference(xf, p):
    """Pure-JAX f32 reference of the same forward pass."""
    h = xf @ p["w1"] + p["b1"]
    h = jnp.where(h > 0, h, 0.2 * h)
    h = h @ p["w2"] + p["b2"]
    h = jnp.where(h > 0, h, 0.2 * h)
    return h @ p["w3"] + p["b3"]


if __name__ == "__main__":
    key = jax.random.PRNGKey(0)
    kx, kp, kx2 = jax.random.split(key, 3)

    # data_cfg.out_kernel.elements corresponds to the flattened per-sample
    # size; here 4 * 16 * 16 = 1024.
    B, C, H, W = 2, 4, 16, 16
    D = C * H * W
    params = init_params(kp, D)

    # --- primary check: tiny batch (single M tile, single K tile) ---
    x = jax.random.normal(kx, (B, C, H, W), jnp.float32)
    out = jax.block_until_ready(discriminator_forward(x, params))
    expected = _reference(x.reshape(B, -1), params)
    assert out.shape == (B, 1)
    # bf16 matmul operands -> loosened tolerance vs the f32 reference.
    assert jnp.allclose(out, expected, atol=2e-2, rtol=2e-2)

    # --- secondary check: multi-M-tile grid, K-tiled fc1, remainder padding ---
    B2 = 300
    x2 = jax.random.normal(kx2, (B2, D), jnp.float32)
    out2 = jax.block_until_ready(discriminator_forward(x2, params, tm=256, tk=512))
    expected2 = _reference(x2, params)
    assert out2.shape == (B2, 1)
    assert jnp.allclose(out2, expected2, atol=2e-2, rtol=2e-2)

    print("KERNEL_OK")
</pallas_src>

<mosaic_0001>
module attributes {stable_mosaic.version = 11 : i64} {
  func.func @_discriminator_kernel(%arg0: i32, %arg1: i32, %arg2: memref<128x1024xf32, #tpu.memory_space<vmem>>, %arg3: memref<1024x512xbf16, #tpu.memory_space<vmem>>, %arg4: memref<1x512xf32, #tpu.memory_space<vmem>>, %arg5: memref<512x256xbf16, #tpu.memory_space<vmem>>, %arg6: memref<1x256xf32, #tpu.memory_space<vmem>>, %arg7: memref<8x256xbf16, #tpu.memory_space<vmem>>, %arg8: memref<1x1xf32, #tpu.memory_space<vmem>>, %arg9: memref<8x128xf32, #tpu.memory_space<vmem>>, %arg10: memref<128x512xf32, #tpu.memory_space<vmem>>) attributes {dimension_semantics = [#tpu.dimension_semantics<parallel>, #tpu.dimension_semantics<arbitrary>], iteration_bounds = array<i64: 1, 1>, scalar_prefetch = 0 : i64, scratch_operands = 1 : i64, tpu.core_type = #tpu.core_type<tc>, window_params = [{transform_indices = @transform_0, window_bounds = array<i64: 128, 1024>}, {transform_indices = @transform_1, window_bounds = array<i64: 1024, 512>}, {pipeline_mode = #tpu.pipeline_mode<synchronous>, transform_indices = @transform_2, window_bounds = array<i64: 1, 512>}, {pipeline_mode = #tpu.pipeline_mode<synchronous>, transform_indices = @transform_3, window_bounds = array<i64: 512, 256>}, {pipeline_mode = #tpu.pipeline_mode<synchronous>, transform_indices = @transform_4, window_bounds = array<i64: 1, 256>}, {pipeline_mode = #tpu.pipeline_mode<synchronous>, transform_indices = @transform_5, window_bounds = array<i64: 8, 256>}, {pipeline_mode = #tpu.pipeline_mode<synchronous>, transform_indices = @transform_6, window_bounds = array<i64: 1, 1>}, {transform_indices = @transform_7, window_bounds = array<i64: 8, 128>}]} {
    %c0_i32 = arith.constant 0 : i32
    %0 = arith.cmpi eq, %arg1, %c0_i32 : i32
    %1 = arith.extui %0 : i1 to i32
    %c0_i32_0 = arith.constant 0 : i32
    %2 = arith.cmpi ne, %1, %c0_i32_0 : i32
    scf.if %2 {
      %cst_10 = arith.constant 0.000000e+00 : f32
      %13 = vector.broadcast %cst_10 : f32 to vector<128x512xf32>
      %c0_11 = arith.constant 0 : index
      %c0_12 = arith.constant 0 : index
      %14 = vector.load %arg10[%c0_11, %c0_12] : memref<128x512xf32, #tpu.memory_space<vmem>>, vector<128x512xf32>
      tpu.vector_store %arg10[%c0_11, %c0_12], %13 {strides = array<i32>} : memref<128x512xf32, #tpu.memory_space<vmem>>, vector<128x512xf32>,
    } else {
    }
    %c0 = arith.constant 0 : index
    %c0_1 = arith.constant 0 : index
    %3 = vector.load %arg10[%c0, %c0_1] : memref<128x512xf32, #tpu.memory_space<vmem>>, vector<128x512xf32>
    %c0_2 = arith.constant 0 : index
    %c0_3 = arith.constant 0 : index
    %4 = vector.load %arg2[%c0_2, %c0_3] : memref<128x1024xf32, #tpu.memory_space<vmem>>, vector<128x1024xf32>
    %5 = arith.truncf %4 : vector<128x1024xf32> to vector<128x1024xbf16>
    %c0_4 = arith.constant 0 : index
    %c0_5 = arith.constant 0 : index
    %6 = vector.load %arg3[%c0_4, %c0_5] : memref<1024x512xbf16, #tpu.memory_space<vmem>>, vector<1024x512xbf16>
    %cst = arith.constant dense<0.000000e+00> : vector<128x512xf32>
    %7 = tpu.matmul %5, %6, %cst {dimension_numbers = #tpu.dot_dimension_numbers<[1], [0], [0], [1], [0, 0, 1, 1], [], []>} : vector<128x1024xbf16>, vector<1024x512xbf16>, vector<128x512xf32> -> vector<128x512xf32>
    %8 = arith.addf %3, %7 : vector<128x512xf32>
    %c0_6 = arith.constant 0 : index
    %c0_7 = arith.constant 0 : index
    %9 = vector.load %arg10[%c0_6, %c0_7] : memref<128x512xf32, #tpu.memory_space<vmem>>, vector<128x512xf32>
    tpu.vector_store %arg10[%c0_6, %c0_7], %8 {strides = array<i32>} : memref<128x512xf32, #tpu.memory_space<vmem>>, vector<128x512xf32>,
    %c0_i32_8 = arith.constant 0 : i32
    %10 = arith.cmpi eq, %arg1, %c0_i32_8 : i32
    %11 = arith.extui %10 : i1 to i32
    %c0_i32_9 = arith.constant 0 : i32
    %12 = arith.cmpi ne, %11, %c0_i32_9 : i32
    scf.if %12 {
      %c0_10 = arith.constant 0 : index
      %c0_11 = arith.constant 0 : index
      %13 = vector.load %arg10[%c0_10, %c0_11] : memref<128x512xf32, #tpu.memory_space<vmem>>, vector<128x512xf32>
      %c0_12 = arith.constant 0 : index
      %c0_13 = arith.constant 0 : index
      %14 = vector.load %arg4[%c0_12, %c0_13] : memref<1x512xf32, #tpu.memory_space<vmem>>, vector<1x512xf32>
      %15 = vector.broadcast %14 : vector<1x512xf32> to vector<128x512xf32>
      %16 = arith.addf %13, %15 : vector<128x512xf32>
      %cst_14 = arith.constant 2.000000e-01 : f32
      %17 = vector.broadcast %cst_14 : f32 to vector<128x512xf32>
      %18 = arith.mulf %17, %16 : vector<128x512xf32>
      %19 = arith.maximumf %16, %18 : vector<128x512xf32>
      %20 = arith.truncf %19 : vector<128x512xf32> to vector<128x512xbf16>
      %c0_15 = arith.constant 0 : index
      %c0_16 = arith.constant 0 : index
      %21 = vector.load %arg5[%c0_15, %c0_16] : memref<512x256xbf16, #tpu.memory_space<vmem>>, vector<512x256xbf16>
      %cst_17 = arith.constant dense<0.000000e+00> : vector<128x256xf32>
      %22 = tpu.matmul %20, %21, %cst_17 {dimension_numbers = #tpu.dot_dimension_numbers<[1], [0], [0], [1], [0, 0, 1, 1], [], []>} : vector<128x512xbf16>, vector<512x256xbf16>, vector<128x256xf32> -> vector<128x256xf32>
      %c0_18 = arith.constant 0 : index
      %c0_19 = arith.constant 0 : index
      %23 = vector.load %arg6[%c0_18, %c0_19] : memref<1x256xf32, #tpu.memory_space<vmem>>, vector<1x256xf32>
      %24 = vector.broadcast %23 : vector<1x256xf32> to vector<128x256xf32>
      %25 = arith.addf %22, %24 : vector<128x256xf32>
      %cst_20 = arith.constant 2.000000e-01 : f32
      %26 = vector.broadcast %cst_20 : f32 to vector<128x256xf32>
      %27 = arith.mulf %26, %25 : vector<128x256xf32>
      %28 = arith.maximumf %25, %27 : vector<128x256xf32>
      %c0_21 = arith.constant 0 : index
      %c0_22 = arith.constant 0 : index
      %29 = vector.load %arg7[%c0_21, %c0_22] : memref<8x256xbf16, #tpu.memory_space<vmem>>, vector<8x256xbf16>
      %30 = arith.truncf %28 : vector<128x256xf32> to vector<128x256xbf16>
      %cst_23 = arith.constant dense<0.000000e+00> : vector<8x128xf32>
      %31 = tpu.matmul %29, %30, %cst_23 {dimension_numbers = #tpu.dot_dimension_numbers<[1], [1], [0], [0], [0, 0, 1, 0], [], []>} : vector<8x256xbf16>, vector<128x256xbf16>, vector<8x128xf32> -> vector<8x128xf32>
      %c0_24 = arith.constant 0 : index
      %c0_25 = arith.constant 0 : index
      %32 = vector.load %arg8[%c0_24, %c0_25] : memref<1x1xf32, #tpu.memory_space<vmem>>, vector<1x1xf32>
      %33 = vector.broadcast %32 : vector<1x1xf32> to vector<8x128xf32>
      %34 = arith.addf %31, %33 : vector<8x128xf32>
      %c0_26 = arith.constant 0 : index
      %c0_27 = arith.constant 0 : index
      %35 = vector.load %arg9[%c0_26, %c0_27] : memref<8x128xf32, #tpu.memory_space<vmem>>, vector<8x128xf32>
      tpu.vector_store %arg9[%c0_26, %c0_27], %34 {strides = array<i32>} : memref<8x128xf32, #tpu.memory_space<vmem>>, vector<8x128xf32>,
    } else {
    }
    return
  }
  func.func @transform_0(%arg0: i32, %arg1: i32) -> (i32, i32) {
    %c0_i32 = arith.constant 0 : i32
    return %arg0, %arg1 : i32, i32
  }
  func.func @transform_1(%arg0: i32, %arg1: i32) -> (i32, i32) {
    %c0_i32 = arith.constant 0 : i32
    %c0_i32_0 = arith.constant 0 : i32
    return %arg1, %c0_i32 : i32, i32
  }
  func.func @transform_2(%arg0: i32, %arg1: i32) -> (i32, i32) {
    %c0_i32 = arith.constant 0 : i32
    %c0_i32_0 = arith.constant 0 : i32
    %c0_i32_1 = arith.constant 0 : i32
    return %c0_i32, %c0_i32_0 : i32, i32
  }
  func.func @transform_3(%arg0: i32, %arg1: i32) -> (i32, i32) {
    %c0_i32 = arith.constant 0 : i32
    %c0_i32_0 = arith.constant 0 : i32
    %c0_i32_1 = arith.constant 0 : i32
    return %c0_i32, %c0_i32_0 : i32, i32
  }
  func.func @transform_4(%arg0: i32, %arg1: i32) -> (i32, i32) {
    %c0_i32 = arith.constant 0 : i32
    %c0_i32_0 = arith.constant 0 : i32
    %c0_i32_1 = arith.constant 0 : i32
    return %c0_i32, %c0_i32_0 : i32, i32
  }
  func.func @transform_5(%arg0: i32, %arg1: i32) -> (i32, i32) {
    %c0_i32 = arith.constant 0 : i32
    %c0_i32_0 = arith.constant 0 : i32
    %c0_i32_1 = arith.constant 0 : i32
    return %c0_i32, %c0_i32_0 : i32, i32
  }
  func.func @transform_6(%arg0: i32, %arg1: i32) -> (i32, i32) {
    %c0_i32 = arith.constant 0 : i32
    %c0_i32_0 = arith.constant 0 : i32
    %c0_i32_1 = arith.constant 0 : i32
    return %c0_i32, %c0_i32_0 : i32, i32
  }
  func.func @transform_7(%arg0: i32, %arg1: i32) -> (i32, i32) {
    %c0_i32 = arith.constant 0 : i32
    %c0_i32_0 = arith.constant 0 : i32
    return %c0_i32, %arg0 : i32, i32
  }
}

</mosaic_0001>

<bundles_post_ra>
// kernel: tpu_custom_call.1
= control target key start
LH: loop header
LB: loop body
LE: loop exit
PB: predicated region body
PF: predicated region fallthrough
CT: control target
= control target key end

     0   :  { %s5785_s0 = inlined_call_operand.hbm [shape: f32[128,1024], index: 0, kind: input, shape index: {}]   ;;  %s5786_s1 = inlined_call_operand.hbm [shape: bf16[1024,512], index: 1, kind: input, shape index: {}]   ;;  %s5787_s2 = inlined_call_operand.hbm [shape: f32[1,512], index: 2, kind: input, shape index: {}]   ;;  %s5788_s3 = inlined_call_operand.hbm [shape: bf16[512,256], index: 3, kind: input, shape index: {}]   ;;  %s5789_s4 = inlined_call_operand.vmem [shape: f32[1,256], index: 4, kind: input, shape index: {}]   ;;  %s5790_s5 = inlined_call_operand.vmem [shape: bf16[8,256], index: 5, kind: input, shape index: {}]   ;;  %s5791_s6 = inlined_call_operand.<no memory space> [shape: f32[1,1], index: 6, kind: input, shape index: {}]   ;;  %s5792_s7 = inlined_call_operand.hbm [shape: f32[8,128], index: 7, kind: output, shape index: {}]  }
   0x1   :  { %v12_v0 = vstv %s5791_s6 }
   0x2   :  { %13 = vst [vmem:[#allocation3] sm:$0x1] %v12_v0 }
   0x3   :  { %14 = vsyncpa [#allocation5], 0 }
   0x4   :  { %15 = vsyncpa [#allocation8], 0 }
   0x5   :  { %16 = vsyncpa [#allocation11], 0 }
   0x6   :  { %17 = vsyncpa [#allocation6], 0  ;;  %s4992_s26 = smov [#allocation7]  }
   0x7   :  { %s35_s27 = sshll.u32 %s4992_s26, 4  ;;  %s36_s27 = int_to_ptr.vmem [resolvable:$true] %s35_s27 }
   0x8   :  { %s4892_s28 = scalar_lea.vmem %s36_s27, 32768  ;;  %p4897_p1 = scmp.lt.s32.totalorder %s36_s27, %s36_s27 }
   0x9   :  { %p4893_p0 = scmp.ne.s32.totalorder %s36_s27, %s4892_s28  ;;  %p4898_p2 = scmp.lt.s32.totalorder %s4892_s28, %s4892_s28 }
   0xb   :  { %p4899_p3 = por %p4898_p2, %p4897_p1 }
   0xd   :  { %p4900_p4 = pnand %p4899_p3, %p4893_p0 }
   0xf   :  { %4903 = shalt.err (!%p4900_p4)
}
  0x10   :  { %s4993_s29 = smov 256   ;;  %s4994_s30 = smov 16  }
  0x11   :  { %41 = dma.hbm_to_vmem [thread:$0]  %s5786_s1, 32768, %s36_s27, [#allocation8], %s4993_s29, %s4993_s29, %s4994_s30  }
  0x12   :  { %s4995_s6 = smov [#allocation4]  }
  0x13   :  { %s23_s10 = sshll.u32 %s4995_s6, 4  ;;  %s24_s10 = int_to_ptr.vmem [resolvable:$true] %s23_s10 }
  0x14   :  { %s4912_s11 = scalar_lea.vmem %s24_s10, 16384  ;;  %p4917_p6 = scmp.lt.s32.totalorder %s24_s10, %s24_s10 }
  0x15   :  { %p4913_p5 = scmp.ne.s32.totalorder %s24_s10, %s4912_s11  ;;  %p4918_p7 = scmp.lt.s32.totalorder %s4912_s11, %s4912_s11 }
  0x17   :  { %p4919_p8 = por %p4918_p7, %p4917_p6 }
  0x19   :  { %p4920_p9 = pnand %p4919_p8, %p4913_p5 }
  0x1b   :  { %4923 = shalt.err (!%p4920_p9)
}
  0x1c   :  { %s4996_s12 = smov 1024   ;;  %s4997_s13 = smov 64  }
  0x1d   :  { %29 = dma.hbm_to_vmem [thread:$0]  %s5785_s0, 16384, %s24_s10, [#allocation5], %s4996_s12, %s4996_s12, %s4997_s13  }
  0x1e   :  { %s4998_s16 = smov [#allocation9]   ;;  %s4999_s18 = smov [#allocation10]  }
  0x1f   :  { %s48_s17 = sshll.u32 %s4998_s16, 4  ;;  %s57_s1 = sshll.u32 %s4999_s18, 4  ;;  %s49_s17 = int_to_ptr.vmem [resolvable:$true] %s48_s17  ;;  %s58_s1 = int_to_ptr.vmem [resolvable:$true] %s57_s1 }
  0x20   :  { %s4932_s19 = scalar_lea.vmem %s49_s17, 64  ;;  %p4937_p11 = scmp.lt.s32.totalorder %s49_s17, %s49_s17 }
  0x21   :  { %p4933_p10 = scmp.ne.s32.totalorder %s49_s17, %s4932_s19  ;;  %p4938_p12 = scmp.lt.s32.totalorder %s4932_s19, %s4932_s19 }
  0x23   :  { %p4939_p13 = por %p4938_p12, %p4937_p11 }
  0x25   :  { %p4940_p0 = pnand %p4939_p13, %p4933_p10 }
  0x27   :  { %4943 = shalt.err (!%p4940_p0)
}
  0x28   :  { %51 = dma.hbm_to_vmem [thread:$0]  %s5787_s2, 64, %s49_s17, [#allocation8]  }
  0x29   :  { %s4952_s22 = scalar_lea.vmem %s58_s1, 8192  ;;  %p4957_p2 = scmp.lt.s32.totalorder %s58_s1, %s58_s1 }
  0x2a   :  { %p4953_p1 = scmp.ne.s32.totalorder %s58_s1, %s4952_s22  ;;  %p4958_p3 = scmp.lt.s32.totalorder %s4952_s22, %s4952_s22 }
  0x2c   :  { %p4959_p4 = por %p4958_p3, %p4957_p2 }
  0x2e   :  { %p4960_p5 = pnand %p4959_p4, %p4953_p1 }
  0x30   :  { %4963 = shalt.err (!%p4960_p5)
}
  0x31   :  { %s5000_s0 = smov 128   ;;  %s5001_s23 = smov 8  }
  0x32   :  { %63 = dma.hbm_to_vmem [thread:$0]  %s5788_s3, 8192, %s58_s1, [#allocation11], %s5000_s0, %s5000_s0, %s5001_s23  }
  0x33   :  { %4984 = dma.done.wait [#allocation5], 16384  }
  0x34   :  { %4985 = vsyncadd [#allocation5], 4294950912 }
  0x35   :  { %4986 = dma.done.wait [#allocation8], 32832  }
  0x36   :  { %4987 = vsyncadd [#allocation8], 4294934464 }
  0x37   :  { %4988 = dma.done.wait [#allocation11], 8192  }
  0x38   :  { %4989 = vsyncadd [#allocation11], 4294959104  ;;  %v4402_v1 = vld [vmem:[#allocation7 + $0xe4] ss:$16 sps:$4 sm:$0xff]   ;;  %v4406_v3 = vld [vmem:[#allocation7 + $0xe0] ss:$16 sps:$4 sm:$0xff]  }
  0x39   :  { %v4404_v2 = vld [vmem:[#allocation7 + $0x2e4] ss:$16 sps:$4 sm:$0xff]   ;;  %1943 = vmatprep.subr.bf16.mxu0 %v4402_v1  ;;  %v4407_v4 = vld [vmem:[#allocation7 + $0x2e0] ss:$16 sps:$4 sm:$0xff]   ;;  %v216_v47 = vld [vmem:[#allocation4 + $0x8] sm:$0xff] }
  0x3a   :  { %2056 = vmatprep.subr.bf16.mxu1 %v4404_v2  ;;  %v4408_v5 = vld [vmem:[#allocation7 + $0xc4] ss:$16 sps:$4 sm:$0xff]   ;;  %1944 = vmatpush1.bf16.msra.mxu0 %v4406_v3  ;;  %v4412_v7 = vld [vmem:[#allocation7 + $0xc0] ss:$16 sps:$4 sm:$0xff]   ;;  %v224_v48 = vld [vmem:[#allocation4 + $0x48] sm:$0xff] }
  0x3b   :  { %2057 = vmatpush1.bf16.msra.mxu1 %v4407_v4  ;;  %v4410_v6 = vld [vmem:[#allocation7 + $0x2c4] ss:$16 sps:$4 sm:$0xff]   ;;  %1945 = vmatprep.subr.bf16.mxu0 %v4408_v5  ;;  %v4413_v8 = vld [vmem:[#allocation7 + $0x2c0] ss:$16 sps:$4 sm:$0xff]   ;;  %v218_v49 = vld [vmem:[#allocation4 + $0x18] sm:$0xff]  ;;  %v5059_v54 = vpack.c.bf16 %v224_v48, %v216_v47 }
  0x3c   :  { %2058 = vmatprep.subr.bf16.mxu1 %v4410_v6  ;;  %v4414_v9 = vld [vmem:[#allocation7 + $0xa4] ss:$16 sps:$4 sm:$0xff]   ;;  %v4418_v11 = vld [vmem:[#allocation7 + $0xa0] ss:$16 sps:$4 sm:$0xff]   ;;  %v226_v50 = vld [vmem:[#allocation4 + $0x58] sm:$0xff] }
  0x3d   :  { %v4416_v10 = vld [vmem:[#allocation7 + $0x2a4] ss:$16 sps:$4 sm:$0xff]   ;;  %v4419_v12 = vld [vmem:[#allocation7 + $0x2a0] ss:$16 sps:$4 sm:$0xff]   ;;  %v5061_v55 = vpack.c.bf16 %v226_v50, %v218_v49  ;;  %1975 = vmatprep.mubr.bf16.mxu0 %v5059_v54 }
  0x3e   :  { %1946 = vmatpush1.bf16.msra.mxu0 %v4412_v7  ;;  %v4420_v13 = vld [vmem:[#allocation7 + $0x84] ss:$16 sps:$4 sm:$0xff]   ;;  %v4424_v15 = vld [vmem:[#allocation7 + $0x80] ss:$16 sps:$4 sm:$0xff]  }
  0x3f   :  { %2059 = vmatpush1.bf16.msra.mxu1 %v4413_v8  ;;  %1947 = vmatprep.subr.bf16.mxu0 %v4414_v9  ;;  %v4422_v14 = vld [vmem:[#allocation7 + $0x284] ss:$16 sps:$4 sm:$0xff]   ;;  %v4425_v16 = vld [vmem:[#allocation7 + $0x280] ss:$16 sps:$4 sm:$0xff]  }
  0x40   :  { %2060 = vmatprep.subr.bf16.mxu1 %v4416_v10  ;;  %v4426_v17 = vld [vmem:[#allocation7 + $0x64] ss:$16 sps:$4 sm:$0xff]   ;;  %v4430_v19 = vld [vmem:[#allocation7 + $0x60] ss:$16 sps:$4 sm:$0xff]   ;;  %2088 = vmatprep.mubr.bf16.mxu1 %v5061_v55 }
  0x41   :  { %v4428_v18 = vld [vmem:[#allocation7 + $0x264] ss:$16 sps:$4 sm:$0xff]   ;;  %v4431_v20 = vld [vmem:[#allocation7 + $0x260] ss:$16 sps:$4 sm:$0xff]  }
  0x42   :  { %1948 = vmatpush1.bf16.msra.mxu0 %v4418_v11  ;;  %v4432_v21 = vld [vmem:[#allocation7 + $0x44] ss:$16 sps:$4 sm:$0xff]   ;;  %v4436_v23 = vld [vmem:[#allocation7 + $0x40] ss:$16 sps:$4 sm:$0xff]  }
  0x43   :  { %2061 = vmatpush1.bf16.msra.mxu1 %v4419_v12  ;;  %1949 = vmatprep.subr.bf16.mxu0 %v4420_v13  ;;  %v4434_v22 = vld [vmem:[#allocation7 + $0x244] ss:$16 sps:$4 sm:$0xff]   ;;  %v4437_v24 = vld [vmem:[#allocation7 + $0x240] ss:$16 sps:$4 sm:$0xff]  }
  0x44   :  { %2062 = vmatprep.subr.bf16.mxu1 %v4422_v14  ;;  %v4438_v25 = vld [vmem:[#allocation7 + $0x24] ss:$16 sps:$4 sm:$0xff]   ;;  %v4442_v27 = vld [vmem:[#allocation7 + $0x20] ss:$16 sps:$4 sm:$0xff]  }
  0x45   :  { %v4440_v26 = vld [vmem:[#allocation7 + $0x224] ss:$16 sps:$4 sm:$0xff]   ;;  %v4443_v28 = vld [vmem:[#allocation7 + $0x220] ss:$16 sps:$4 sm:$0xff]  }
  0x46   :  { %1950 = vmatpush1.bf16.msra.mxu0 %v4424_v15  ;;  %v4444_v29 = vld [vmem:[#allocation7 + $0x4] ss:$16 sps:$4 sm:$0xff]   ;;  %v4448_v31 = vld [vmem:[#allocation7] ss:$16 sps:$4 sm:$0xff]   ;;  %v232_v15 = vld [vmem:[#allocation4 + $0x88] sm:$0xff] }
  0x47   :  { %2063 = vmatpush1.bf16.msra.mxu1 %v4425_v16  ;;  %1951 = vmatprep.subr.bf16.mxu0 %v4426_v17  ;;  %v4446_v30 = vld [vmem:[#allocation7 + $0x204] ss:$16 sps:$4 sm:$0xff]   ;;  %v4449_v32 = vld [vmem:[#allocation7 + $0x200] ss:$16 sps:$4 sm:$0xff]   ;;  %v240_v16 = vld [vmem:[#allocation4 + $0xc8] sm:$0xff] }
  0x48   :  { %2064 = vmatprep.subr.bf16.mxu1 %v4428_v18  ;;  %v4450_v33 = vld [vmem:[#allocation7 + $0x1e4] ss:$16 sps:$4 sm:$0xff]   ;;  %v4454_v35 = vld [vmem:[#allocation7 + $0x1e0] ss:$16 sps:$4 sm:$0xff]  }
  0x49   :  { %v4452_v34 = vld [vmem:[#allocation7 + $0x3e4] ss:$16 sps:$4 sm:$0xff]   ;;  %v4455_v36 = vld [vmem:[#allocation7 + $0x3e0] ss:$16 sps:$4 sm:$0xff]  }
  0x4a   :  { %1952 = vmatpush1.bf16.msra.mxu0 %v4430_v19  ;;  %v4456_v37 = vld [vmem:[#allocation7 + $0x1c4] ss:$16 sps:$4 sm:$0xff]   ;;  %v4460_v39 = vld [vmem:[#allocation7 + $0x1c0] ss:$16 sps:$4 sm:$0xff]   ;;  %v234_v19 = vld [vmem:[#allocation4 + $0x98] sm:$0xff] }
  0x4b   :  { %2065 = vmatpush1.bf16.msra.mxu1 %v4431_v20  ;;  %1953 = vmatprep.subr.bf16.mxu0 %v4432_v21  ;;  %v4458_v38 = vld [vmem:[#allocation7 + $0x3c4] ss:$16 sps:$4 sm:$0xff]   ;;  %v4461_v40 = vld [vmem:[#allocation7 + $0x3c0] ss:$16 sps:$4 sm:$0xff]   ;;  %v242_v20 = vld [vmem:[#allocation4 + $0xd8] sm:$0xff] }
  0x4c   :  { %2066 = vmatprep.subr.bf16.mxu1 %v4434_v22  ;;  %v4462_v41 = vld [vmem:[#allocation7 + $0x1a4] ss:$16 sps:$4 sm:$0xff]   ;;  %v4466_v43 = vld [vmem:[#allocation7 + $0x1a0] ss:$16 sps:$4 sm:$0xff]  }
  0x4d   :  { %v4464_v42 = vld [vmem:[#allocation7 + $0x3a4] ss:$16 sps:$4 sm:$0xff]   ;;  %v4467_v44 = vld [vmem:[#allocation7 + $0x3a0] ss:$16 sps:$4 sm:$0xff]  }
  0x4e   :  { %1954 = vmatpush1.bf16.msra.mxu0 %v4436_v23  ;;  %v4468_v45 = vld [vmem:[#allocation7 + $0x184] ss:$16 sps:$4 sm:$0xff]   ;;  %v4472_v51 = vld [vmem:[#allocation7 + $0x180] ss:$16 sps:$4 sm:$0xff]  }
  0x4f   :  { %2067 = vmatpush1.bf16.msra.mxu1 %v4437_v24  ;;  %1955 = vmatprep.subr.bf16.mxu0 %v4438_v25  ;;  %v4470_v46 = vld [vmem:[#allocation7 + $0x384] ss:$16 sps:$4 sm:$0xff]   ;;  %v4473_v52 = vld [vmem:[#allocation7 + $0x380] ss:$16 sps:$4 sm:$0xff]   ;;  %v5069_v24 = vpack.c.bf16 %v240_v16, %v232_v15  ;;  %v5071_v25 = vpack.c.bf16 %v242_v20, %v234_v19  ;;  %v282_v19 = vld [vmem:[#allocation4 + $0x218] sm:$0xff] }
  0x50   :  { %2068 = vmatprep.subr.bf16.mxu1 %v4440_v26  ;;  %v4474_v53 = vld [vmem:[#allocation7 + $0x164] ss:$16 sps:$4 sm:$0xff]   ;;  %v4478_v57 = vld [vmem:[#allocation7 + $0x160] ss:$16 sps:$4 sm:$0xff]   ;;  %v290_v20 = vld [vmem:[#allocation4 + $0x258] sm:$0xff] }
  0x51   :  { %v4476_v56 = vld [vmem:[#allocation7 + $0x364] ss:$16 sps:$4 sm:$0xff]   ;;  %v4479_v58 = vld [vmem:[#allocation7 + $0x360] ss:$16 sps:$4 sm:$0xff]  }
  0x52   :  { %1956 = vmatpush1.bf16.msra.mxu0 %v4442_v27  ;;  %v4480_v59 = vld [vmem:[#allocation7 + $0x144] ss:$16 sps:$4 sm:$0xff]   ;;  %v4484_v61 = vld [vmem:[#allocation7 + $0x140] ss:$16 sps:$4 sm:$0xff]  }
  0x53   :  { %2069 = vmatpush1.bf16.msra.mxu1 %v4443_v28  ;;  %1957 = vmatprep.subr.bf16.mxu0 %v4444_v29  ;;  %v4482_v60 = vld [vmem:[#allocation7 + $0x344] ss:$16 sps:$4 sm:$0xff]   ;;  %v4485_v62 = vld [vmem:[#allocation7 + $0x340] ss:$16 sps:$4 sm:$0xff]  }
  0x54   :  { %2070 = vmatprep.subr.bf16.mxu1 %v4446_v30  ;;  %v4486_v63 = vld [vmem:[#allocation7 + $0x124] ss:$16 sps:$4 sm:$0xff]   ;;  %v4490_v1 = vld [vmem:[#allocation7 + $0x120] ss:$16 sps:$4 sm:$0xff]  }
  0x55   :  { %v4488_v0 = vld [vmem:[#allocation7 + $0x324] ss:$16 sps:$4 sm:$0xff]   ;;  %v4491_v2 = vld [vmem:[#allocation7 + $0x320] ss:$16 sps:$4 sm:$0xff]  }
  0x56   :  { %1958 = vmatpush1.bf16.msra.mxu0 %v4448_v31  ;;  %v4492_v3 = vld [vmem:[#allocation7 + $0x104] ss:$16 sps:$4 sm:$0xff]   ;;  %v4496_v5 = vld [vmem:[#allocation7 + $0x100] ss:$16 sps:$4 sm:$0xff]  }
  0x57   :  { %2071 = vmatpush1.bf16.msra.mxu1 %v4449_v32  ;;  %1959 = vmatprep.subr.bf16.mxu0 %v4450_v33  ;;  %v4494_v4 = vld [vmem:[#allocation7 + $0x304] ss:$16 sps:$4 sm:$0xff]   ;;  %v4497_v6 = vld [vmem:[#allocation7 + $0x300] ss:$16 sps:$4 sm:$0xff]  }
  0x58   :  { %2072 = vmatprep.subr.bf16.mxu1 %v4452_v34  ;;  %v215_v7 = vld [vmem:[#allocation4] sm:$0xff]  ;;  %v217_v9 = vld [vmem:[#allocation4 + $0x10] sm:$0xff] }
  0x59   :  { %v223_v8 = vld [vmem:[#allocation4 + $0x40] sm:$0xff]  ;;  %v225_v10 = vld [vmem:[#allocation4 + $0x50] sm:$0xff] }
  0x5a   :  { %1960 = vmatpush2.bf16.msra.mxu0 %v4454_v35  ;;  %v4500_v11 = vld [vmem:[#allocation7 + $0x4e4] ss:$16 sps:$4 sm:$0xff]   ;;  %v4498_v13 = vld [vmem:[#allocation7 + $0x4e0] ss:$16 sps:$4 sm:$0xff]   ;;  %v5065_v17 = vpack.c.bf16 %v223_v8, %v215_v7  ;;  %v5067_v18 = vpack.c.bf16 %v225_v10, %v217_v9  ;;  %v248_v35 = vld [vmem:[#allocation4 + $0x108] sm:$0xff] }
  0x5b   :  { %2073 = vmatpush2.bf16.msra.mxu1 %v4455_v36  ;;  %1961 = vmatprep.subr.bf16.mxu0 %v4456_v37  ;;  %v4503_v12 = vld [vmem:[#allocation7 + $0x6e4] ss:$16 sps:$4 sm:$0xff]   ;;  %v4501_v14 = vld [vmem:[#allocation7 + $0x6e0] ss:$16 sps:$4 sm:$0xff]   ;;  %v256_v36 = vld [vmem:[#allocation4 + $0x148] sm:$0xff] }
  0x5c   :  { %2074 = vmatprep.subr.bf16.mxu1 %v4458_v38  ;;  %v4506_v21 = vld [vmem:[#allocation7 + $0x4c4] ss:$16 sps:$4 sm:$0xff]   ;;  %v4504_v23 = vld [vmem:[#allocation7 + $0x4c0] ss:$16 sps:$4 sm:$0xff]  }
  0x5d   :  { %v4509_v22 = vld [vmem:[#allocation7 + $0x6c4] ss:$16 sps:$4 sm:$0xff]   ;;  %v4507_v26 = vld [vmem:[#allocation7 + $0x6c0] ss:$16 sps:$4 sm:$0xff]  }
  0x5e   :  { %1962 = vmatpush2.bf16.msra.mxu0 %v4460_v39  ;;  %v231_v27 = vld [vmem:[#allocation4 + $0x80] sm:$0xff]  ;;  %v233_v29 = vld [vmem:[#allocation4 + $0x90] sm:$0xff]  ;;  %v250_v39 = vld [vmem:[#allocation4 + $0x118] sm:$0xff] }
  0x5f   :  { %2075 = vmatpush2.bf16.msra.mxu1 %v4461_v40  ;;  %1963 = vmatprep.subr.bf16.mxu0 %v4462_v41  ;;  %v239_v28 = vld [vmem:[#allocation4 + $0xc0] sm:$0xff]  ;;  %v241_v30 = vld [vmem:[#allocation4 + $0xd0] sm:$0xff]  ;;  %v258_v40 = vld [vmem:[#allocation4 + $0x158] sm:$0xff] }
  0x60   :  { %2076 = vmatprep.subr.bf16.mxu1 %v4464_v42  ;;  %v4512_v31 = vld [vmem:[#allocation7 + $0x4a4] ss:$16 sps:$4 sm:$0xff]   ;;  %v4510_v33 = vld [vmem:[#allocation7 + $0x4a0] ss:$16 sps:$4 sm:$0xff]   ;;  %v5077_v37 = vpack.c.bf16 %v239_v28, %v231_v27  ;;  %v5079_v38 = vpack.c.bf16 %v241_v30, %v233_v29  ;;  %v5107_v27 = vpack.c.bf16 %v290_v20, %v282_v19 }
  0x61   :  { %v4515_v32 = vld [vmem:[#allocation7 + $0x6a4] ss:$16 sps:$4 sm:$0xff]   ;;  %v4513_v34 = vld [vmem:[#allocation7 + $0x6a0] ss:$16 sps:$4 sm:$0xff]  }
  0x62   :  { %1964 = vmatpush2.bf16.msra.mxu0 %v4466_v43  ;;  %v4518_v41 = vld [vmem:[#allocation7 + $0x484] ss:$16 sps:$4 sm:$0xff]   ;;  %v4516_v43 = vld [vmem:[#allocation7 + $0x480] ss:$16 sps:$4 sm:$0xff]  }
  0x63   :  { %2077 = vmatpush2.bf16.msra.mxu1 %v4467_v44  ;;  %1965 = vmatprep.subr.bf16.mxu0 %v4468_v45  ;;  %v4521_v42 = vld [vmem:[#allocation7 + $0x684] ss:$16 sps:$4 sm:$0xff]   ;;  %v5081_v44 = vpack.c.bf16 %v256_v36, %v248_v35  ;;  %v5083_v45 = vpack.c.bf16 %v258_v40, %v250_v39  ;;  %v4543_v28 = vld [vmem:[#allocation7 + $0x600] ss:$16 sps:$4 sm:$0xff]   ;;  %v296_v39 = vld [vmem:[#allocation4 + $0x288] sm:$0xff] }
  0x64   :  { %2078 = vmatprep.subr.bf16.mxu1 %v4470_v46  ;;  %v4519_v46 = vld [vmem:[#allocation7 + $0x680] ss:$16 sps:$4 sm:$0xff]   ;;  %v4536_v9 = vld [vmem:[#allocation7 + $0x424] ss:$16 sps:$4 sm:$0xff]   ;;  %v304_v40 = vld [vmem:[#allocation4 + $0x2c8] sm:$0xff] }
  0x65   :  { %v247_v47 = vld [vmem:[#allocation4 + $0x100] sm:$0xff]  ;;  %v249_v49 = vld [vmem:[#allocation4 + $0x110] sm:$0xff] }
  0x66   :  { %1966 = vmatpush2.bf16.msra.mxu0 %v4472_v51  ;;  %v255_v48 = vld [vmem:[#allocation4 + $0x140] sm:$0xff]  ;;  %v257_v50 = vld [vmem:[#allocation4 + $0x150] sm:$0xff] }
  0x67   :  { %2079 = vmatpush2.bf16.msra.mxu1 %v4473_v52  ;;  %1967 = vmatprep.subr.bf16.mxu0 %v4474_v53  ;;  %v4524_v51 = vld [vmem:[#allocation7 + $0x464] ss:$16 sps:$4 sm:$0xff]   ;;  %v4522_v53 = vld [vmem:[#allocation7 + $0x460] ss:$16 sps:$4 sm:$0xff]  }
  0x68   :  { %2080 = vmatprep.subr.bf16.mxu1 %v4476_v56  ;;  %v4527_v52 = vld [vmem:[#allocation7 + $0x664] ss:$16 sps:$4 sm:$0xff]   ;;  %v4525_v56 = vld [vmem:[#allocation7 + $0x660] ss:$16 sps:$4 sm:$0xff]  }
  0x69   :  { %v265_v7 = vld [vmem:[#allocation4 + $0x190] sm:$0xff]  ;;  %v279_v29 = vld [vmem:[#allocation4 + $0x200] sm:$0xff] }
  0x6a   :  { %1968 = vmatpush2.bf16.msra.mxu0 %v4478_v57  ;;  %v264_v57 = vld [vmem:[#allocation4 + $0x188] sm:$0xff]  ;;  %v273_v8 = vld [vmem:[#allocation4 + $0x1d0] sm:$0xff]  ;;  %v287_v30 = vld [vmem:[#allocation4 + $0x240] sm:$0xff] }
  0x6b   :  { %2081 = vmatpush2.bf16.msra.mxu1 %v4479_v58  ;;  %1969 = vmatprep.subr.bf16.mxu0 %v4480_v59  ;;  %v272_v58 = vld [vmem:[#allocation4 + $0x1c8] sm:$0xff]  ;;  %v5089_v59 = vpack.c.bf16 %v255_v48, %v247_v47  ;;  %v4539_v10 = vld [vmem:[#allocation7 + $0x624] ss:$16 sps:$4 sm:$0xff]   ;;  %v5103_v16 = vpack.c.bf16 %v273_v8, %v265_v7  ;;  %v4546_v35 = vld [vmem:[#allocation7 + $0x5e0] ss:$16 sps:$4 sm:$0xff]  }
  0x6c   :  { %2082 = vmatprep.subr.bf16.mxu1 %v4482_v60  ;;  %v5091_v60 = vpack.c.bf16 %v257_v50, %v249_v49  ;;  %v4549_v36 = vld [vmem:[#allocation7 + $0x7e0] ss:$16 sps:$4 sm:$0xff]   ;;  %v4554_v47 = vld [vmem:[#allocation7 + $0x5c4] ss:$16 sps:$4 sm:$0xff]   ;;  %v5117_v50 = vpack.c.bf16 %v304_v40, %v296_v39  ;;  %v314_v7 = vld [vmem:[#allocation4 + $0x318] sm:$0xff] }
  0x6d   :  { %v4557_v48 = vld [vmem:[#allocation7 + $0x7c4] ss:$16 sps:$4 sm:$0xff]   ;;  %v4552_v49 = vld [vmem:[#allocation7 + $0x5c0] ss:$16 sps:$4 sm:$0xff]   ;;  %v322_v8 = vld [vmem:[#allocation4 + $0x358] sm:$0xff] }
  0x6e   :  { %1970 = vmatpush2.bf16.msra.mxu0 %v4484_v61  ;;  %v266_v61 = vld [vmem:[#allocation4 + $0x198] sm:$0xff]  ;;  %v311_v19 = vld [vmem:[#allocation4 + $0x300] sm:$0xff] }
  0x6f   :  { %2083 = vmatpush2.bf16.msra.mxu1 %v4485_v62  ;;  %1971 = vmatprep.subr.bf16.mxu0 %v4486_v63  ;;  %v274_v62 = vld [vmem:[#allocation4 + $0x1d8] sm:$0xff]  ;;  %v4530_v63 = vld [vmem:[#allocation7 + $0x444] ss:$16 sps:$4 sm:$0xff]  }
  0x70   :  { %2084 = vmatprep.subr.bf16.mxu1 %v4488_v0  ;;  %v4533_v0 = vld [vmem:[#allocation7 + $0x644] ss:$16 sps:$4 sm:$0xff]  }
  0x71   :  { %v319_v20 = vld [vmem:[#allocation4 + $0x340] sm:$0xff] }
  0x72   :  { %1972 = vmatpush2.bf16.msra.mxu0 %v4490_v1  ;;  %v4528_v1 = vld [vmem:[#allocation7 + $0x440] ss:$16 sps:$4 sm:$0xff]   ;;  %v4578_v39 = vld [vmem:[#allocation7 + $0x544] ss:$16 sps:$4 sm:$0xff]  }
  0x73   :  { %2085 = vmatpush2.bf16.msra.mxu1 %v4491_v2  ;;  %1973 = vmatprep.subr.bf16.mxu0 %v4492_v3  ;;  %v5093_v2 = vpack.c.bf16 %v272_v58, %v264_v57  ;;  %v5095_v3 = vpack.c.bf16 %v274_v62, %v266_v61  ;;  %v297_v57 = vld [vmem:[#allocation4 + $0x290] sm:$0xff] }
  0x74   :  { %2086 = vmatprep.subr.bf16.mxu1 %v4494_v4  ;;  %v4531_v4 = vld [vmem:[#allocation7 + $0x640] ss:$16 sps:$4 sm:$0xff]   ;;  %v4560_v61 = vld [vmem:[#allocation7 + $0x5a4] ss:$16 sps:$4 sm:$0xff]  }
  0x75   :  { %v305_v58 = vld [vmem:[#allocation4 + $0x2d0] sm:$0xff] }
  0x76   :  { %1974 = vmatpush2.bf16.msra.mxu0 %v4496_v5  ;;  %v263_v5 = vld [vmem:[#allocation4 + $0x180] sm:$0xff] }
  0x77   :  { %2087 = vmatpush2.bf16.msra.mxu1 %v4497_v6  ;;  %2169 = vmatprep.subr.bf16.mxu0 %v4500_v11  ;;  %v271_v6 = vld [vmem:[#allocation4 + $0x1c0] sm:$0xff] }
  0x78   :  { %2282 = vmatprep.subr.bf16.mxu1 %v4503_v12  ;;  %v4534_v11 = vld [vmem:[#allocation7 + $0x420] ss:$16 sps:$4 sm:$0xff]   ;;  %v5101_v15 = vpack.c.bf16 %v271_v6, %v263_v5  ;;  %v4563_v62 = vld [vmem:[#allocation7 + $0x7a4] ss:$16 sps:$4 sm:$0xff]   ;;  %v5127_v6 = vpack.c.bf16 %v305_v58, %v297_v57 }
  0x79   :  { %1976 = vmatmul.mubr.bf16.vlgmr.msra.gmra.mxu0 %v5065_v17  ;;  %v4537_v12 = vld [vmem:[#allocation7 + $0x620] ss:$16 sps:$4 sm:$0xff]   ;;  %v4581_v40 = vld [vmem:[#allocation7 + $0x744] ss:$16 sps:$4 sm:$0xff]  }
  0x7a   :  { %2089 = vmatmul.mubr.bf16.vlgmr.msra.gmra.mxu1 %v5067_v18  ;;  %2170 = vmatpush1.bf16.msra.mxu0 %v4498_v13  ;;  %v280_v13 = vld [vmem:[#allocation4 + $0x208] sm:$0xff]  ;;  %v4584_v57 = vld [vmem:[#allocation7 + $0x524] ss:$16 sps:$4 sm:$0xff]  }
  0x7b   :  { %2283 = vmatpush1.bf16.msra.mxu1 %v4501_v14  ;;  %2171 = vmatprep.subr.bf16.mxu0 %v4506_v21  ;;  %v288_v14 = vld [vmem:[#allocation4 + $0x248] sm:$0xff]  ;;  %v4542_v21 = vld [vmem:[#allocation7 + $0x404] ss:$16 sps:$4 sm:$0xff]  }
  0x7c   :  { %2284 = vmatprep.subr.bf16.mxu1 %v4509_v22  ;;  %1985 = vmatprep.mubr.bf16.mxu0 %v5069_v24  ;;  %v4545_v22 = vld [vmem:[#allocation7 + $0x604] ss:$16 sps:$4 sm:$0xff]  }
  0x7d   :  { %2098 = vmatprep.mubr.bf16.mxu1 %v5071_v25  ;;  %v4587_v58 = vld [vmem:[#allocation7 + $0x724] ss:$16 sps:$4 sm:$0xff]  }
  0x7e   :  { %2172 = vmatpush1.bf16.msra.mxu0 %v4504_v23  ;;  %v4540_v23 = vld [vmem:[#allocation7 + $0x400] ss:$16 sps:$4 sm:$0xff]  }
  0x7f   :  { %2285 = vmatpush1.bf16.msra.mxu1 %v4507_v26  ;;  %2173 = vmatprep.subr.bf16.mxu0 %v4512_v31  ;;  %v5105_v26 = vpack.c.bf16 %v288_v14, %v280_v13  ;;  %v281_v31 = vld [vmem:[#allocation4 + $0x210] sm:$0xff]  ;;  %v5131_v13 = vpack.c.bf16 %v322_v8, %v314_v7  ;;  %v222_v7 = vld [vmem:[#allocation4 + $0x38] sm:$0xff] }
  0x80   :  { %2286 = vmatprep.subr.bf16.mxu1 %v4515_v32  ;;  %v289_v32 = vld [vmem:[#allocation4 + $0x250] sm:$0xff]  ;;  %v230_v8 = vld [vmem:[#allocation4 + $0x78] sm:$0xff] }
  0x81   :  { %1986 = vmatmul.mubr.bf16.gmra.mxu0 %v5077_v37  ;;  %v4567_v14 = vld [vmem:[#allocation7 + $0x780] ss:$16 sps:$4 sm:$0xff]  }
  0x82   :  { %2099 = vmatmul.mubr.bf16.gmra.mxu1 %v5079_v38  ;;  %2174 = vmatpush1.bf16.msra.mxu0 %v4510_v33  ;;  %v4548_v33 = vld [vmem:[#allocation7 + $0x5e4] ss:$16 sps:$4 sm:$0xff]  }
  0x83   :  { %2287 = vmatpush1.bf16.msra.mxu1 %v4513_v34  ;;  %2175 = vmatprep.subr.bf16.mxu0 %v4518_v41  ;;  %v4551_v34 = vld [vmem:[#allocation7 + $0x7e4] ss:$16 sps:$4 sm:$0xff]   ;;  %v5113_v41 = vpack.c.bf16 %v287_v30, %v279_v29  ;;  %v4570_v29 = vld [vmem:[#allocation7 + $0x560] ss:$16 sps:$4 sm:$0xff]  }
  0x84   :  { %2288 = vmatprep.subr.bf16.mxu1 %v4521_v42  ;;  %1995 = vmatprep.mubr.bf16.mxu0 %v5081_v44  ;;  %v5115_v42 = vpack.c.bf16 %v289_v32, %v281_v31  ;;  %v4573_v30 = vld [vmem:[#allocation7 + $0x760] ss:$16 sps:$4 sm:$0xff]   ;;  %v328_v31 = vld [vmem:[#allocation4 + $0x388] sm:$0xff] }
  0x85   :  { %2108 = vmatprep.mubr.bf16.mxu1 %v5083_v45  ;;  %v336_v32 = vld [vmem:[#allocation4 + $0x3c8] sm:$0xff] }
  0x86   :  { %2176 = vmatpush1.bf16.msra.mxu0 %v4516_v43  ;;  %v298_v43 = vld [vmem:[#allocation4 + $0x298] sm:$0xff] }
  0x87   :  { %2289 = vmatpush1.bf16.msra.mxu1 %v4519_v46  ;;  %2177 = vmatprep.subr.bf16.mxu0 %v4524_v51  ;;  %v306_v46 = vld [vmem:[#allocation4 + $0x2d8] sm:$0xff] }
  0x88   :  { %2290 = vmatprep.subr.bf16.mxu1 %v4527_v52  ;;  %v5119_v51 = vpack.c.bf16 %v306_v46, %v298_v43  ;;  %v4555_v52 = vld [vmem:[#allocation7 + $0x7c0] ss:$16 sps:$4 sm:$0xff]   ;;  %v5141_v46 = vpack.c.bf16 %v336_v32, %v328_v31  ;;  %v4594_v31 = vld [vmem:[#allocation7 + $0xe8] ss:$16 sps:$4 sm:$0xff]  }
  0x89   :  { %1996 = vmatmul.mubr.bf16.gmra.mxu0 %v5089_v59  ;;  %v4576_v43 = vld [vmem:[#allocation7 + $0x540] ss:$16 sps:$4 sm:$0xff]   ;;  %v4597_v32 = vld [vmem:[#allocation7 + $0x2e8] ss:$16 sps:$4 sm:$0xff]  }
  0x8a   :  { %2109 = vmatmul.mubr.bf16.gmra.mxu1 %v5091_v60  ;;  %2178 = vmatpush1.bf16.msra.mxu0 %v4522_v53  ;;  %v295_v53 = vld [vmem:[#allocation4 + $0x280] sm:$0xff] }
  0x8b   :  { %2291 = vmatpush1.bf16.msra.mxu1 %v4525_v56  ;;  %2179 = vmatprep.subr.bf16.mxu0 %v4530_v63  ;;  %v303_v56 = vld [vmem:[#allocation4 + $0x2c0] sm:$0xff] }
  0x8c   :  { %2292 = vmatprep.subr.bf16.mxu1 %v4533_v0  ;;  %2005 = vmatprep.mubr.bf16.mxu0 %v5093_v2  ;;  %v4558_v63 = vld [vmem:[#allocation7 + $0x5a0] ss:$16 sps:$4 sm:$0xff]   ;;  %v5125_v5 = vpack.c.bf16 %v303_v56, %v295_v53 }
  0x8d   :  { %2118 = vmatprep.mubr.bf16.mxu1 %v5095_v3  ;;  %v4561_v0 = vld [vmem:[#allocation7 + $0x7a0] ss:$16 sps:$4 sm:$0xff]  }
  0x8e   :  { %2180 = vmatpush1.bf16.msra.mxu0 %v4528_v1  ;;  %v312_v1 = vld [vmem:[#allocation4 + $0x308] sm:$0xff]  ;;  %v329_v53 = vld [vmem:[#allocation4 + $0x390] sm:$0xff] }
  0x8f   :  { %2293 = vmatpush1.bf16.msra.mxu1 %v4531_v4  ;;  %2181 = vmatprep.subr.bf16.mxu0 %v4536_v9  ;;  %v320_v4 = vld [vmem:[#allocation4 + $0x348] sm:$0xff]  ;;  %v4566_v9 = vld [vmem:[#allocation7 + $0x584] ss:$16 sps:$4 sm:$0xff]  }
  0x90   :  { %2294 = vmatprep.subr.bf16.mxu1 %v4539_v10  ;;  %v4569_v10 = vld [vmem:[#allocation7 + $0x784] ss:$16 sps:$4 sm:$0xff]  }
  0x91   :  { %2006 = vmatmul.mubr.bf16.gmra.mxu0 %v5101_v15  ;;  %v337_v56 = vld [vmem:[#allocation4 + $0x3d0] sm:$0xff] }
  0x92   :  { %2119 = vmatmul.mubr.bf16.gmra.mxu1 %v5103_v16  ;;  %2182 = vmatpush1.bf16.msra.mxu0 %v4534_v11  ;;  %v4564_v11 = vld [vmem:[#allocation7 + $0x580] ss:$16 sps:$4 sm:$0xff]  }
  0x93   :  { %2295 = vmatpush1.bf16.msra.mxu1 %v4537_v12  ;;  %2183 = vmatprep.subr.bf16.mxu0 %v4542_v21  ;;  %v5129_v12 = vpack.c.bf16 %v320_v4, %v312_v1  ;;  %v313_v21 = vld [vmem:[#allocation4 + $0x310] sm:$0xff]  ;;  %v5151_v4 = vpack.c.bf16 %v337_v56, %v329_v53  ;;  %v4600_v53 = vld [vmem:[#allocation7 + $0xc8] ss:$16 sps:$4 sm:$0xff]  }
  0x94   :  { %2296 = vmatprep.subr.bf16.mxu1 %v4545_v22  ;;  %2015 = vmatprep.mubr.bf16.mxu0 %v5105_v26  ;;  %v321_v22 = vld [vmem:[#allocation4 + $0x350] sm:$0xff] }
  0x95   :  { %2128 = vmatprep.mubr.bf16.mxu1 %v5107_v27 }
  0x96   :  { %2184 = vmatpush1.bf16.msra.mxu0 %v4540_v23  ;;  %v4572_v23 = vld [vmem:[#allocation7 + $0x564] ss:$16 sps:$4 sm:$0xff]  }
  0x97   :  { %2297 = vmatpush1.bf16.msra.mxu1 %v4543_v28  ;;  %2185 = vmatprep.subr.bf16.mxu0 %v4548_v33  ;;  %v4575_v28 = vld [vmem:[#allocation7 + $0x764] ss:$16 sps:$4 sm:$0xff]   ;;  %v5137_v33 = vpack.c.bf16 %v319_v20, %v311_v19  ;;  %v5155_v19 = vpack.c.bf16 %v230_v8, %v222_v7  ;;  %v4591_v20 = vld [vmem:[#allocation7 + $0x700] ss:$16 sps:$4 sm:$0xff]   ;;  %v4608_v7 = vld [vmem:[#allocation7 + $0xac] ss:$16 sps:$4 sm:$0xff]  }
  0x98   :  { %2298 = vmatprep.subr.bf16.mxu1 %v4551_v34  ;;  %v5139_v34 = vpack.c.bf16 %v321_v22, %v313_v21  ;;  %v219_v21 = vld [vmem:[#allocation4 + $0x20] sm:$0xff]  ;;  %v4611_v8 = vld [vmem:[#allocation7 + $0x2ac] ss:$16 sps:$4 sm:$0xff]  }
  0x99   :  { %2016 = vmatmul.mubr.bf16.gmra.mxu0 %v5113_v41  ;;  %v227_v22 = vld [vmem:[#allocation4 + $0x60] sm:$0xff] }
  0x9a   :  { %2129 = vmatmul.mubr.bf16.gmra.mxu1 %v5115_v42  ;;  %2186 = vmatpush2.bf16.msra.mxu0 %v4546_v35  ;;  %v330_v35 = vld [vmem:[#allocation4 + $0x398] sm:$0xff] }
  0x9b   :  { %2299 = vmatpush2.bf16.msra.mxu1 %v4549_v36  ;;  %2187 = vmatprep.subr.bf16.mxu0 %v4554_v47  ;;  %v338_v36 = vld [vmem:[#allocation4 + $0x3d8] sm:$0xff] }
  0x9c   :  { %2300 = vmatprep.subr.bf16.mxu1 %v4557_v48  ;;  %2025 = vmatprep.mubr.bf16.mxu0 %v5117_v50  ;;  %v5143_v47 = vpack.c.bf16 %v338_v36, %v330_v35  ;;  %v4579_v48 = vld [vmem:[#allocation7 + $0x740] ss:$16 sps:$4 sm:$0xff]   ;;  %v236_v35 = vld [vmem:[#allocation4 + $0xa8] sm:$0xff] }
  0x9d   :  { %2138 = vmatprep.mubr.bf16.mxu1 %v5119_v51  ;;  %v244_v36 = vld [vmem:[#allocation4 + $0xe8] sm:$0xff] }
  0x9e   :  { %2188 = vmatpush2.bf16.msra.mxu0 %v4552_v49  ;;  %v327_v49 = vld [vmem:[#allocation4 + $0x380] sm:$0xff]  ;;  %v5165_v56 = vpack.c.bf16 %v244_v36, %v236_v35  ;;  %v4615_v36 = vld [vmem:[#allocation7 + $0x288] ss:$16 sps:$4 sm:$0xff]  }
  0x9f   :  { %2301 = vmatpush2.bf16.msra.mxu1 %v4555_v52  ;;  %2189 = vmatprep.subr.bf16.mxu0 %v4560_v61  ;;  %v335_v52 = vld [vmem:[#allocation4 + $0x3c0] sm:$0xff] }
  0xa0   :  { %2302 = vmatprep.subr.bf16.mxu1 %v4563_v62  ;;  %v4582_v61 = vld [vmem:[#allocation7 + $0x520] ss:$16 sps:$4 sm:$0xff]   ;;  %v5149_v1 = vpack.c.bf16 %v335_v52, %v327_v49  ;;  %v4602_v49 = vld [vmem:[#allocation7 + $0xcc] ss:$16 sps:$4 sm:$0xff]  }
  0xa1   :  { %2026 = vmatmul.mubr.bf16.gmra.mxu0 %v5125_v5  ;;  %v4585_v62 = vld [vmem:[#allocation7 + $0x720] ss:$16 sps:$4 sm:$0xff]   ;;  %v4605_v52 = vld [vmem:[#allocation7 + $0x2cc] ss:$16 sps:$4 sm:$0xff]  }
  0xa2   :  { %2139 = vmatmul.mubr.bf16.gmra.mxu1 %v5127_v6  ;;  %2190 = vmatpush2.bf16.msra.mxu0 %v4558_v63  ;;  %v220_v63 = vld [vmem:[#allocation4 + $0x28] sm:$0xff] }
  0xa3   :  { %2303 = vmatpush2.bf16.msra.mxu1 %v4561_v0  ;;  %2191 = vmatprep.subr.bf16.mxu0 %v4566_v9  ;;  %v228_v0 = vld [vmem:[#allocation4 + $0x68] sm:$0xff]  ;;  %v4590_v9 = vld [vmem:[#allocation7 + $0x504] ss:$16 sps:$4 sm:$0xff]  }
  0xa4   :  { %2304 = vmatprep.subr.bf16.mxu1 %v4569_v10  ;;  %2035 = vmatprep.mubr.bf16.mxu0 %v5129_v12  ;;  %v4593_v10 = vld [vmem:[#allocation7 + $0x704] ss:$16 sps:$4 sm:$0xff]  }
  0xa5   :  { %2148 = vmatprep.mubr.bf16.mxu1 %v5131_v13 }
  0xa6   :  { %2192 = vmatpush2.bf16.msra.mxu0 %v4564_v11  ;;  %v4588_v11 = vld [vmem:[#allocation7 + $0x500] ss:$16 sps:$4 sm:$0xff]  }
  0xa7   :  { %2305 = vmatpush2.bf16.msra.mxu1 %v4567_v14  ;;  %2193 = vmatprep.subr.bf16.mxu0 %v4572_v23  ;;  %v5153_v14 = vpack.c.bf16 %v228_v0, %v220_v63  ;;  %v221_v23 = vld [vmem:[#allocation4 + $0x30] sm:$0xff] }
  0xa8   :  { %2306 = vmatprep.subr.bf16.mxu1 %v4575_v28  ;;  %v229_v28 = vld [vmem:[#allocation4 + $0x70] sm:$0xff] }
  0xa9   :  { %2036 = vmatmul.mubr.bf16.gmra.mxu0 %v5137_v33  ;;  %v237_v63 = vld [vmem:[#allocation4 + $0xb0] sm:$0xff] }
  0xaa   :  { %2149 = vmatmul.mubr.bf16.gmra.mxu1 %v5139_v34  ;;  %2194 = vmatpush2.bf16.msra.mxu0 %v4570_v29  ;;  %v4596_v29 = vld [vmem:[#allocation7 + $0xec] ss:$16 sps:$4 sm:$0xff]   ;;  %v245_v0 = vld [vmem:[#allocation4 + $0xf0] sm:$0xff] }
  0xab   :  { %2307 = vmatpush2.bf16.msra.mxu1 %v4573_v30  ;;  %2195 = vmatprep.subr.bf16.mxu0 %v4578_v39  ;;  %v4599_v30 = vld [vmem:[#allocation7 + $0x2ec] ss:$16 sps:$4 sm:$0xff]   ;;  %v5161_v39 = vpack.c.bf16 %v227_v22, %v219_v21  ;;  %v5175_v22 = vpack.c.bf16 %v245_v0, %v237_v63 }
  0xac   :  { %2308 = vmatprep.subr.bf16.mxu1 %v4581_v40  ;;  %2045 = vmatprep.mubr.bf16.mxu0 %v5141_v46  ;;  %v5163_v40 = vpack.c.bf16 %v229_v28, %v221_v23  ;;  %v254_v23 = vld [vmem:[#allocation4 + $0x138] sm:$0xff]  ;;  %v268_v63 = vld [vmem:[#allocation4 + $0x1a8] sm:$0xff] }
  0xad   :  { %2158 = vmatprep.mubr.bf16.mxu1 %v5143_v47  ;;  %v262_v28 = vld [vmem:[#allocation4 + $0x178] sm:$0xff]  ;;  %v276_v0 = vld [vmem:[#allocation4 + $0x1e8] sm:$0xff] }
  0xae   :  { %2196 = vmatpush2.bf16.msra.mxu0 %v4576_v43  ;;  %v238_v43 = vld [vmem:[#allocation4 + $0xb8] sm:$0xff]  ;;  %v5179_v35 = vpack.c.bf16 %v262_v28, %v254_v23  ;;  %v5189_v28 = vpack.c.bf16 %v276_v0, %v268_v63  ;;  %v284_v63 = vld [vmem:[#allocation4 + $0x228] sm:$0xff] }
  0xaf   :  { %2309 = vmatpush2.bf16.msra.mxu1 %v4579_v48  ;;  %2197 = vmatprep.subr.bf16.mxu0 %v4584_v57  ;;  %v246_v48 = vld [vmem:[#allocation4 + $0xf8] sm:$0xff]  ;;  %v292_v0 = vld [vmem:[#allocation4 + $0x268] sm:$0xff] }
  0xb0   :  { %2310 = vmatprep.subr.bf16.mxu1 %v4587_v58  ;;  %v5167_v57 = vpack.c.bf16 %v246_v48, %v238_v43  ;;  %v4603_v58 = vld [vmem:[#allocation7 + $0x2c8] ss:$16 sps:$4 sm:$0xff]   ;;  %5814 = vst [vmem:[#allocation18_spill] sm:$0xff] %v5179_v35  ;;  %v251_v43 = vld [vmem:[#allocation4 + $0x120] sm:$0xff]  ;;  %5817 = vst [vmem:[#allocation21_spill] sm:$0xff] %v5189_v28 }
  0xb1   :  { %2046 = vmatmul.mubr.bf16.gmra.mxu0 %v5149_v1  ;;  %v259_v48 = vld [vmem:[#allocation4 + $0x160] sm:$0xff]  ;;  %v4624_v23 = vld [vmem:[#allocation7 + $0x48] ss:$16 sps:$4 sm:$0xff]  }
  0xb2   :  { %2159 = vmatmul.mubr.bf16.gmra.mxu1 %v5151_v4  ;;  %2198 = vmatpush2.bf16.msra.mxu0 %v4582_v61  ;;  %v235_v61 = vld [vmem:[#allocation4 + $0xa0] sm:$0xff] }
  0xb3   :  { %2311 = vmatpush2.bf16.msra.mxu1 %v4585_v62  ;;  %2199 = vmatprep.subr.bf16.mxu0 %v4590_v9  ;;  %v243_v62 = vld [vmem:[#allocation4 + $0xe0] sm:$0xff]  ;;  %v4606_v9 = vld [vmem:[#allocation7 + $0xa8] ss:$16 sps:$4 sm:$0xff]  }
  0xb4   :  { %2312 = vmatprep.subr.bf16.mxu1 %v4593_v10  ;;  %2201 = vmatprep.mubr.bf16.mxu0 %v5153_v14  ;;  %v4609_v10 = vld [vmem:[#allocation7 + $0x2a8] ss:$16 sps:$4 sm:$0xff]   ;;  %v5173_v21 = vpack.c.bf16 %v243_v62, %v235_v61 }
  0xb5   :  { %2314 = vmatprep.mubr.bf16.mxu1 %v5155_v19  ;;  %v4618_v61 = vld [vmem:[#allocation7 + $0x68] ss:$16 sps:$4 sm:$0xff]  }
  0xb6   :  { %2200 = vmatpush2.bf16.msra.mxu0 %v4588_v11  ;;  %v252_v11 = vld [vmem:[#allocation4 + $0x128] sm:$0xff] }
  0xb7   :  { %2313 = vmatpush2.bf16.msra.mxu1 %v4591_v20  ;;  %2395 = vmatprep.subr.bf16.mxu0 %v4596_v29  ;;  %v260_v20 = vld [vmem:[#allocation4 + $0x168] sm:$0xff] }
  0xb8   :  { %2508 = vmatprep.subr.bf16.mxu1 %v4599_v30  ;;  %v4614_v29 = vld [vmem:[#allocation7 + $0x8c] ss:$16 sps:$4 sm:$0xff]   ;;  %v4621_v62 = vld [vmem:[#allocation7 + $0x268] ss:$16 sps:$4 sm:$0xff]  }
  0xb9   :  { %2202 = vmatmul.mubr.bf16.vlgmr.msra.gmra.mxu0 %v5161_v39  ;;  %v4617_v30 = vld [vmem:[#allocation7 + $0x28c] ss:$16 sps:$4 sm:$0xff]  }
  0xba   :  { %2315 = vmatmul.mubr.bf16.vlgmr.msra.gmra.mxu1 %v5163_v40  ;;  %2396 = vmatpush1.bf16.msra.mxu0 %v4594_v31  ;;  %v4612_v31 = vld [vmem:[#allocation7 + $0x88] ss:$16 sps:$4 sm:$0xff]  }
  0xbb   :  { %2509 = vmatpush1.bf16.msra.mxu1 %v4597_v32  ;;  %2397 = vmatprep.subr.bf16.mxu0 %v4602_v49  ;;  %v5177_v32 = vpack.c.bf16 %v260_v20, %v252_v11  ;;  %v253_v49 = vld [vmem:[#allocation4 + $0x130] sm:$0xff]  ;;  %v4626_v11 = vld [vmem:[#allocation7 + $0x4c] ss:$16 sps:$4 sm:$0xff]  }
  0xbc   :  { %2510 = vmatprep.subr.bf16.mxu1 %v4605_v52  ;;  %2211 = vmatprep.mubr.bf16.mxu0 %v5165_v56  ;;  %v261_v52 = vld [vmem:[#allocation4 + $0x170] sm:$0xff]  ;;  %v4629_v20 = vld [vmem:[#allocation7 + $0x24c] ss:$16 sps:$4 sm:$0xff]  }
  0xbd   :  { %2324 = vmatprep.mubr.bf16.mxu1 %v5167_v57  ;;  %5813 = vst [vmem:[#allocation17_spill] sm:$0xff] %v5177_v32 }
  0xbe   :  { %2398 = vmatpush1.bf16.msra.mxu0 %v4600_v53  ;;  %v4620_v53 = vld [vmem:[#allocation7 + $0x6c] ss:$16 sps:$4 sm:$0xff]  }
  0xbf   :  { %2511 = vmatpush1.bf16.msra.mxu1 %v4603_v58  ;;  %2399 = vmatprep.subr.bf16.mxu0 %v4608_v7  ;;  %v4623_v58 = vld [vmem:[#allocation7 + $0x26c] ss:$16 sps:$4 sm:$0xff]   ;;  %v5185_v7 = vpack.c.bf16 %v259_v48, %v251_v43  ;;  %v267_v43 = vld [vmem:[#allocation4 + $0x1a0] sm:$0xff] }
  0xc0   :  { %2512 = vmatprep.subr.bf16.mxu1 %v4611_v8  ;;  %v5187_v8 = vpack.c.bf16 %v261_v52, %v253_v49  ;;  %v275_v48 = vld [vmem:[#allocation4 + $0x1e0] sm:$0xff]  ;;  %v4632_v49 = vld [vmem:[#allocation7 + $0x2c] ss:$16 sps:$4 sm:$0xff]  }
  0xc1   :  { %2212 = vmatmul.mubr.bf16.gmra.mxu0 %v5173_v21  ;;  %5815 = vst [vmem:[#allocation19_spill] sm:$0xff] %v5185_v7  ;;  %v4635_v52 = vld [vmem:[#allocation7 + $0x22c] ss:$16 sps:$4 sm:$0xff]  }
  0xc2   :  { %2325 = vmatmul.mubr.bf16.gmra.mxu1 %v5175_v22  ;;  %2400 = vmatpush1.bf16.msra.mxu0 %v4606_v9  ;;  %5816 = vst [vmem:[#allocation20_spill] sm:$0xff] %v5187_v8  ;;  %v270_v9 = vld [vmem:[#allocation4 + $0x1b8] sm:$0xff] }
  0xc3   :  { %2513 = vmatpush1.bf16.msra.mxu1 %v4609_v10  ;;  %2401 = vmatprep.subr.bf16.mxu0 %v4614_v29  ;;  %v278_v10 = vld [vmem:[#allocation4 + $0x1f8] sm:$0xff] }
  0xc4   :  { %2514 = vmatprep.subr.bf16.mxu1 %v4617_v30  ;;  %2221 = vmatprep.mubr.bf16.mxu0 %v5177_v32  ;;  %v5191_v29 = vpack.c.bf16 %v278_v10, %v270_v9  ;;  %v4627_v30 = vld [vmem:[#allocation7 + $0x248] ss:$16 sps:$4 sm:$0xff]   ;;  %v5197_v9 = vpack.c.bf16 %v275_v48, %v267_v43  ;;  %v283_v48 = vld [vmem:[#allocation4 + $0x220] sm:$0xff] }
  0xc5   :  { %2334 = vmatprep.mubr.bf16.mxu1 %v5179_v35  ;;  %v4639_v43 = vld [vmem:[#allocation7 + $0x208] ss:$16 sps:$4 sm:$0xff]   ;;  %v315_v35 = vld [vmem:[#allocation4 + $0x320] sm:$0xff] }
  0xc6   :  { %2402 = vmatpush1.bf16.msra.mxu0 %v4612_v31  ;;  %5818 = vst [vmem:[#allocation22_spill] sm:$0xff] %v5191_v29  ;;  %v269_v31 = vld [vmem:[#allocation4 + $0x1b0] sm:$0xff]  ;;  %5819 = vst [vmem:[#allocation23_spill] sm:$0xff] %v5197_v9  ;;  %v323_v32 = vld [vmem:[#allocation4 + $0x360] sm:$0xff] }
  0xc7   :  { %2515 = vmatpush1.bf16.msra.mxu1 %v4615_v36  ;;  %2403 = vmatprep.subr.bf16.mxu0 %v4620_v53  ;;  %v277_v36 = vld [vmem:[#allocation4 + $0x1f0] sm:$0xff]  ;;  %v4630_v53 = vld [vmem:[#allocation7 + $0x28] ss:$16 sps:$4 sm:$0xff]  }
  0xc8   :  { %2516 = vmatprep.subr.bf16.mxu1 %v4623_v58  ;;  %v4633_v58 = vld [vmem:[#allocation7 + $0x228] ss:$16 sps:$4 sm:$0xff]   ;;  %v5199_v10 = vpack.c.bf16 %v277_v36, %v269_v31  ;;  %v291_v31 = vld [vmem:[#allocation4 + $0x260] sm:$0xff]  ;;  %v4644_v36 = vld [vmem:[#allocation7 + $0x1ec] ss:$16 sps:$4 sm:$0xff]  }
  0xc9   :  { %2222 = vmatmul.mubr.bf16.gmra.mxu0 %v5185_v7 }
  0xca   :  { %2335 = vmatmul.mubr.bf16.gmra.mxu1 %v5187_v8  ;;  %2404 = vmatpush1.bf16.msra.mxu0 %v4618_v61  ;;  %5820 = vst [vmem:[#allocation24_spill] sm:$0xff] %v5199_v10  ;;  %v286_v61 = vld [vmem:[#allocation4 + $0x238] sm:$0xff] }
  0xcb   :  { %2517 = vmatpush1.bf16.msra.mxu1 %v4621_v62  ;;  %2405 = vmatprep.subr.bf16.mxu0 %v4626_v11  ;;  %v294_v62 = vld [vmem:[#allocation4 + $0x278] sm:$0xff] }
  0xcc   :  { %2518 = vmatprep.subr.bf16.mxu1 %v4629_v20  ;;  %2231 = vmatprep.mubr.bf16.mxu0 %v5189_v28  ;;  %v4638_v8 = vld [vmem:[#allocation7 + $0xc] ss:$16 sps:$4 sm:$0xff]   ;;  %v4636_v20 = vld [vmem:[#allocation7 + $0x8] ss:$16 sps:$4 sm:$0xff]   ;;  %v5201_v28 = vpack.c.bf16 %v292_v0, %v284_v63 }
  0xcd   :  { %2344 = vmatprep.mubr.bf16.mxu1 %v5191_v29  ;;  %v4641_v11 = vld [vmem:[#allocation7 + $0x20c] ss:$16 sps:$4 sm:$0xff]   ;;  %v5203_v29 = vpack.c.bf16 %v294_v62, %v286_v61  ;;  %v4645_v63 = vld [vmem:[#allocation7 + $0x3e8] ss:$16 sps:$4 sm:$0xff]   ;;  %v5209_v62 = vpack.c.bf16 %v291_v31, %v283_v48  ;;  %v299_v31 = vld [vmem:[#allocation4 + $0x2a0] sm:$0xff] }
  0xce   :  { %2406 = vmatpush1.bf16.msra.mxu0 %v4624_v23  ;;  %5821 = vst [vmem:[#allocation25_spill] sm:$0xff] %v5201_v28  ;;  %v285_v23 = vld [vmem:[#allocation4 + $0x230] sm:$0xff]  ;;  %v300_v0 = vld [vmem:[#allocation4 + $0x2a8] sm:$0xff] }
  0xcf   :  { %2519 = vmatpush1.bf16.msra.mxu1 %v4627_v30  ;;  %2407 = vmatprep.subr.bf16.mxu0 %v4632_v49  ;;  %5822 = vst [vmem:[#allocation26_spill] sm:$0xff] %v5203_v29  ;;  %v293_v30 = vld [vmem:[#allocation4 + $0x270] sm:$0xff]  ;;  %v4647_v49 = vld [vmem:[#allocation7 + $0x3ec] ss:$16 sps:$4 sm:$0xff]   ;;  %5823 = vst [vmem:[#allocation27_spill] sm:$0xff] %v5209_v62 }
  0xd0   :  { %2520 = vmatprep.subr.bf16.mxu1 %v4635_v52  ;;  %v4642_v52 = vld [vmem:[#allocation7 + $0x1e8] ss:$16 sps:$4 sm:$0xff]  }
  0xd1   :  { %2232 = vmatmul.mubr.bf16.gmra.mxu0 %v5197_v9  ;;  %v308_v61 = vld [vmem:[#allocation4 + $0x2e8] sm:$0xff] }
  0xd2   :  { %2345 = vmatmul.mubr.bf16.gmra.mxu1 %v5199_v10  ;;  %2408 = vmatpush1.bf16.msra.mxu0 %v4630_v53  ;;  %v5211_v10 = vpack.c.bf16 %v293_v30, %v285_v23  ;;  %v302_v53 = vld [vmem:[#allocation4 + $0x2b8] sm:$0xff]  ;;  %v307_v23 = vld [vmem:[#allocation4 + $0x2e0] sm:$0xff] }
  0xd3   :  { %2521 = vmatpush1.bf16.msra.mxu1 %v4633_v58  ;;  %2409 = vmatprep.subr.bf16.mxu0 %v4638_v8  ;;  %v310_v58 = vld [vmem:[#allocation4 + $0x2f8] sm:$0xff] }
  0xd4   :  { %2522 = vmatprep.subr.bf16.mxu1 %v4641_v11  ;;  %2241 = vmatprep.mubr.bf16.mxu0 %v5201_v28  ;;  %5824 = vst [vmem:[#allocation28_spill] sm:$0xff] %v5211_v10  ;;  %v4650_v9 = vld [vmem:[#allocation7 + $0x1cc] ss:$16 sps:$4 sm:$0xff]   ;;  %v4648_v11 = vld [vmem:[#allocation7 + $0x1c8] ss:$16 sps:$4 sm:$0xff]   ;;  %v5213_v28 = vpack.c.bf16 %v308_v61, %v300_v0 }
  0xd5   :  { %2354 = vmatprep.mubr.bf16.mxu1 %v5203_v29  ;;  %v4653_v8 = vld [vmem:[#allocation7 + $0x3cc] ss:$16 sps:$4 sm:$0xff]   ;;  %v5215_v29 = vpack.c.bf16 %v310_v58, %v302_v53  ;;  %v4651_v48 = vld [vmem:[#allocation7 + $0x3c8] ss:$16 sps:$4 sm:$0xff]   ;;  %v5221_v58 = vpack.c.bf16 %v307_v23, %v299_v31  ;;  %v317_v31 = vld [vmem:[#allocation4 + $0x330] sm:$0xff] }
  0xd6   :  { %2410 = vmatpush1.bf16.msra.mxu0 %v4636_v20  ;;  %5825 = vst [vmem:[#allocation29_spill] sm:$0xff] %v5213_v28  ;;  %v301_v20 = vld [vmem:[#allocation4 + $0x2b0] sm:$0xff]  ;;  %v4656_v30 = vld [vmem:[#allocation7 + $0x1ac] ss:$16 sps:$4 sm:$0xff]   ;;  %v4657_v0 = vld [vmem:[#allocation7 + $0x3a8] ss:$16 sps:$4 sm:$0xff]  }
  0xd7   :  { %2523 = vmatpush1.bf16.msra.mxu1 %v4639_v43  ;;  %2411 = vmatprep.subr.bf16.mxu0 %v4644_v36  ;;  %5826 = vst [vmem:[#allocation30_spill] sm:$0xff] %v5215_v29  ;;  %v309_v43 = vld [vmem:[#allocation4 + $0x2f0] sm:$0xff]  ;;  %v4659_v36 = vld [vmem:[#allocation7 + $0x3ac] ss:$16 sps:$4 sm:$0xff]   ;;  %5827 = vst [vmem:[#allocation31_spill] sm:$0xff] %v5221_v58 }
  0xd8   :  { %2524 = vmatprep.subr.bf16.mxu1 %v4647_v49  ;;  %v4654_v49 = vld [vmem:[#allocation7 + $0x1a8] ss:$16 sps:$4 sm:$0xff]   ;;  %v325_v23 = vld [vmem:[#allocation4 + $0x370] sm:$0xff] }
  0xd9   :  { %2242 = vmatmul.mubr.bf16.gmra.mxu0 %v5209_v62  ;;  %v316_v61 = vld [vmem:[#allocation4 + $0x328] sm:$0xff] }
  0xda   :  { %2355 = vmatmul.mubr.bf16.gmra.mxu1 %v5211_v10  ;;  %2412 = vmatpush2.bf16.msra.mxu0 %v4642_v52  ;;  %v324_v53 = vld [vmem:[#allocation4 + $0x368] sm:$0xff]  ;;  %v5223_v10 = vpack.c.bf16 %v309_v43, %v301_v20  ;;  %v318_v52 = vld [vmem:[#allocation4 + $0x338] sm:$0xff] }
  0xdb   :  { %2525 = vmatpush2.bf16.msra.mxu1 %v4645_v63  ;;  %2413 = vmatprep.subr.bf16.mxu0 %v4650_v9  ;;  %v326_v63 = vld [vmem:[#allocation4 + $0x378] sm:$0xff]  ;;  %v5225_v7 = vpack.c.bf16 %v324_v53, %v316_v61  ;;  %v5233_v61 = vpack.c.bf16 %v323_v32, %v315_v35  ;;  %v5235_v53 = vpack.c.bf16 %v325_v23, %v317_v31  ;;  %v333_v32 = vld [vmem:[#allocation4 + $0x3b0] sm:$0xff] }
  0xdc   :  { %2526 = vmatprep.subr.bf16.mxu1 %v4653_v8  ;;  %2251 = vmatprep.mubr.bf16.mxu0 %v5213_v28  ;;  %5828 = vst [vmem:[#allocation32_spill] sm:$0xff] %v5223_v10  ;;  %v4662_v62 = vld [vmem:[#allocation7 + $0x18c] ss:$16 sps:$4 sm:$0xff]   ;;  %v4660_v8 = vld [vmem:[#allocation7 + $0x188] ss:$16 sps:$4 sm:$0xff]   ;;  %v341_v35 = vld [vmem:[#allocation4 + $0x3f0] sm:$0xff] }
  0xdd   :  { %2364 = vmatprep.mubr.bf16.mxu1 %v5215_v29  ;;  %v4665_v9 = vld [vmem:[#allocation7 + $0x38c] ss:$16 sps:$4 sm:$0xff]   ;;  %v4663_v28 = vld [vmem:[#allocation7 + $0x388] ss:$16 sps:$4 sm:$0xff]   ;;  %5829 = vst [vmem:[#allocation33_spill] sm:$0xff] %v5225_v7  ;;  %v5227_v29 = vpack.c.bf16 %v326_v63, %v318_v52  ;;  %v5247_v23 = vpack.c.bf16 %v341_v35, %v333_v32 }
  0xde   :  { %2414 = vmatpush2.bf16.msra.mxu0 %v4648_v11  ;;  %v4668_v11 = vld [vmem:[#allocation7 + $0x16c] ss:$16 sps:$4 sm:$0xff]   ;;  %v4666_v20 = vld [vmem:[#allocation7 + $0x168] ss:$16 sps:$4 sm:$0xff]  }
  0xdf   :  { %2527 = vmatpush2.bf16.msra.mxu1 %v4651_v48  ;;  %2415 = vmatprep.subr.bf16.mxu0 %v4656_v30  ;;  %5830 = vst [vmem:[#allocation34_spill] sm:$0xff] %v5227_v29  ;;  %v4671_v48 = vld [vmem:[#allocation7 + $0x36c] ss:$16 sps:$4 sm:$0xff]   ;;  %v4669_v43 = vld [vmem:[#allocation7 + $0x368] ss:$16 sps:$4 sm:$0xff]  }
  0xe0   :  { %2528 = vmatprep.subr.bf16.mxu1 %v4659_v36  ;;  %v332_v30 = vld [vmem:[#allocation4 + $0x3a8] sm:$0xff]  ;;  %v334_v52 = vld [vmem:[#allocation4 + $0x3b8] sm:$0xff] }
  0xe1   :  { %2252 = vmatmul.mubr.bf16.gmra.mxu0 %v5221_v58  ;;  %v340_v36 = vld [vmem:[#allocation4 + $0x3e8] sm:$0xff]  ;;  %v342_v63 = vld [vmem:[#allocation4 + $0x3f8] sm:$0xff]  ;;  %v339_v58 = vld [vmem:[#allocation4 + $0x3e0] sm:$0xff] }
  0xe2   :  { %2365 = vmatmul.mubr.bf16.gmra.mxu1 %v5223_v10  ;;  %2416 = vmatpush2.bf16.msra.mxu0 %v4654_v49  ;;  %v4674_v49 = vld [vmem:[#allocation7 + $0x14c] ss:$16 sps:$4 sm:$0xff]   ;;  %v331_v10 = vld [vmem:[#allocation4 + $0x3a0] sm:$0xff]  ;;  %v4705_v35 = vld [vmem:[#allocation7 + $0x6a8] ss:$16 sps:$4 sm:$0xff]  }
  0xe3   :  { %2529 = vmatpush2.bf16.msra.mxu1 %v4657_v0  ;;  %2417 = vmatprep.subr.bf16.mxu0 %v4662_v62  ;;  %v4677_v62 = vld [vmem:[#allocation7 + $0x34c] ss:$16 sps:$4 sm:$0xff]   ;;  %v4672_v0 = vld [vmem:[#allocation7 + $0x148] ss:$16 sps:$4 sm:$0xff]   ;;  %v5245_v31 = vpack.c.bf16 %v339_v58, %v331_v10 }
  0xe4   :  { %2530 = vmatprep.subr.bf16.mxu1 %v4665_v9  ;;  %2261 = vmatprep.mubr.bf16.mxu0 %v5225_v7  ;;  %v4675_v9 = vld [vmem:[#allocation7 + $0x348] ss:$16 sps:$4 sm:$0xff]   ;;  %v5237_v7 = vpack.c.bf16 %v340_v36, %v332_v30  ;;  %v4686_v30 = vld [vmem:[#allocation7 + $0x10c] ss:$16 sps:$4 sm:$0xff]  }
  0xe5   :  { %2374 = vmatprep.mubr.bf16.mxu1 %v5227_v29  ;;  %v5239_v29 = vpack.c.bf16 %v342_v63, %v334_v52  ;;  %v4687_v36 = vld [vmem:[#allocation7 + $0x308] ss:$16 sps:$4 sm:$0xff]   ;;  %v4692_v10 = vld [vmem:[#allocation7 + $0x4ec] ss:$16 sps:$4 sm:$0xff]  }
  0xe6   :  { %2418 = vmatpush2.bf16.msra.mxu0 %v4660_v8  ;;  %v4683_v8 = vld [vmem:[#allocation7 + $0x32c] ss:$16 sps:$4 sm:$0xff]   ;;  %v4690_v52 = vld [vmem:[#allocation7 + $0x4e8] ss:$16 sps:$4 sm:$0xff]  }
  0xe7   :  { %2531 = vmatpush2.bf16.msra.mxu1 %v4663_v28  ;;  %2419 = vmatprep.subr.bf16.mxu0 %v4668_v11  ;;  %v4680_v28 = vld [vmem:[#allocation7 + $0x12c] ss:$16 sps:$4 sm:$0xff]   ;;  %v4678_v11 = vld [vmem:[#allocation7 + $0x128] ss:$16 sps:$4 sm:$0xff]  }
  0xe8   :  { %2532 = vmatprep.subr.bf16.mxu1 %v4671_v48  ;;  %v4681_v48 = vld [vmem:[#allocation7 + $0x328] ss:$16 sps:$4 sm:$0xff]   ;;  %v4695_v58 = vld [vmem:[#allocation7 + $0x6ec] ss:$16 sps:$4 sm:$0xff]  }
  0xe9   :  { %2262 = vmatmul.mubr.bf16.gmra.mxu0 %v5233_v61  ;;  %v4693_v63 = vld [vmem:[#allocation7 + $0x6e8] ss:$16 sps:$4 sm:$0xff]   ;;  %v4704_v32 = vld [vmem:[#allocation7 + $0x4ac] ss:$16 sps:$4 sm:$0xff]  }
  0xea   :  { %2375 = vmatmul.mubr.bf16.gmra.mxu1 %v5235_v53  ;;  %2420 = vmatpush2.bf16.msra.mxu0 %v4666_v20  ;;  %v4689_v20 = vld [vmem:[#allocation7 + $0x30c] ss:$16 sps:$4 sm:$0xff]  }
  0xeb   :  { %2533 = vmatpush2.bf16.msra.mxu1 %v4669_v43  ;;  %2421 = vmatprep.subr.bf16.mxu0 %v4674_v49  ;;  %v4684_v43 = vld [vmem:[#allocation7 + $0x108] ss:$16 sps:$4 sm:$0xff]   ;;  %v4698_v49 = vld [vmem:[#allocation7 + $0x4cc] ss:$16 sps:$4 sm:$0xff]  }
  0xec   :  { %2534 = vmatprep.subr.bf16.mxu1 %v4677_v62  ;;  %2271 = vmatprep.mubr.bf16.mxu0 %v5237_v7  ;;  %v4701_v62 = vld [vmem:[#allocation7 + $0x6cc] ss:$16 sps:$4 sm:$0xff]  }
  0xed   :  { %2384 = vmatprep.mubr.bf16.mxu1 %v5239_v29 }
  0xee   :  { %2422 = vmatpush2.bf16.msra.mxu0 %v4672_v0  ;;  %v4696_v0 = vld [vmem:[#allocation7 + $0x4c8] ss:$16 sps:$4 sm:$0xff]  }
  0xef   :  { %2535 = vmatpush2.bf16.msra.mxu1 %v4675_v9  ;;  %2423 = vmatprep.subr.bf16.mxu0 %v4680_v28  ;;  %v4699_v9 = vld [vmem:[#allocation7 + $0x6c8] ss:$16 sps:$4 sm:$0xff]   ;;  %v4710_v28 = vld [vmem:[#allocation7 + $0x48c] ss:$16 sps:$4 sm:$0xff]  }
  0xf0   :  { %2536 = vmatprep.subr.bf16.mxu1 %v4683_v8  ;;  %v4711_v8 = vld [vmem:[#allocation7 + $0x688] ss:$16 sps:$4 sm:$0xff]  }
  0xf1   :  { %2272 = vmatmul.mubr.bf16.gmra.mxu0 %v5245_v31 }
  0xf2   :  { %2385 = vmatmul.mubr.bf16.gmra.mxu1 %v5247_v23  ;;  %2424 = vmatpush2.bf16.msra.mxu0 %v4678_v11  ;;  %v4716_v11 = vld [vmem:[#allocation7 + $0x46c] ss:$16 sps:$4 sm:$0xff]  }
  0xf3   :  { %2537 = vmatpush2.bf16.msra.mxu1 %v4681_v48  ;;  %2425 = vmatprep.subr.bf16.mxu0 %v4686_v30  ;;  %v4717_v48 = vld [vmem:[#allocation7 + $0x668] ss:$16 sps:$4 sm:$0xff]   ;;  %v4722_v30 = vld [vmem:[#allocation7 + $0x44c] ss:$16 sps:$4 sm:$0xff]  }
  0xf4   :  { %2538 = vmatprep.subr.bf16.mxu1 %v4689_v20  ;;  %2427 = vmatprep.mubr.bf16.mxu0 %v5059_v54  ;;  %v4707_v54 = vld [vmem:[#allocation7 + $0x6ac] ss:$16 sps:$4 sm:$0xff]   ;;  %v4723_v20 = vld [vmem:[#allocation7 + $0x648] ss:$16 sps:$4 sm:$0xff]  }
  0xf5   :  { %2540 = vmatprep.mubr.bf16.mxu1 %v5061_v55  ;;  %v4702_v55 = vld [vmem:[#allocation7 + $0x4a8] ss:$16 sps:$4 sm:$0xff]  }
  0xf6   :  { %2426 = vmatpush2.bf16.msra.mxu0 %v4684_v43  ;;  %v4728_v43 = vld [vmem:[#allocation7 + $0x42c] ss:$16 sps:$4 sm:$0xff]  }
  0xf7   :  { %2539 = vmatpush2.bf16.msra.mxu1 %v4687_v36  ;;  %2621 = vmatprep.subr.bf16.mxu0 %v4692_v10  ;;  %v4729_v36 = vld [vmem:[#allocation7 + $0x628] ss:$16 sps:$4 sm:$0xff]   ;;  %v4734_v10 = vld [vmem:[#allocation7 + $0x40c] ss:$16 sps:$4 sm:$0xff]  }
  0xf8   :  { %2734 = vmatprep.subr.bf16.mxu1 %v4695_v58  ;;  %v4735_v58 = vld [vmem:[#allocation7 + $0x608] ss:$16 sps:$4 sm:$0xff]  }
  0xf9   :  { %2428 = vmatmul.mubr.bf16.vlgmr.msra.gmra.mxu0 %v5065_v17  ;;  %v4713_v17 = vld [vmem:[#allocation7 + $0x68c] ss:$16 sps:$4 sm:$0xff]  }
  0xfa   :  { %2541 = vmatmul.mubr.bf16.vlgmr.msra.gmra.mxu1 %v5067_v18  ;;  %2622 = vmatpush1.bf16.msra.mxu0 %v4690_v52  ;;  %v4708_v18 = vld [vmem:[#allocation7 + $0x488] ss:$16 sps:$4 sm:$0xff]   ;;  %v4740_v52 = vld [vmem:[#allocation7 + $0x5ec] ss:$16 sps:$4 sm:$0xff]  }
  0xfb   :  { %2735 = vmatpush1.bf16.msra.mxu1 %v4693_v63  ;;  %2623 = vmatprep.subr.bf16.mxu0 %v4698_v49  ;;  %v4741_v63 = vld [vmem:[#allocation7 + $0x7e8] ss:$16 sps:$4 sm:$0xff]   ;;  %v4746_v49 = vld [vmem:[#allocation7 + $0x5cc] ss:$16 sps:$4 sm:$0xff]  }
  0xfc   :  { %2736 = vmatprep.subr.bf16.mxu1 %v4701_v62  ;;  %2437 = vmatprep.mubr.bf16.mxu0 %v5069_v24  ;;  %v4719_v24 = vld [vmem:[#allocation7 + $0x66c] ss:$16 sps:$4 sm:$0xff]   ;;  %v4747_v62 = vld [vmem:[#allocation7 + $0x7c8] ss:$16 sps:$4 sm:$0xff]  }
  0xfd   :  { %2550 = vmatprep.mubr.bf16.mxu1 %v5071_v25  ;;  %v4714_v25 = vld [vmem:[#allocation7 + $0x468] ss:$16 sps:$4 sm:$0xff]  }
  0xfe   :  { %2624 = vmatpush1.bf16.msra.mxu0 %v4696_v0  ;;  %v4750_v0 = vld [vmem:[#allocation7 + $0x5a8] ss:$16 sps:$4 sm:$0xff]  }
  0xff   :  { %2737 = vmatpush1.bf16.msra.mxu1 %v4699_v9  ;;  %2625 = vmatprep.subr.bf16.mxu0 %v4704_v32  ;;  %v4753_v9 = vld [vmem:[#allocation7 + $0x7a8] ss:$16 sps:$4 sm:$0xff]  }
 0x100   :  { %2738 = vmatprep.subr.bf16.mxu1 %v4707_v54  ;;  %v4756_v32 = vld [vmem:[#allocation7 + $0x588] ss:$16 sps:$4 sm:$0xff]  }
 0x101   :  { %2438 = vmatmul.mubr.bf16.gmra.mxu0 %v5077_v37  ;;  %v4725_v37 = vld [vmem:[#allocation7 + $0x64c] ss:$16 sps:$4 sm:$0xff]   ;;  %v4759_v54 = vld [vmem:[#allocation7 + $0x788] ss:$16 sps:$4 sm:$0xff]  }
 0x102   :  { %2551 = vmatmul.mubr.bf16.gmra.mxu1 %v5079_v38  ;;  %2626 = vmatpush1.bf16.msra.mxu0 %v4702_v55  ;;  %v4720_v38 = vld [vmem:[#allocation7 + $0x448] ss:$16 sps:$4 sm:$0xff]   ;;  %v4764_v55 = vld [vmem:[#allocation7 + $0x56c] ss:$16 sps:$4 sm:$0xff]  }
 0x103   :  { %2739 = vmatpush1.bf16.msra.mxu1 %v4705_v35  ;;  %2627 = vmatprep.subr.bf16.mxu0 %v4710_v28  ;;  %v4767_v35 = vld [vmem:[#allocation7 + $0x76c] ss:$16 sps:$4 sm:$0xff]  }
 0x104   :  { %2740 = vmatprep.subr.bf16.mxu1 %v4713_v17  ;;  %2447 = vmatprep.mubr.bf16.mxu0 %v5081_v44  ;;  %v4731_v44 = vld [vmem:[#allocation7 + $0x62c] ss:$16 sps:$4 sm:$0xff]  }
 0x105   :  { %2560 = vmatprep.mubr.bf16.mxu1 %v5083_v45  ;;  %v4726_v45 = vld [vmem:[#allocation7 + $0x428] ss:$16 sps:$4 sm:$0xff]   ;;  %v4770_v28 = vld [vmem:[#allocation7 + $0x54c] ss:$16 sps:$4 sm:$0xff]  }
 0x106   :  { %2628 = vmatpush1.bf16.msra.mxu0 %v4708_v18  ;;  %v4773_v17 = vld [vmem:[#allocation7 + $0x74c] ss:$16 sps:$4 sm:$0xff]  }
 0x107   :  { %2741 = vmatpush1.bf16.msra.mxu1 %v4711_v8  ;;  %2629 = vmatprep.subr.bf16.mxu0 %v4716_v11  ;;  %v4776_v18 = vld [vmem:[#allocation7 + $0x52c] ss:$16 sps:$4 sm:$0xff]   ;;  %v4777_v8 = vld [vmem:[#allocation7 + $0x728] ss:$16 sps:$4 sm:$0xff]  }
 0x108   :  { %2742 = vmatprep.subr.bf16.mxu1 %v4719_v24  ;;  %v4782_v11 = vld [vmem:[#allocation7 + $0x50c] ss:$16 sps:$4 sm:$0xff]   ;;  %v4783_v24 = vld [vmem:[#allocation7 + $0x708] ss:$16 sps:$4 sm:$0xff]  }
 0x109   :  { %2448 = vmatmul.mubr.bf16.gmra.mxu0 %v5089_v59  ;;  %v4737_v59 = vld [vmem:[#allocation7 + $0x60c] ss:$16 sps:$4 sm:$0xff]  }
 0x10a   :  { %2561 = vmatmul.mubr.bf16.gmra.mxu1 %v5091_v60  ;;  %2630 = vmatpush1.bf16.msra.mxu0 %v4714_v25  ;;  %v4732_v60 = vld [vmem:[#allocation7 + $0x408] ss:$16 sps:$4 sm:$0xff]  }
 0x10b   :  { %2743 = vmatpush1.bf16.msra.mxu1 %v4717_v48  ;;  %2631 = vmatprep.subr.bf16.mxu0 %v4722_v30  ;;  %v4791_v25 = vld [vmem:[#allocation10 + $0x64] ss:$8 sps:$4 sm:$0xff]  }
 0x10c   :  { %2744 = vmatprep.subr.bf16.mxu1 %v4725_v37  ;;  %2457 = vmatprep.mubr.bf16.mxu0 %v5093_v2  ;;  %v4743_v2 = vld [vmem:[#allocation7 + $0x7ec] ss:$16 sps:$4 sm:$0xff]  }
 0x10d   :  { %2570 = vmatprep.mubr.bf16.mxu1 %v5095_v3  ;;  %v4738_v3 = vld [vmem:[#allocation7 + $0x5e8] ss:$16 sps:$4 sm:$0xff]  }
 0x10e   :  { %2632 = vmatpush1.bf16.msra.mxu0 %v4720_v38  ;;  %v4794_v38 = vld [vmem:[#allocation10 + $0x54] ss:$8 sps:$4 sm:$0xff]  }
 0x10f   :  { %2745 = vmatpush1.bf16.msra.mxu1 %v4723_v20  ;;  %2633 = vmatprep.subr.bf16.mxu0 %v4728_v43 }
 0x110   :  { %2746 = vmatprep.subr.bf16.mxu1 %v4731_v44 }
 0x111   :  { %2458 = vmatmul.mubr.bf16.gmra.mxu0 %v5101_v15  ;;  %v4749_v15 = vld [vmem:[#allocation7 + $0x7cc] ss:$16 sps:$4 sm:$0xff]  }
 0x112   :  { %2571 = vmatmul.mubr.bf16.gmra.mxu1 %v5103_v16  ;;  %2634 = vmatpush1.bf16.msra.mxu0 %v4726_v45  ;;  %v4744_v16 = vld [vmem:[#allocation7 + $0x5c8] ss:$16 sps:$4 sm:$0xff]  }
 0x113   :  { %2747 = vmatpush1.bf16.msra.mxu1 %v4729_v36  ;;  %2635 = vmatprep.subr.bf16.mxu0 %v4734_v10  ;;  %v5831_v10 = vld [vmem:[#allocation17_spill] sm:$0xff] }
 0x114   :  { %2748 = vmatprep.subr.bf16.mxu1 %v4737_v59  ;;  %2467 = vmatprep.mubr.bf16.mxu0 %v5105_v26  ;;  %v4752_v26 = vld [vmem:[#allocation7 + $0x5ac] ss:$16 sps:$4 sm:$0xff]   ;;  %v5832_v59 = vld [vmem:[#allocation18_spill] sm:$0xff] }
 0x115   :  { %2580 = vmatprep.mubr.bf16.mxu1 %v5107_v27  ;;  %v4755_v27 = vld [vmem:[#allocation7 + $0x7ac] ss:$16 sps:$4 sm:$0xff]  }
 0x116   :  { %2636 = vmatpush1.bf16.msra.mxu0 %v4732_v60 }
 0x117   :  { %2749 = vmatpush1.bf16.msra.mxu1 %v4735_v58  ;;  %2637 = vmatprep.subr.bf16.mxu0 %v4740_v52  ;;  %v4795_v52 = vld [vmem:[#allocation10 + $0x40] ss:$8 sps:$4 sm:$0xff]  }
 0x118   :  { %2750 = vmatprep.subr.bf16.mxu1 %v4743_v2 }
 0x119   :  { %2468 = vmatmul.mubr.bf16.gmra.mxu0 %v5113_v41  ;;  %v4758_v41 = vld [vmem:[#allocation7 + $0x58c] ss:$16 sps:$4 sm:$0xff]  }
 0x11a   :  { %2581 = vmatmul.mubr.bf16.gmra.mxu1 %v5115_v42  ;;  %2638 = vmatpush2.bf16.msra.mxu0 %v4738_v3  ;;  %v4761_v42 = vld [vmem:[#allocation7 + $0x78c] ss:$16 sps:$4 sm:$0xff]   ;;  %v4800_v3 = vld [vmem:[#allocation10 + $0x34] ss:$8 sps:$4 sm:$0xff]  }
 0x11b   :  { %2751 = vmatpush2.bf16.msra.mxu1 %v4741_v63  ;;  %2639 = vmatprep.subr.bf16.mxu0 %v4746_v49 }
 0x11c   :  { %2752 = vmatprep.subr.bf16.mxu1 %v4749_v15  ;;  %2477 = vmatprep.mubr.bf16.mxu0 %v5117_v50  ;;  %v4762_v50 = vld [vmem:[#allocation7 + $0x568] ss:$16 sps:$4 sm:$0xff]  }
 0x11d   :  { %2590 = vmatprep.mubr.bf16.mxu1 %v5119_v51  ;;  %v4765_v51 = vld [vmem:[#allocation7 + $0x768] ss:$16 sps:$4 sm:$0xff]  }
 0x11e   :  { %2640 = vmatpush2.bf16.msra.mxu0 %v4744_v16  ;;  %v4798_v16 = vld [vmem:[#allocation10 + $0x30] ss:$8 sps:$4 sm:$0xff]  }
 0x11f   :  { %2753 = vmatpush2.bf16.msra.mxu1 %v4747_v62  ;;  %2641 = vmatprep.subr.bf16.mxu0 %v4752_v26  ;;  %v4803_v62 = vld [vmem:[#allocation10 + $0x24] ss:$8 sps:$4 sm:$0xff]  }
 0x120   :  { %2754 = vmatprep.subr.bf16.mxu1 %v4755_v27 }
 0x121   :  { %2478 = vmatmul.mubr.bf16.gmra.mxu0 %v5125_v5  ;;  %v4768_v5 = vld [vmem:[#allocation7 + $0x548] ss:$16 sps:$4 sm:$0xff]  }
 0x122   :  { %2591 = vmatmul.mubr.bf16.gmra.mxu1 %v5127_v6  ;;  %2642 = vmatpush2.bf16.msra.mxu0 %v4750_v0  ;;  %v4771_v6 = vld [vmem:[#allocation7 + $0x748] ss:$16 sps:$4 sm:$0xff]   ;;  %v5833_v0 = vld [vmem:[#allocation19_spill] sm:$0xff] }
 0x123   :  { %2755 = vmatpush2.bf16.msra.mxu1 %v4753_v9  ;;  %2643 = vmatprep.subr.bf16.mxu0 %v4758_v41  ;;  %v5834_v9 = vld [vmem:[#allocation20_spill] sm:$0xff] }
 0x124   :  { %2756 = vmatprep.subr.bf16.mxu1 %v4761_v42  ;;  %2487 = vmatprep.mubr.bf16.mxu0 %v5129_v12  ;;  %v4779_v12 = vld [vmem:[#allocation7 + $0x72c] ss:$16 sps:$4 sm:$0xff]  }
 0x125   :  { %2600 = vmatprep.mubr.bf16.mxu1 %v5131_v13  ;;  %v4774_v13 = vld [vmem:[#allocation7 + $0x528] ss:$16 sps:$4 sm:$0xff]   ;;  %v5835_v42 = vld [vmem:[#allocation21_spill] sm:$0xff] }
 0x126   :  { %2644 = vmatpush2.bf16.msra.mxu0 %v4756_v32  ;;  %v5836_v32 = vld [vmem:[#allocation22_spill] sm:$0xff] }
 0x127   :  { %2757 = vmatpush2.bf16.msra.mxu1 %v4759_v54  ;;  %2645 = vmatprep.subr.bf16.mxu0 %v4764_v55 }
 0x128   :  { %2758 = vmatprep.subr.bf16.mxu1 %v4767_v35  ;;  %v4801_v35 = vld [vmem:[#allocation10 + $0x20] ss:$8 sps:$4 sm:$0xff]  }
 0x129   :  { %2488 = vmatmul.mubr.bf16.gmra.mxu0 %v5137_v33  ;;  %v4785_v33 = vld [vmem:[#allocation7 + $0x70c] ss:$16 sps:$4 sm:$0xff]  }
 0x12a   :  { %2601 = vmatmul.mubr.bf16.gmra.mxu1 %v5139_v34  ;;  %2646 = vmatpush2.bf16.msra.mxu0 %v4762_v50  ;;  %v4780_v34 = vld [vmem:[#allocation7 + $0x508] ss:$16 sps:$4 sm:$0xff]  }
 0x12b   :  { %2759 = vmatpush2.bf16.msra.mxu1 %v4765_v51  ;;  %2647 = vmatprep.subr.bf16.mxu0 %v4770_v28  ;;  %v4806_v51 = vld [vmem:[#allocation10 + $0x14] ss:$8 sps:$4 sm:$0xff]  }
 0x12c   :  { %2760 = vmatprep.subr.bf16.mxu1 %v4773_v17  ;;  %2497 = vmatprep.mubr.bf16.mxu0 %v5141_v46  ;;  %v4788_v46 = vld [vmem:[#allocation10 + $0x74] ss:$8 sps:$4 sm:$0xff]  }
 0x12d   :  { %2610 = vmatprep.mubr.bf16.mxu1 %v5143_v47  ;;  %v4786_v47 = vld [vmem:[#allocation10 + $0x70] ss:$8 sps:$4 sm:$0xff]   ;;  %v4836_v28 = vld [vmem:[#allocation10 + $0x174] ss:$8 sps:$4 sm:$0xff]  }
 0x12e   :  { %2648 = vmatpush2.bf16.msra.mxu0 %v4768_v5 }
 0x12f   :  { %2761 = vmatpush2.bf16.msra.mxu1 %v4771_v6  ;;  %2649 = vmatprep.subr.bf16.mxu0 %v4776_v18  ;;  %v4834_v6 = vld [vmem:[#allocation10 + $0x170] ss:$8 sps:$4 sm:$0xff]  }
 0x130   :  { %2762 = vmatprep.subr.bf16.mxu1 %v4779_v12 }
 0x131   :  { %2498 = vmatmul.mubr.bf16.gmra.mxu0 %v5149_v1 }
 0x132   :  { %2611 = vmatmul.mubr.bf16.gmra.mxu1 %v5151_v4  ;;  %2650 = vmatpush2.bf16.msra.mxu0 %v4774_v13 }
 0x133   :  { %2763 = vmatpush2.bf16.msra.mxu1 %v4777_v8  ;;  %2651 = vmatprep.subr.bf16.mxu0 %v4782_v11  ;;  %v4804_v8 = vld [vmem:[#allocation10 + $0x10] ss:$8 sps:$4 sm:$0xff]   ;;  %v4809_v11 = vld [vmem:[#allocation10 + $0x4] ss:$8 sps:$4 sm:$0xff]  }
 0x134   :  { %2764 = vmatprep.subr.bf16.mxu1 %v4785_v33  ;;  %2653 = vmatprep.mubr.bf16.mxu0 %v5153_v14  ;;  %v4839_v33 = vld [vmem:[#allocation10 + $0x164] ss:$8 sps:$4 sm:$0xff]  }
 0x135   :  { %2766 = vmatprep.mubr.bf16.mxu1 %v5155_v19  ;;  %v4789_v19 = vld [vmem:[#allocation10 + $0x60] ss:$8 sps:$4 sm:$0xff]  }
 0x136   :  { %2652 = vmatpush2.bf16.msra.mxu0 %v4780_v34 }
 0x137   :  { %2765 = vmatpush2.bf16.msra.mxu1 %v4783_v24  ;;  %3684 = vmatprep.subr.bf16.mxu0 %v4788_v46  ;;  %v5837_v46 = vld [vmem:[#allocation23_spill] sm:$0xff] }
 0x138   :  { %3797 = vmatprep.subr.bf16.mxu1 %v4836_v28  ;;  %v4818_v28 = vld [vmem:[#allocation10 + $0xd4] ss:$8 sps:$4 sm:$0xff]  }
 0x139   :  { %v1977_v48 = vpop.f32.mrf.mxu0  ;;  %2654 = vmatmul.mubr.bf16.vlgmr.msra.gmra.mxu0 %v5161_v39 }
 0x13a   :  { %v2090_v1 = vpop.f32.mrf.mxu1  ;;  %2767 = vmatmul.mubr.bf16.vlgmr.msra.gmra.mxu1 %v5163_v40  ;;  %2663 = vmatprep.mubr.bf16.mxu0 %v5165_v56  ;;  %v4792_v56 = vld [vmem:[#allocation10 + $0x50] ss:$8 sps:$4 sm:$0xff]  }
 0x13b   :  { %v5287_v4 = vadd.f32 %v2090_v1, %v1977_v48  ;;  %2776 = vmatprep.mubr.bf16.mxu1 %v5167_v57  ;;  %v1979_v14 = vpop.f32.mrf.mxu0  ;;  %3685 = vmatpush1.bf16.msra.mxu0 %v4786_v47  ;;  %v4797_v57 = vld [vmem:[#allocation10 + $0x44] ss:$8 sps:$4 sm:$0xff]  }
 0x13c   :  { %v2092_v30 = vpop.f32.mrf.mxu1  ;;  %3686 = vmatprep.subr.bf16.mxu0 %v4791_v25  ;;  %3798 = vmatpush1.bf16.msra.mxu1 %v4834_v6  ;;  %v5838_v47 = vld [vmem:[#allocation24_spill] sm:$0xff]  ;;  %v5839_v1 = vld [vmem:[#allocation25_spill] sm:$0xff] }
 0x13d   :  { %v5291_v37 = vadd.f32 %v2092_v30, %v1979_v14  ;;  %v5293_v20 = vpop.f32.mrf.mxu0  ;;  %v4837_v25 = vld [vmem:[#allocation10 + $0x160] ss:$8 sps:$4 sm:$0xff]   ;;  %v5840_v14 = vld [vmem:[#allocation26_spill] sm:$0xff]  ;;  %3799 = vmatprep.subr.bf16.mxu1 %v4839_v33 }
 0x13e   :  { %v5295_v43 = vpop.f32.mrf.mxu1 }
 0x13f   :  { %v5297_v39 = vpop.f32.mrf.mxu0  ;;  %3687 = vmatpush1.bf16.msra.mxu0 %v4789_v19 }
 0x140   :  { %v5299_v40 = vpop.f32.mrf.mxu1  ;;  %3688 = vmatprep.subr.bf16.mxu0 %v4794_v38  ;;  %v4807_v38 = vld [vmem:[#allocation10] ss:$8 sps:$4 sm:$0xff]   ;;  %3800 = vmatpush1.bf16.msra.mxu1 %v4837_v25 }
 0x141   :  { %v1987_v44 = vpop.f32.mrf.mxu0  ;;  %2664 = vmatmul.mubr.bf16.gmra.mxu0 %v5173_v21 }
 0x142   :  { %v2100_v45 = vpop.f32.mrf.mxu1  ;;  %2777 = vmatmul.mubr.bf16.gmra.mxu1 %v5175_v22  ;;  %2673 = vmatprep.mubr.bf16.mxu0 %v5831_v10 }
 0x143   :  { %v5303_v36 = vadd.f32 %v2100_v45, %v1987_v44  ;;  %2786 = vmatprep.mubr.bf16.mxu1 %v5832_v59  ;;  %v1989_v60 = vpop.f32.mrf.mxu0  ;;  %3689 = vmatpush1.bf16.msra.mxu0 %v4792_v56  ;;  %v4842_v44 = vld [vmem:[#allocation10 + $0x154] ss:$8 sps:$4 sm:$0xff]   ;;  %v4840_v59 = vld [vmem:[#allocation10 + $0x150] ss:$8 sps:$4 sm:$0xff]  }
 0x144   :  { %v2102_v58 = vpop.f32.mrf.mxu1  ;;  %3690 = vmatprep.subr.bf16.mxu0 %v4797_v57  ;;  %v4812_v57 = vld [vmem:[#allocation10 + $0xf4] ss:$8 sps:$4 sm:$0xff]   ;;  %3801 = vmatprep.subr.bf16.mxu1 %v4842_v44 }
 0x145   :  { %v5307_v2 = vadd.f32 %v2102_v58, %v1989_v60  ;;  %v1991_v63 = vpop.f32.mrf.mxu0  ;;  %3802 = vmatpush1.bf16.msra.mxu1 %v4840_v59  ;;  %v5848_v44 = vld [vmem:[#allocation34_spill] sm:$0xff]  ;;  %v4819_v59 = vld [vmem:[#allocation10 + $0xc0] ss:$8 sps:$4 sm:$0xff]  }
 0x146   :  { %v2104_v49 = vpop.f32.mrf.mxu1 }
 0x147   :  { %v5309_v15 = vadd.f32 %v2104_v49, %v1991_v63  ;;  %v5311_v21 = vpop.f32.mrf.mxu0  ;;  %3691 = vmatpush1.bf16.msra.mxu0 %v4795_v52  ;;  %v4815_v63 = vld [vmem:[#allocation10 + $0xe4] ss:$8 sps:$4 sm:$0xff]  }
 0x148   :  { %v5313_v22 = vpop.f32.mrf.mxu1  ;;  %3692 = vmatprep.subr.bf16.mxu0 %v4800_v3  ;;  %v4810_v3 = vld [vmem:[#allocation10 + $0xf0] ss:$8 sps:$4 sm:$0xff]   ;;  %v4845_v49 = vld [vmem:[#allocation10 + $0x144] ss:$8 sps:$4 sm:$0xff]  }
 0x149   :  { %v1997_v26 = vpop.f32.mrf.mxu0  ;;  %2674 = vmatmul.mubr.bf16.gmra.mxu0 %v5833_v0  ;;  %v4843_v0 = vld [vmem:[#allocation10 + $0x140] ss:$8 sps:$4 sm:$0xff]   ;;  %3803 = vmatprep.subr.bf16.mxu1 %v4845_v49  ;;  %v4854_v49 = vld [vmem:[#allocation10 + $0x114] ss:$8 sps:$4 sm:$0xff]  }
 0x14a   :  { %v2110_v27 = vpop.f32.mrf.mxu1  ;;  %2787 = vmatmul.mubr.bf16.gmra.mxu1 %v5834_v9  ;;  %2683 = vmatprep.mubr.bf16.mxu0 %v5835_v42  ;;  %v5843_v42 = vld [vmem:[#allocation29_spill] sm:$0xff] }
 0x14b   :  { %v5317_v41 = vadd.f32 %v2110_v27, %v1997_v26  ;;  %2796 = vmatprep.mubr.bf16.mxu1 %v5836_v32  ;;  %v1999_v54 = vpop.f32.mrf.mxu0  ;;  %3693 = vmatpush1.bf16.msra.mxu0 %v4798_v16  ;;  %v5841_v26 = vld [vmem:[#allocation27_spill] sm:$0xff]  ;;  %v5842_v27 = vld [vmem:[#allocation28_spill] sm:$0xff]  ;;  %v5844_v32 = vld [vmem:[#allocation30_spill] sm:$0xff] }
 0x14c   :  { %v2112_v55 = vpop.f32.mrf.mxu1  ;;  %3694 = vmatprep.subr.bf16.mxu0 %v4803_v62  ;;  %3804 = vmatpush1.bf16.msra.mxu1 %v4843_v0 }
 0x14d   :  { %v5321_v50 = vadd.f32 %v2112_v55, %v1999_v54  ;;  %v2001_v17 = vpop.f32.mrf.mxu0 }
 0x14e   :  { %v2114_v5 = vpop.f32.mrf.mxu1 }
 0x14f   :  { %v5323_v18 = vadd.f32 %v2114_v5, %v2001_v17  ;;  %v5325_v12 = vpop.f32.mrf.mxu0  ;;  %3695 = vmatpush1.bf16.msra.mxu0 %v4801_v35  ;;  %v4813_v35 = vld [vmem:[#allocation10 + $0xe0] ss:$8 sps:$4 sm:$0xff]   ;;  %v4848_v17 = vld [vmem:[#allocation10 + $0x134] ss:$8 sps:$4 sm:$0xff]  }
 0x150   :  { %v5327_v13 = vpop.f32.mrf.mxu1  ;;  %3696 = vmatprep.subr.bf16.mxu0 %v4806_v51  ;;  %3805 = vmatprep.subr.bf16.mxu1 %v4848_v17  ;;  %v4855_v17 = vld [vmem:[#allocation10 + $0x100] ss:$8 sps:$4 sm:$0xff]  }
 0x151   :  { %v2007_v34 = vpop.f32.mrf.mxu0  ;;  %2684 = vmatmul.mubr.bf16.gmra.mxu0 %v5837_v46  ;;  %v4821_v46 = vld [vmem:[#allocation10 + $0xc4] ss:$8 sps:$4 sm:$0xff]  }
 0x152   :  { %v2120_v24 = vpop.f32.mrf.mxu1  ;;  %2797 = vmatmul.mubr.bf16.gmra.mxu1 %v5838_v47  ;;  %2693 = vmatprep.mubr.bf16.mxu0 %v5839_v1  ;;  %v4851_v47 = vld [vmem:[#allocation10 + $0x124] ss:$8 sps:$4 sm:$0xff]  }
 0x153   :  { %v5331_v48 = vadd.f32 %v2120_v24, %v2007_v34  ;;  %2806 = vmatprep.mubr.bf16.mxu1 %v5840_v14  ;;  %v2009_v30 = vpop.f32.mrf.mxu0  ;;  %3697 = vmatpush1.bf16.msra.mxu0 %v4804_v8  ;;  %v4846_v8 = vld [vmem:[#allocation10 + $0x130] ss:$8 sps:$4 sm:$0xff]  }
 0x154   :  { %v2122_v19 = vpop.f32.mrf.mxu1  ;;  %3698 = vmatprep.subr.bf16.mxu0 %v4809_v11  ;;  %v4816_v24 = vld [vmem:[#allocation10 + $0xd0] ss:$8 sps:$4 sm:$0xff]   ;;  %3806 = vmatpush1.bf16.msra.mxu1 %v4846_v8 }
 0x155   :  { %v5335_v56 = vadd.f32 %v2122_v19, %v2009_v30  ;;  %v2011_v45 = vpop.f32.mrf.mxu0  ;;  %v5845_v14 = vld [vmem:[#allocation31_spill] sm:$0xff]  ;;  %v5846_v30 = vld [vmem:[#allocation32_spill] sm:$0xff]  ;;  %3807 = vmatprep.subr.bf16.mxu1 %v4851_v47 }
 0x156   :  { %v2124_v10 = vpop.f32.mrf.mxu1  ;;  %v4849_v19 = vld [vmem:[#allocation10 + $0x120] ss:$8 sps:$4 sm:$0xff]   ;;  %v4830_v47 = vld [vmem:[#allocation10 + $0x94] ss:$8 sps:$4 sm:$0xff]  }
 0x157   :  { %v5337_v60 = vadd.f32 %v2124_v10, %v2011_v45  ;;  %v5339_v58 = vpop.f32.mrf.mxu0  ;;  %3699 = vmatpush1.bf16.msra.mxu0 %v4807_v38 }
 0x158   :  { %v5341_v52 = vpop.f32.mrf.mxu1  ;;  %3700 = vmatprep.subr.bf16.mxu0 %v4812_v57  ;;  %v5847_v57 = vld [vmem:[#allocation33_spill] sm:$0xff]  ;;  %3808 = vmatpush1.bf16.msra.mxu1 %v4849_v19  ;;  %v4828_v19 = vld [vmem:[#allocation10 + $0x90] ss:$8 sps:$4 sm:$0xff]  }
 0x159   :  { %v2017_v16 = vpop.f32.mrf.mxu0  ;;  %2694 = vmatmul.mubr.bf16.gmra.mxu0 %v5841_v26  ;;  %v4852_v26 = vld [vmem:[#allocation10 + $0x110] ss:$8 sps:$4 sm:$0xff]   ;;  %3809 = vmatprep.subr.bf16.mxu1 %v4854_v49 }
 0x15a   :  { %v2130_v62 = vpop.f32.mrf.mxu1  ;;  %2807 = vmatmul.mubr.bf16.gmra.mxu1 %v5842_v27  ;;  %2703 = vmatprep.mubr.bf16.mxu0 %v5843_v42 }
 0x15b   :  { %v5345_v9 = vadd.f32 %v2130_v62, %v2017_v16  ;;  %2816 = vmatprep.mubr.bf16.mxu1 %v5844_v32  ;;  %v2019_v54 = vpop.f32.mrf.mxu0  ;;  %3701 = vmatpush2.bf16.msra.mxu0 %v4810_v3  ;;  %v4822_v32 = vld [vmem:[#allocation10 + $0xb0] ss:$8 sps:$4 sm:$0xff]  }
 0x15c   :  { %v2132_v55 = vpop.f32.mrf.mxu1  ;;  %3702 = vmatprep.subr.bf16.mxu0 %v4815_v63  ;;  %v4824_v63 = vld [vmem:[#allocation10 + $0xb4] ss:$8 sps:$4 sm:$0xff]   ;;  %3810 = vmatpush1.bf16.msra.mxu1 %v4852_v26  ;;  %v4831_v26 = vld [vmem:[#allocation10 + $0x80] ss:$8 sps:$4 sm:$0xff]  }
 0x15d   :  { %v5349_v51 = vadd.f32 %v2132_v55, %v2019_v54  ;;  %v2021_v5 = vpop.f32.mrf.mxu0  ;;  %v4827_v54 = vld [vmem:[#allocation10 + $0xa4] ss:$8 sps:$4 sm:$0xff]  }
 0x15e   :  { %v2134_v6 = vpop.f32.mrf.mxu1  ;;  %v4857_v55 = vld [vmem:[#allocation10 + $0x104] ss:$8 sps:$4 sm:$0xff]  }
 0x15f   :  { %v5351_v11 = vadd.f32 %v2134_v6, %v2021_v5  ;;  %v5353_v33 = vpop.f32.mrf.mxu0  ;;  %3703 = vmatpush2.bf16.msra.mxu0 %v4813_v35  ;;  %3811 = vmatprep.subr.bf16.mxu1 %v4857_v55 }
 0x160   :  { %v5355_v34 = vpop.f32.mrf.mxu1  ;;  %3704 = vmatprep.subr.bf16.mxu0 %v4818_v28  ;;  %3812 = vmatpush1.bf16.msra.mxu1 %v4855_v17 }
 0x161   :  { %v2027_v25 = vpop.f32.mrf.mxu0  ;;  %2704 = vmatmul.mubr.bf16.gmra.mxu0 %v5845_v14 }
 0x162   :  { %v2140_v1 = vpop.f32.mrf.mxu1  ;;  %2817 = vmatmul.mubr.bf16.gmra.mxu1 %v5846_v30  ;;  %2713 = vmatprep.mubr.bf16.mxu0 %v5847_v57  ;;  %v3044_v30 = vlaneseq  ;;  %v4833_v57 = vld [vmem:[#allocation10 + $0x84] ss:$8 sps:$4 sm:$0xff]  }
 0x163   :  { %v5359_v38 = vadd.f32 %v2140_v1, %v2027_v25  ;;  %2826 = vmatprep.mubr.bf16.mxu1 %v5848_v44  ;;  %v2029_v45 = vpop.f32.mrf.mxu0  ;;  %3705 = vmatpush2.bf16.msra.mxu0 %v4816_v24  ;;  %v4825_v24 = vld [vmem:[#allocation10 + $0xa0] ss:$8 sps:$4 sm:$0xff]   ;;  %v4858_v1 = vld [vmem:[#allocation10 + $0x1f0] ss:$8 sps:$4 sm:$0xff]   ;;  %v4863_v44 = vld [vmem:[#allocation10 + $0x1e4] ss:$8 sps:$4 sm:$0xff]  }
 0x164   :  { %v2142_v10 = vpop.f32.mrf.mxu1  ;;  %3706 = vmatprep.subr.bf16.mxu0 %v4821_v46  ;;  %v5389_v49 = vshrl.u32 %v3044_v30, 7 }
 0x165   :  { %v5363_v3 = vadd.f32 %v2142_v10, %v2029_v45  ;;  %v2031_v16 = vpop.f32.mrf.mxu0 }
 0x166   :  { %v2144_v62 = vpop.f32.mrf.mxu1 }
 0x167   :  { %v5365_v27 = vadd.f32 %v2144_v62, %v2031_v16  ;;  %v5367_v0 = vpop.f32.mrf.mxu0  ;;  %3707 = vmatpush2.bf16.msra.mxu0 %v4819_v59  ;;  %v4861_v59 = vld [vmem:[#allocation10 + $0x1e0] ss:$8 sps:$4 sm:$0xff]  }
 0x168   :  { %v5369_v42 = vpop.f32.mrf.mxu1  ;;  %3708 = vmatprep.subr.bf16.mxu0 %v4824_v63 }
 0x169   :  { %v2037_v35 = vpop.f32.mrf.mxu0  ;;  %2714 = vmatmul.mubr.bf16.gmra.mxu0 %v5233_v61  ;;  %v4860_v61 = vld [vmem:[#allocation10 + $0x1f4] ss:$8 sps:$4 sm:$0xff]  }
 0x16a   :  { %v2150_v28 = vpop.f32.mrf.mxu1  ;;  %2827 = vmatmul.mubr.bf16.gmra.mxu1 %v5235_v53  ;;  %2723 = vmatprep.mubr.bf16.mxu0 %v5237_v7 }
 0x16b   :  { %v5373_v5 = vadd.f32 %v2150_v28, %v2037_v35  ;;  %2836 = vmatprep.mubr.bf16.mxu1 %v5239_v29  ;;  %v2039_v6 = vpop.f32.mrf.mxu0  ;;  %3709 = vmatpush2.bf16.msra.mxu0 %v4822_v32 }
 0x16c   :  { %v2152_v8 = vpop.f32.mrf.mxu1  ;;  %3710 = vmatprep.subr.bf16.mxu0 %v4827_v54  ;;  %3813 = vmatprep.subr.bf16.mxu1 %v4860_v61  ;;  %v4866_v54 = vld [vmem:[#allocation10 + $0x1d4] ss:$8 sps:$4 sm:$0xff]  }
 0x16d   :  { %v5377_v46 = vadd.f32 %v2152_v8, %v2039_v6  ;;  %v2041_v25 = vpop.f32.mrf.mxu0  ;;  %3814 = vmatpush2.bf16.msra.mxu1 %v4858_v1  ;;  %v5400_v8 = vld [vmem:[#allocation9] sm:$0xf] }
 0x16e   :  { %v2154_v53 = vpop.f32.mrf.mxu1  ;;  %3815 = vmatprep.subr.bf16.mxu1 %v4863_v44  ;;  %v2095_v44 = vadd.f32 %v5295_v43, %v5293_v20 }
 0x16f   :  { %v5379_v14 = vadd.f32 %v2154_v53, %v2041_v25  ;;  %v5381_v7 = vpop.f32.mrf.mxu0  ;;  %3711 = vmatpush2.bf16.msra.mxu0 %v4825_v24  ;;  %v5811_v24 = vsub.s32 1, %v5389_v49  ;;  %v4867_v53 = vld [vmem:[#allocation10 + $0x1c0] ss:$8 sps:$4 sm:$0xff]  }
 0x170   :  { %v5383_v29 = vpop.f32.mrf.mxu1  ;;  %3712 = vmatprep.subr.bf16.mxu0 %v4830_v47  ;;  %v4869_v47 = vld [vmem:[#allocation10 + $0x1c4] ss:$8 sps:$4 sm:$0xff]  }
 0x171   :  { %v2047_v45 = vpop.f32.mrf.mxu0  ;;  %2724 = vmatmul.mubr.bf16.gmra.mxu0 %v5245_v31  ;;  %3816 = vmatpush2.bf16.msra.mxu1 %v4861_v59  ;;  %v4864_v31 = vld [vmem:[#allocation10 + $0x1d0] ss:$8 sps:$4 sm:$0xff]   ;;  %v5415_v59 = vrot.slane %v5400_v8, %v5811_v24  ;;  %v4873_v24 = vld [vmem:[#allocation10 + $0x1a0] ss:$8 sps:$4 sm:$0xff]  }
 0x172   :  { %v2160_v10 = vpop.f32.mrf.mxu1  ;;  %2837 = vmatmul.mubr.bf16.gmra.mxu1 %v5247_v23  ;;  %v5812_v23 = vsub.s32 0, %v5389_v49  ;;  %3817 = vmatprep.subr.bf16.mxu1 %v4866_v54  ;;  %v2097_v54 = vadd.f32 %v5299_v40, %v5297_v39 }
 0x173   :  { %v5387_v63 = vadd.f32 %v2160_v10, %v2047_v45  ;;  %v2049_v16 = vpop.f32.mrf.mxu0  ;;  %3713 = vmatpush2.bf16.msra.mxu0 %v4828_v19 }
 0x174   :  { %v2162_v62 = vpop.f32.mrf.mxu1  ;;  %3714 = vmatprep.subr.bf16.mxu0 %v4833_v57  ;;  %v5407_v30 = vrot.slane %v5400_v8, %v5812_v23 }
 0x175   :  { %v5391_v32 = vadd.f32 %v2162_v62, %v2049_v16  ;;  %v2051_v55 = vpop.f32.mrf.mxu0  ;;  %3818 = vmatpush2.bf16.msra.mxu1 %v4864_v31 }
 0x176   :  { %v2164_v35 = vpop.f32.mrf.mxu1  ;;  %3819 = vmatprep.subr.bf16.mxu1 %v4869_v47 }
 0x177   :  { %v5393_v28 = vadd.f32 %v2164_v35, %v2051_v55  ;;  %v5396_v17 = vpop.f32.mrf.mxu0  ;;  %3715 = vmatpush2.bf16.msra.mxu0 %v4831_v26  ;;  %v4870_v26 = vld [vmem:[#allocation10 + $0x1b0] ss:$8 sps:$4 sm:$0xff]  }
 0x178   :  { %v5398_v6 = vpop.f32.mrf.mxu1 }
 0x179   :  { %v2203_v61 = vpop.f32.mrf.mxu0  ;;  %3820 = vmatpush2.bf16.msra.mxu1 %v4867_v53 }
 0x17a   :  { %v2316_v25 = vpop.f32.mrf.mxu1  ;;  %v2204_v1 = vadd.f32 %v2203_v61, %v5287_v4  ;;  %v4872_v4 = vld [vmem:[#allocation10 + $0x1b4] ss:$8 sps:$4 sm:$0xff]  }
 0x17b   :  { %v2205_v19 = vpop.f32.mrf.mxu0  ;;  %3821 = vmatprep.subr.bf16.mxu1 %v4872_v4 }
 0x17c   :  { %v2318_v57 = vpop.f32.mrf.mxu1  ;;  %v2317_v45 = vadd.f32 %v2316_v25, %v2204_v1  ;;  %v2206_v10 = vadd.f32 %v2205_v19, %v5291_v37  ;;  %v4875_v25 = vld [vmem:[#allocation10 + $0x1a4] ss:$8 sps:$4 sm:$0xff]  }
 0x17d   :  { %v2207_v16 = vpop.f32.mrf.mxu0  ;;  %3822 = vmatpush2.bf16.msra.mxu1 %v4870_v26 }
 0x17e   :  { %v2320_v62 = vpop.f32.mrf.mxu1  ;;  %v3064_v55 = vadd.f32 %v5407_v30, %v2317_v45  ;;  %v2319_v35 = vadd.f32 %v2318_v57, %v2206_v10  ;;  %v2208_v20 = vadd.f32 %v2207_v16, %v2095_v44  ;;  %3823 = vmatprep.subr.bf16.mxu1 %v4875_v25 }
 0x17f   :  { %v2209_v43 = vpop.f32.mrf.mxu0 }
 0x180   :  { %v2322_v37 = vpop.f32.mrf.mxu1  ;;  %v3065_v31 = vadd.f32 %v5415_v59, %v2319_v35  ;;  %v2321_v47 = vadd.f32 %v2320_v62, %v2208_v20  ;;  %v2210_v61 = vadd.f32 %v2209_v43, %v2097_v54  ;;  %v3128_v53 = vmul.f32 0.2, %v3064_v55  ;;  %v4878_v62 = vld [vmem:[#allocation10 + $0x194] ss:$8 sps:$4 sm:$0xff]   ;;  %v4876_v43 = vld [vmem:[#allocation10 + $0x190] ss:$8 sps:$4 sm:$0xff]  }
 0x181   :  { %v2213_v1 = vpop.f32.mrf.mxu0  ;;  %3824 = vmatpush2.bf16.msra.mxu1 %v4873_v24 }
 0x182   :  { %v2326_v19 = vpop.f32.mrf.mxu1  ;;  %v3068_v23 = vadd.f32 %v5407_v30, %v2321_v47  ;;  %v2323_v39 = vadd.f32 %v2322_v37, %v2210_v61  ;;  %v3129_v40 = vmul.f32 0.2, %v3065_v31  ;;  %v2214_v57 = vadd.f32 %v2213_v1, %v5303_v36  ;;  %3825 = vmatprep.subr.bf16.mxu1 %v4878_v62 }
 0x183   :  { %v2215_v44 = vpop.f32.mrf.mxu0  ;;  %v3192_v26 = vmax.f32 %v3064_v55, %v3128_v53  ;;  %v2107_v36 = vadd.f32 %v5313_v22, %v5311_v21 }
 0x184   :  { %v2328_v45 = vpop.f32.mrf.mxu1  ;;  %v3132_v10 = vmul.f32 0.2, %v3068_v23  ;;  %v3069_v4 = vadd.f32 %v5415_v59, %v2323_v39  ;;  %v2216_v16 = vadd.f32 %v2215_v44, %v5307_v2  ;;  %v2327_v54 = vadd.f32 %v2326_v19, %v2214_v57 }
 0x185   :  { %v2217_v35 = vpop.f32.mrf.mxu0  ;;  %v3193_v1 = vmax.f32 %v3065_v31, %v3129_v40  ;;  %3826 = vmatpush2.bf16.msra.mxu1 %v4876_v43 }
 0x186   :  { %v2330_v20 = vpop.f32.mrf.mxu1  ;;  %v3196_v47 = vmax.f32 %v3068_v23, %v3132_v10  ;;  %v3133_v37 = vmul.f32 0.2, %v3069_v4  ;;  %v2329_v61 = vadd.f32 %v2328_v45, %v2216_v16  ;;  %v2218_v25 = vadd.f32 %v2217_v35, %v5309_v15  ;;  %v4881_v23 = vld [vmem:[#allocation10 + $0x184] ss:$8 sps:$4 sm:$0xff]   ;;  %v4879_v16 = vld [vmem:[#allocation10 + $0x180] ss:$8 sps:$4 sm:$0xff]  }
 0x187   :  { %v3072_v39 = vadd.f32 %v5407_v30, %v2327_v54  ;;  %v2219_v2 = vpop.f32.mrf.mxu0  ;;  %3827 = vmatprep.subr.bf16.mxu1 %v4881_v23 }
 0x188   :  { %v2332_v24 = vpop.f32.mrf.mxu1  ;;  %v3256_v44 = vpack.c.bf16 %v3196_v47, %v3192_v26  ;;  %v3197_v55 = vmax.f32 %v3069_v4, %v3133_v37  ;;  %v3073_v53 = vadd.f32 %v5415_v59, %v2329_v61  ;;  %v2331_v19 = vadd.f32 %v2330_v20, %v2218_v25 }
 0x189   :  { %v3136_v57 = vmul.f32 0.2, %v3072_v39  ;;  %v2220_v45 = vadd.f32 %v2219_v2, %v2107_v36  ;;  %v2223_v10 = vpop.f32.mrf.mxu0  ;;  %3828 = vmatpush2.bf16.msra.mxu1 %v4879_v16  ;;  %v2117_v2 = vadd.f32 %v5327_v13, %v5325_v12 }
 0x18a   :  { %v2336_v15 = vpop.f32.mrf.mxu1  ;;  %v3076_v62 = vadd.f32 %v5407_v30, %v2331_v19  ;;  %v2224_v21 = vadd.f32 %v2223_v10, %v5317_v41  ;;  %v3257_v22 = vpack.c.bf16 %v3197_v55, %v3193_v1  ;;  %v3137_v4 = vmul.f32 0.2, %v3073_v53 }
 0x18b   :  { %v2333_v31 = vadd.f32 %v2332_v24, %v2220_v45  ;;  %v2225_v40 = vpop.f32.mrf.mxu0  ;;  %v3200_v43 = vmax.f32 %v3072_v39, %v3136_v57 }
 0x18c   :  { %v2338_v26 = vpop.f32.mrf.mxu1  ;;  %v3140_v54 = vmul.f32 0.2, %v3076_v62  ;;  %v2337_v35 = vadd.f32 %v2336_v15, %v2224_v21  ;;  %v2226_v20 = vadd.f32 %v2225_v40, %v5321_v50  ;;  %3716 = vmatprep.mubr.bf16.mxu0 %v3257_v22  ;;  %v3201_v19 = vmax.f32 %v3073_v53, %v3137_v4 }
 0x18d   :  { %v3077_v47 = vadd.f32 %v5415_v59, %v2333_v31  ;;  %v2227_v37 = vpop.f32.mrf.mxu0  ;;  %3717 = vmatmul.mubr.bf16.vlgmr.msra.gmra.mxu0 %v3256_v44 }
 0x18e   :  { %v2340_v61 = vpop.f32.mrf.mxu1  ;;  %v3204_v25 = vmax.f32 %v3076_v62, %v3140_v54  ;;  %v3080_v41 = vadd.f32 %v5407_v30, %v2337_v35  ;;  %v2339_v36 = vadd.f32 %v2338_v26, %v2226_v20  ;;  %v2228_v1 = vadd.f32 %v2227_v37, %v5323_v18 }
 0x18f   :  { %v3141_v24 = vmul.f32 0.2, %v3077_v47  ;;  %v2229_v55 = vpop.f32.mrf.mxu0 }
 0x190   :  { %v2342_v50 = vpop.f32.mrf.mxu1  ;;  %v3260_v23 = vpack.c.bf16 %v3204_v25, %v3200_v43  ;;  %v2341_v39 = vadd.f32 %v2340_v61, %v2228_v1  ;;  %v3144_v45 = vmul.f32 0.2, %v3080_v41  ;;  %v3081_v10 = vadd.f32 %v5415_v59, %v2339_v36 }
 0x191   :  { %v3205_v57 = vmax.f32 %v3077_v47, %v3141_v24  ;;  %v2230_v44 = vadd.f32 %v2229_v55, %v2117_v2  ;;  %v2233_v15 = vpop.f32.mrf.mxu0  ;;  %v2127_v61 = vadd.f32 %v5341_v52, %v5339_v58 }
 0x192   :  { %v2346_v16 = vpop.f32.mrf.mxu1  ;;  %v3084_v62 = vadd.f32 %v5407_v30, %v2341_v39  ;;  %v2234_v18 = vadd.f32 %v2233_v15, %v5331_v48  ;;  %v3208_v26 = vmax.f32 %v3080_v41, %v3144_v45  ;;  %v3145_v4 = vmul.f32 0.2, %v3081_v10 }
 0x193   :  { %v2343_v21 = vadd.f32 %v2342_v50, %v2230_v44  ;;  %v2235_v22 = vpop.f32.mrf.mxu0  ;;  %v3261_v13 = vpack.c.bf16 %v3205_v57, %v3201_v19 }
 0x194   :  { %v2348_v12 = vpop.f32.mrf.mxu1  ;;  %v3148_v31 = vmul.f32 0.2, %v3084_v62  ;;  %v2347_v40 = vadd.f32 %v2346_v16, %v2234_v18  ;;  %v2236_v53 = vadd.f32 %v2235_v22, %v5335_v56  ;;  %v3209_v24 = vmax.f32 %v3081_v10, %v3145_v4 }
 0x195   :  { %v3085_v54 = vadd.f32 %v5415_v59, %v2343_v21  ;;  %3726 = vmatprep.mubr.bf16.mxu0 %v3261_v13  ;;  %v2237_v35 = vpop.f32.mrf.mxu0 }
 0x196   :  { %v2350_v20 = vpop.f32.mrf.mxu1  ;;  %v3212_v43 = vmax.f32 %v3084_v62, %v3148_v31  ;;  %v3088_v47 = vadd.f32 %v5407_v30, %v2347_v40  ;;  %v2349_v37 = vadd.f32 %v2348_v12, %v2236_v53  ;;  %v2238_v48 = vadd.f32 %v2237_v35, %v5337_v60  ;;  %3727 = vmatmul.mubr.bf16.gmra.mxu0 %v3260_v23 }
 0x197   :  { %v3149_v25 = vmul.f32 0.2, %v3085_v54  ;;  %v2239_v36 = vpop.f32.mrf.mxu0  ;;  %v2137_v53 = vadd.f32 %v5355_v34, %v5353_v33 }
 0x198   :  { %v2352_v56 = vpop.f32.mrf.mxu1  ;;  %v3264_v41 = vpack.c.bf16 %v3212_v43, %v3208_v26  ;;  %v3089_v1 = vadd.f32 %v5415_v59, %v2349_v37  ;;  %v2351_v2 = vadd.f32 %v2350_v20, %v2238_v48  ;;  %v3152_v50 = vmul.f32 0.2, %v3088_v47 }
 0x199   :  { %v3213_v55 = vmax.f32 %v3085_v54, %v3149_v25  ;;  %v2240_v19 = vadd.f32 %v2239_v36, %v2127_v61  ;;  %v2243_v39 = vpop.f32.mrf.mxu0 }
 0x19a   :  { %v2356_v57 = vpop.f32.mrf.mxu1  ;;  %v3092_v45 = vadd.f32 %v5407_v30, %v2351_v2  ;;  %v2244_v60 = vadd.f32 %v2243_v39, %v5345_v9  ;;  %v3153_v15 = vmul.f32 0.2, %v3089_v1  ;;  %v3216_v21 = vmax.f32 %v3088_v47, %v3152_v50 }
 0x19b   :  { %v2353_v23 = vadd.f32 %v2352_v56, %v2240_v19  ;;  %v2245_v44 = vpop.f32.mrf.mxu0  ;;  %v3265_v52 = vpack.c.bf16 %v3213_v55, %v3209_v24 }
 0x19c   :  { %v2358_v58 = vpop.f32.mrf.mxu1  ;;  %v3156_v16 = vmul.f32 0.2, %v3092_v45  ;;  %v2357_v62 = vadd.f32 %v2356_v57, %v2244_v60  ;;  %v2246_v18 = vadd.f32 %v2245_v44, %v5349_v51  ;;  %v3217_v51 = vmax.f32 %v3089_v1, %v3153_v15 }
 0x19d   :  { %v3093_v10 = vadd.f32 %v5415_v59, %v2353_v23  ;;  %3736 = vmatprep.mubr.bf16.mxu0 %v3265_v52  ;;  %v2247_v22 = vpop.f32.mrf.mxu0  ;;  %v2147_v44 = vadd.f32 %v5369_v42, %v5367_v0 }
 0x19e   :  { %v2360_v12 = vpop.f32.mrf.mxu1  ;;  %v3220_v13 = vmax.f32 %v3092_v45, %v3156_v16  ;;  %v3096_v31 = vadd.f32 %v5407_v30, %v2357_v62  ;;  %v2359_v40 = vadd.f32 %v2358_v58, %v2246_v18  ;;  %v2248_v9 = vadd.f32 %v2247_v22, %v5351_v11  ;;  %3737 = vmatmul.mubr.bf16.gmra.mxu0 %v3264_v41 }
 0x19f   :  { %v3157_v26 = vmul.f32 0.2, %v3093_v10  ;;  %v2249_v4 = vpop.f32.mrf.mxu0 }
 0x1a0   :  { %v2362_v54 = vpop.f32.mrf.mxu1  ;;  %v3268_v35 = vpack.c.bf16 %v3220_v13, %v3216_v21  ;;  %v2361_v20 = vadd.f32 %v2360_v12, %v2248_v9  ;;  %v3160_v47 = vmul.f32 0.2, %v3096_v31  ;;  %v3097_v37 = vadd.f32 %v5415_v59, %v2359_v40 }
 0x1a1   :  { %v3221_v43 = vmax.f32 %v3093_v10, %v3157_v26  ;;  %v2250_v48 = vadd.f32 %v2249_v4, %v2137_v53  ;;  %v2253_v61 = vpop.f32.mrf.mxu0 }
 0x1a2   :  { %v2366_v25 = vpop.f32.mrf.mxu1  ;;  %v3100_v36 = vadd.f32 %v5407_v30, %v2361_v20  ;;  %v2254_v11 = vadd.f32 %v2253_v61, %v5359_v38  ;;  %v3224_v55 = vmax.f32 %v3096_v31, %v3160_v47  ;;  %v3161_v50 = vmul.f32 0.2, %v3097_v37 }
 0x1a3   :  { %v2363_v56 = vadd.f32 %v2362_v54, %v2250_v48  ;;  %v2255_v41 = vpop.f32.mrf.mxu0  ;;  %v3269_v34 = vpack.c.bf16 %v3221_v43, %v3217_v51  ;;  %v2157_v61 = vadd.f32 %v5383_v29, %v5381_v7 }
 0x1a4   :  { %v2368_v33 = vpop.f32.mrf.mxu1  ;;  %v3164_v2 = vmul.f32 0.2, %v3100_v36  ;;  %v2367_v24 = vadd.f32 %v2366_v25, %v2254_v11  ;;  %v2256_v1 = vadd.f32 %v2255_v41, %v5363_v3  ;;  %v3225_v18 = vmax.f32 %v3097_v37, %v3161_v50 }
 0x1a5   :  { %v3101_v19 = vadd.f32 %v5415_v59, %v2363_v56  ;;  %3746 = vmatprep.mubr.bf16.mxu0 %v3269_v34  ;;  %v2257_v39 = vpop.f32.mrf.mxu0 }
 0x1a6   :  { %v2370_v57 = vpop.f32.mrf.mxu1  ;;  %v3228_v45 = vmax.f32 %v3100_v36, %v3164_v2  ;;  %v3104_v60 = vadd.f32 %v5407_v30, %v2367_v24  ;;  %v2369_v23 = vadd.f32 %v2368_v33, %v2256_v1  ;;  %v2258_v38 = vadd.f32 %v2257_v39, %v5365_v27  ;;  %3747 = vmatmul.mubr.bf16.gmra.mxu0 %v3268_v35 }
 0x1a7   :  { %v3165_v58 = vmul.f32 0.2, %v3101_v19  ;;  %v2259_v52 = vpop.f32.mrf.mxu0 }
 0x1a8   :  { %v2372_v3 = vpop.f32.mrf.mxu1  ;;  %v3272_v15 = vpack.c.bf16 %v3228_v45, %v3224_v55  ;;  %v3105_v16 = vadd.f32 %v5415_v59, %v2369_v23  ;;  %v2371_v62 = vadd.f32 %v2370_v57, %v2258_v38  ;;  %v3168_v10 = vmul.f32 0.2, %v3104_v60 }
 0x1a9   :  { %v3229_v21 = vmax.f32 %v3101_v19, %v3165_v58  ;;  %v2260_v22 = vadd.f32 %v2259_v52, %v2147_v44  ;;  %v2263_v12 = vpop.f32.mrf.mxu0 }
 0x1aa   :  { %v2376_v13 = vpop.f32.mrf.mxu1  ;;  %v3108_v31 = vadd.f32 %v5407_v30, %v2371_v62  ;;  %v2264_v27 = vadd.f32 %v2263_v12, %v5373_v5  ;;  %v3169_v53 = vmul.f32 0.2, %v3105_v16  ;;  %v3232_v51 = vmax.f32 %v3104_v60, %v3168_v10 }
 0x1ab   :  { %v2373_v40 = vadd.f32 %v2372_v3, %v2260_v22  ;;  %v2265_v9 = vpop.f32.mrf.mxu0  ;;  %v3273_v42 = vpack.c.bf16 %v3229_v21, %v3225_v18  ;;  %v2167_v62 = vadd.f32 %v5398_v6, %v5396_v17 }
 0x1ac   :  { %v2378_v0 = vpop.f32.mrf.mxu1  ;;  %v3172_v26 = vmul.f32 0.2, %v3108_v31  ;;  %v2377_v4 = vadd.f32 %v2376_v13, %v2264_v27  ;;  %v2266_v54 = vadd.f32 %v2265_v9, %v5377_v46  ;;  %v3233_v46 = vmax.f32 %v3105_v16, %v3169_v53 }
 0x1ad   :  { %v3109_v35 = vadd.f32 %v5415_v59, %v2373_v40  ;;  %3756 = vmatprep.mubr.bf16.mxu0 %v3273_v42  ;;  %v2267_v20 = vpop.f32.mrf.mxu0 }
 0x1ae   :  { %v2380_v43 = vpop.f32.mrf.mxu1  ;;  %v3236_v47 = vmax.f32 %v3108_v31, %v3172_v26  ;;  %v3112_v37 = vadd.f32 %v5407_v30, %v2377_v4  ;;  %v2379_v48 = vadd.f32 %v2378_v0, %v2266_v54  ;;  %v2268_v5 = vadd.f32 %v2267_v20, %v5379_v14  ;;  %3757 = vmatmul.mubr.bf16.gmra.mxu0 %v3272_v15 }
 0x1af   :  { %v3173_v25 = vmul.f32 0.2, %v3109_v35  ;;  %v2269_v36 = vpop.f32.mrf.mxu0 }
 0x1b0   :  { %v2382_v11 = vpop.f32.mrf.mxu1  ;;  %v3276_v56 = vpack.c.bf16 %v3236_v47, %v3232_v51  ;;  %v2381_v41 = vadd.f32 %v2380_v43, %v2268_v5  ;;  %v3176_v34 = vmul.f32 0.2, %v3112_v37  ;;  %v3113_v2 = vadd.f32 %v5415_v59, %v2379_v48 }
 0x1b1   :  { %v3237_v33 = vmax.f32 %v3109_v35, %v3173_v25  ;;  %v2270_v24 = vadd.f32 %v2269_v36, %v2157_v61  ;;  %v2273_v1 = vpop.f32.mrf.mxu0 }
 0x1b2   :  { %v2386_v55 = vpop.f32.mrf.mxu1  ;;  %v3116_v50 = vadd.f32 %v5407_v30, %v2381_v41  ;;  %v2274_v14 = vadd.f32 %v2273_v1, %v5387_v63  ;;  %v3240_v23 = vmax.f32 %v3112_v37, %v3176_v34  ;;  %v3177_v38 = vmul.f32 0.2, %v3113_v2 }
 0x1b3   :  { %v2383_v19 = vadd.f32 %v2382_v11, %v2270_v24  ;;  %v2275_v39 = vpop.f32.mrf.mxu0  ;;  %v3277_v29 = vpack.c.bf16 %v3237_v33, %v3233_v46 }
 0x1b4   :  { %v2388_v7 = vpop.f32.mrf.mxu1  ;;  %v3180_v57 = vmul.f32 0.2, %v3116_v50  ;;  %v2387_v45 = vadd.f32 %v2386_v55, %v2274_v14  ;;  %v2276_v60 = vadd.f32 %v2275_v39, %v5391_v32  ;;  %v3241_v12 = vmax.f32 %v3113_v2, %v3177_v38 }
 0x1b5   :  { %v3117_v44 = vadd.f32 %v5415_v59, %v2383_v19  ;;  %3766 = vmatprep.mubr.bf16.mxu0 %v3277_v29  ;;  %v2277_v58 = vpop.f32.mrf.mxu0 }
 0x1b6   :  { %v2390_v52 = vpop.f32.mrf.mxu1  ;;  %v3244_v3 = vmax.f32 %v3116_v50, %v3180_v57  ;;  %v3120_v15 = vadd.f32 %v5407_v30, %v2387_v45  ;;  %v2389_v16 = vadd.f32 %v2388_v7, %v2276_v60  ;;  %v2278_v63 = vadd.f32 %v2277_v58, %v5393_v28  ;;  %3767 = vmatmul.mubr.bf16.gmra.mxu0 %v3276_v56 }
 0x1b7   :  { %v3181_v18 = vmul.f32 0.2, %v3117_v44  ;;  %v2279_v21 = vpop.f32.mrf.mxu0 }
 0x1b8   :  { %v2392_v32 = vpop.f32.mrf.mxu1  ;;  %v3280_v10 = vpack.c.bf16 %v3244_v3, %v3240_v23  ;;  %v2391_v22 = vadd.f32 %v2390_v52, %v2278_v63  ;;  %v3121_v31 = vadd.f32 %v5415_v59, %v2389_v16  ;;  %v2280_v27 = vadd.f32 %v2279_v21, %v2167_v62 }
 0x1b9   :  { %v3245_v13 = vmax.f32 %v3117_v44, %v3181_v18  ;;  %v2429_v40 = vpop.f32.mrf.mxu0  ;;  %v3184_v0 = vmul.f32 0.2, %v3120_v15 }
 0x1ba   :  { %v2542_v9 = vpop.f32.mrf.mxu1  ;;  %v3124_v42 = vadd.f32 %v5407_v30, %v2391_v22  ;;  %v2393_v53 = vadd.f32 %v2392_v32, %v2280_v27  ;;  %v3185_v51 = vmul.f32 0.2, %v3121_v31 }
 0x1bb   :  { %v5485_v28 = vadd.f32 %v2542_v9, %v2429_v40  ;;  %v2431_v26 = vpop.f32.mrf.mxu0  ;;  %v3281_v6 = vpack.c.bf16 %v3245_v13, %v3241_v12  ;;  %v3248_v47 = vmax.f32 %v3120_v15, %v3184_v0 }
 0x1bc   :  { %v2544_v17 = vpop.f32.mrf.mxu1  ;;  %v3188_v4 = vmul.f32 0.2, %v3124_v42  ;;  %v3125_v35 = vadd.f32 %v5415_v59, %v2393_v53  ;;  %v3249_v25 = vmax.f32 %v3121_v31, %v3185_v51 }
 0x1bd   :  { %v5487_v54 = vadd.f32 %v2544_v17, %v2431_v26  ;;  %3776 = vmatprep.mubr.bf16.mxu0 %v3281_v6  ;;  %v5490_v20 = vpop.f32.mrf.mxu0 }
 0x1be   :  { %v5492_v43 = vpop.f32.mrf.mxu1  ;;  %v3252_v37 = vmax.f32 %v3124_v42, %v3188_v4  ;;  %3777 = vmatmul.mubr.bf16.gmra.mxu0 %v3280_v10  ;;  %v3189_v30 = vmul.f32 0.2, %v3125_v35 }
 0x1bf   :  { %v5494_v48 = vpop.f32.mrf.mxu0 }
 0x1c0   :  { %v5496_v5 = vpop.f32.mrf.mxu1  ;;  %v3284_v61 = vpack.c.bf16 %v3252_v37, %v3248_v47  ;;  %v3253_v36 = vmax.f32 %v3125_v35, %v3189_v30 }
 0x1c1   :  { %v2439_v11 = vpop.f32.mrf.mxu0 }
 0x1c2   :  { %v2552_v46 = vpop.f32.mrf.mxu1  ;;  %v3285_v33 = vpack.c.bf16 %v3253_v36, %v3249_v25 }
 0x1c3   :  { %v5498_v56 = vadd.f32 %v2552_v46, %v2439_v11  ;;  %v2441_v59 = vpop.f32.mrf.mxu0 }
 0x1c4   :  { %v2554_v41 = vpop.f32.mrf.mxu1  ;;  %3786 = vmatprep.mubr.bf16.mxu0 %v3285_v33 }
 0x1c5   :  { %v5500_v34 = vadd.f32 %v2554_v41, %v2441_v59  ;;  %v2443_v2 = vpop.f32.mrf.mxu0 }
 0x1c6   :  { %v2556_v24 = vpop.f32.mrf.mxu1  ;;  %3787 = vmatmul.mubr.bf16.gmra.mxu0 %v3284_v61 }
 0x1c7   :  { %v5502_v1 = vadd.f32 %v2556_v24, %v2443_v2  ;;  %v5504_v55 = vpop.f32.mrf.mxu0 }
 0x1c8   :  { %v5506_v50 = vpop.f32.mrf.mxu1 }
 0x1c9   :  { %v2449_v14 = vpop.f32.mrf.mxu0 }
 0x1ca   :  { %v2562_v19 = vpop.f32.mrf.mxu1 }
 0x1cb   :  { %v5508_v39 = vadd.f32 %v2562_v19, %v2449_v14  ;;  %v2451_v7 = vpop.f32.mrf.mxu0 }
 0x1cc   :  { %v2564_v29 = vpop.f32.mrf.mxu1 }
 0x1cd   :  { %v5510_v57 = vadd.f32 %v2564_v29, %v2451_v7  ;;  %v2453_v45 = vpop.f32.mrf.mxu0 }
 0x1ce   :  { %v2566_v60 = vpop.f32.mrf.mxu1 }
 0x1cf   :  { %v5512_v23 = vadd.f32 %v2566_v60, %v2453_v45  ;;  %v5514_v38 = vpop.f32.mrf.mxu0 }
 0x1d0   :  { %v5516_v44 = vpop.f32.mrf.mxu1 }
 0x1d1   :  { %v2459_v58 = vpop.f32.mrf.mxu0 }
 0x1d2   :  { %v2572_v52 = vpop.f32.mrf.mxu1 }
 0x1d3   :  { %v5518_v3 = vadd.f32 %v2572_v52, %v2459_v58  ;;  %v2461_v15 = vpop.f32.mrf.mxu0 }
 0x1d4   :  { %v2574_v16 = vpop.f32.mrf.mxu1 }
 0x1d5   :  { %v5520_v63 = vadd.f32 %v2574_v16, %v2461_v15  ;;  %v2463_v62 = vpop.f32.mrf.mxu0 }
 0x1d6   :  { %v2576_v18 = vpop.f32.mrf.mxu1 }
 0x1d7   :  { %v5522_v21 = vadd.f32 %v2576_v18, %v2463_v62  ;;  %v5524_v32 = vpop.f32.mrf.mxu0 }
 0x1d8   :  { %v5526_v10 = vpop.f32.mrf.mxu1 }
 0x1d9   :  { %v2469_v22 = vpop.f32.mrf.mxu0 }
 0x1da   :  { %v2582_v12 = vpop.f32.mrf.mxu1 }
 0x1db   :  { %v5528_v13 = vadd.f32 %v2582_v12, %v2469_v22  ;;  %v2471_v31 = vpop.f32.mrf.mxu0  ;;  %v3054_v12 = vsub.s32 2, %v5389_v49 }
 0x1dc   :  { %v2584_v27 = vpop.f32.mrf.mxu1 }
 0x1dd   :  { %v5530_v40 = vadd.f32 %v2584_v27, %v2471_v31  ;;  %v2473_v9 = vpop.f32.mrf.mxu0 }
 0x1de   :  { %v2586_v0 = vpop.f32.mrf.mxu1 }
 0x1df   :  { %v5532_v42 = vadd.f32 %v2586_v0, %v2473_v9  ;;  %v5534_v53 = vpop.f32.mrf.mxu0  ;;  %v3058_v9 = vsub.s32 3, %v5389_v49 }
 0x1e0   :  { %v5536_v26 = vpop.f32.mrf.mxu1 }
 0x1e1   :  { %v2479_v17 = vpop.f32.mrf.mxu0 }
 0x1e2   :  { %v2592_v6 = vpop.f32.mrf.mxu1 }
 0x1e3   :  { %v5538_v4 = vadd.f32 %v2592_v6, %v2479_v17  ;;  %v2481_v51 = vpop.f32.mrf.mxu0 }
 0x1e4   :  { %v2594_v35 = vpop.f32.mrf.mxu1 }
 0x1e5   :  { %v5540_v47 = vadd.f32 %v2594_v35, %v2481_v51  ;;  %v2483_v37 = vpop.f32.mrf.mxu0  ;;  %v5572_v51 = vrot.slane %v5400_v8, %v3054_v12 }
 0x1e6   :  { %v2596_v30 = vpop.f32.mrf.mxu1 }
 0x1e7   :  { %v5542_v61 = vadd.f32 %v2596_v30, %v2483_v37  ;;  %v5544_v25 = vpop.f32.mrf.mxu0  ;;  %v2547_v30 = vadd.f32 %v5492_v43, %v5490_v20 }
 0x1e8   :  { %v5546_v36 = vpop.f32.mrf.mxu1 }
 0x1e9   :  { %v2489_v11 = vpop.f32.mrf.mxu0 }
 0x1ea   :  { %v2602_v46 = vpop.f32.mrf.mxu1 }
 0x1eb   :  { %v5548_v59 = vadd.f32 %v2602_v46, %v2489_v11  ;;  %v2491_v41 = vpop.f32.mrf.mxu0 }
 0x1ec   :  { %v2604_v33 = vpop.f32.mrf.mxu1 }
 0x1ed   :  { %v5550_v2 = vadd.f32 %v2604_v33, %v2491_v41  ;;  %v2493_v24 = vpop.f32.mrf.mxu0  ;;  %v5578_v41 = vrot.slane %v5400_v8, %v3058_v9 }
 0x1ee   :  { %v2606_v14 = vpop.f32.mrf.mxu1 }
 0x1ef   :  { %v5552_v19 = vadd.f32 %v2606_v14, %v2493_v24  ;;  %v5554_v7 = vpop.f32.mrf.mxu0  ;;  %v2549_v14 = vadd.f32 %v5496_v5, %v5494_v48 }
 0x1f0   :  { %v5556_v29 = vpop.f32.mrf.mxu1 }
 0x1f1   :  { %v2499_v45 = vpop.f32.mrf.mxu0 }
 0x1f2   :  { %v2612_v60 = vpop.f32.mrf.mxu1 }
 0x1f3   :  { %v5558_v58 = vadd.f32 %v2612_v60, %v2499_v45  ;;  %v2501_v52 = vpop.f32.mrf.mxu0 }
 0x1f4   :  { %v2614_v15 = vpop.f32.mrf.mxu1 }
 0x1f5   :  { %v5560_v16 = vadd.f32 %v2614_v15, %v2501_v52  ;;  %v2503_v62 = vpop.f32.mrf.mxu0 }
 0x1f6   :  { %v2616_v18 = vpop.f32.mrf.mxu1 }
 0x1f7   :  { %v5562_v22 = vadd.f32 %v2616_v18, %v2503_v62  ;;  %v5565_v31 = vpop.f32.mrf.mxu0 }
 0x1f8   :  { %v5567_v27 = vpop.f32.mrf.mxu1 }
 0x1f9   :  { %v2655_v0 = vpop.f32.mrf.mxu0 }
 0x1fa   :  { %v2768_v17 = vpop.f32.mrf.mxu1  ;;  %v2656_v6 = vadd.f32 %v2655_v0, %v5485_v28 }
 0x1fb   :  { %v2657_v35 = vpop.f32.mrf.mxu0 }
 0x1fc   :  { %v2770_v37 = vpop.f32.mrf.mxu1  ;;  %v2769_v11 = vadd.f32 %v2768_v17, %v2656_v6  ;;  %v2658_v46 = vadd.f32 %v2657_v35, %v5487_v54 }
 0x1fd   :  { %v2659_v33 = vpop.f32.mrf.mxu0 }
 0x1fe   :  { %v2772_v24 = vpop.f32.mrf.mxu1  ;;  %v3066_v28 = vadd.f32 %v5572_v51, %v2769_v11  ;;  %v2771_v45 = vadd.f32 %v2770_v37, %v2658_v46  ;;  %v2660_v60 = vadd.f32 %v2659_v33, %v2547_v30 }
 0x1ff   :  { %v2661_v52 = vpop.f32.mrf.mxu0 }
 0x200   :  { %v2774_v15 = vpop.f32.mrf.mxu1  ;;  %v3067_v62 = vadd.f32 %v5578_v41, %v2771_v45  ;;  %v2773_v20 = vadd.f32 %v2772_v24, %v2660_v60  ;;  %v2662_v43 = vadd.f32 %v2661_v52, %v2549_v14  ;;  %v3130_v18 = vmul.f32 0.2, %v3066_v28 }
 0x201   :  { %v2665_v54 = vpop.f32.mrf.mxu0  ;;  %v2559_v52 = vadd.f32 %v5506_v50, %v5504_v55 }
 0x202   :  { %v2778_v12 = vpop.f32.mrf.mxu1  ;;  %v3070_v8 = vadd.f32 %v5572_v51, %v2773_v20  ;;  %v2775_v9 = vadd.f32 %v2774_v15, %v2662_v43  ;;  %v3131_v0 = vmul.f32 0.2, %v3067_v62  ;;  %v2666_v17 = vadd.f32 %v2665_v54, %v5498_v56 }
 0x203   :  { %v2667_v48 = vpop.f32.mrf.mxu0  ;;  %v3194_v30 = vmax.f32 %v3066_v28, %v3130_v18 }
 0x204   :  { %v2780_v5 = vpop.f32.mrf.mxu1  ;;  %v3134_v6 = vmul.f32 0.2, %v3070_v8  ;;  %v3071_v35 = vadd.f32 %v5578_v41, %v2775_v9  ;;  %v2668_v37 = vadd.f32 %v2667_v48, %v5500_v34  ;;  %v2779_v11 = vadd.f32 %v2778_v12, %v2666_v17 }
 0x205   :  { %v2669_v46 = vpop.f32.mrf.mxu0  ;;  %v3195_v56 = vmax.f32 %v3067_v62, %v3131_v0 }
 0x206   :  { %v2782_v33 = vpop.f32.mrf.mxu1  ;;  %v3198_v24 = vmax.f32 %v3070_v8, %v3134_v6  ;;  %v3135_v14 = vmul.f32 0.2, %v3071_v35  ;;  %v2781_v45 = vadd.f32 %v2780_v5, %v2668_v37  ;;  %v2670_v60 = vadd.f32 %v2669_v46, %v5502_v1 }
 0x207   :  { %v3074_v15 = vadd.f32 %v5572_v51, %v2779_v11  ;;  %v2671_v20 = vpop.f32.mrf.mxu0 }
 0x208   :  { %v2784_v43 = vpop.f32.mrf.mxu1  ;;  %v3258_v54 = vpack.c.bf16 %v3198_v24, %v3194_v30  ;;  %v3199_v9 = vmax.f32 %v3071_v35, %v3135_v14  ;;  %v3075_v34 = vadd.f32 %v5578_v41, %v2781_v45  ;;  %v2783_v28 = vadd.f32 %v2782_v33, %v2670_v60 }
 0x209   :  { %v3138_v18 = vmul.f32 0.2, %v3074_v15  ;;  %v2672_v12 = vadd.f32 %v2671_v20, %v2559_v52  ;;  %v2675_v8 = vpop.f32.mrf.mxu0  ;;  %v2569_v60 = vadd.f32 %v5516_v44, %v5514_v38 }
 0x20a   :  { %v2788_v17 = vpop.f32.mrf.mxu1  ;;  %v3078_v48 = vadd.f32 %v5572_v51, %v2783_v28  ;;  %v2676_v1 = vadd.f32 %v2675_v8, %v5508_v39  ;;  %v3259_v5 = vpack.c.bf16 %v3199_v9, %v3195_v56  ;;  %v3139_v0 = vmul.f32 0.2, %v3075_v34 }
 0x20b   :  { %v2785_v55 = vadd.f32 %v2784_v43, %v2672_v12  ;;  %v2677_v50 = vpop.f32.mrf.mxu0  ;;  %v3202_v30 = vmax.f32 %v3074_v15, %v3138_v18 }
 0x20c   :  { %v2790_v62 = vpop.f32.mrf.mxu1  ;;  %v3142_v6 = vmul.f32 0.2, %v3078_v48  ;;  %v2789_v37 = vadd.f32 %v2788_v17, %v2676_v1  ;;  %v2678_v35 = vadd.f32 %v2677_v50, %v5510_v57  ;;  %3829 = vmatprep.mubr.bf16.mxu1 %v3259_v5  ;;  %v3203_v57 = vmax.f32 %v3075_v34, %v3139_v0 }
 0x20d   :  { %v3079_v11 = vadd.f32 %v5578_v41, %v2785_v55  ;;  %v2679_v46 = vpop.f32.mrf.mxu0  ;;  %3830 = vmatmul.mubr.bf16.vlgmr.msra.gmra.mxu1 %v3258_v54 }
 0x20e   :  { %v2792_v33 = vpop.f32.mrf.mxu1  ;;  %v3206_v24 = vmax.f32 %v3078_v48, %v3142_v6  ;;  %v3082_v14 = vadd.f32 %v5572_v51, %v2789_v37  ;;  %v2791_v39 = vadd.f32 %v2790_v62, %v2678_v35  ;;  %v2680_v45 = vadd.f32 %v2679_v46, %v5512_v23 }
 0x20f   :  { %v3143_v52 = vmul.f32 0.2, %v3079_v11  ;;  %v2681_v56 = vpop.f32.mrf.mxu0  ;;  %v2579_v46 = vadd.f32 %v5526_v10, %v5524_v32 }
 0x210   :  { %v2794_v20 = vpop.f32.mrf.mxu1  ;;  %v3262_v43 = vpack.c.bf16 %v3206_v24, %v3202_v30  ;;  %v2793_v15 = vadd.f32 %v2792_v33, %v2680_v45  ;;  %v3146_v28 = vmul.f32 0.2, %v3082_v14  ;;  %v3083_v18 = vadd.f32 %v5578_v41, %v2791_v39 }
 0x211   :  { %v3207_v9 = vmax.f32 %v3079_v11, %v3143_v52  ;;  %v2682_v54 = vadd.f32 %v2681_v56, %v2569_v60  ;;  %v2685_v12 = vpop.f32.mrf.mxu0 }
 0x212   :  { %v2798_v8 = vpop.f32.mrf.mxu1  ;;  %v3086_v17 = vadd.f32 %v5572_v51, %v2793_v15  ;;  %v2686_v23 = vadd.f32 %v2685_v12, %v5518_v3  ;;  %v3210_v50 = vmax.f32 %v3082_v14, %v3146_v28  ;;  %v3147_v62 = vmul.f32 0.2, %v3083_v18 }
 0x213   :  { %v2795_v48 = vadd.f32 %v2794_v20, %v2682_v54  ;;  %v2687_v1 = vpop.f32.mrf.mxu0  ;;  %v3263_v44 = vpack.c.bf16 %v3207_v9, %v3203_v57 }
 0x214   :  { %v2800_v38 = vpop.f32.mrf.mxu1  ;;  %v3150_v5 = vmul.f32 0.2, %v3086_v17  ;;  %v2799_v55 = vadd.f32 %v2798_v8, %v2686_v23  ;;  %v2688_v34 = vadd.f32 %v2687_v1, %v5520_v63  ;;  %v3211_v60 = vmax.f32 %v3083_v18, %v3147_v62 }
 0x215   :  { %v3087_v0 = vadd.f32 %v5578_v41, %v2795_v48  ;;  %3839 = vmatprep.mubr.bf16.mxu1 %v3263_v44  ;;  %v2689_v6 = vpop.f32.mrf.mxu0 }
 0x216   :  { %v2802_v37 = vpop.f32.mrf.mxu1  ;;  %v3214_v35 = vmax.f32 %v3086_v17, %v3150_v5  ;;  %v3090_v30 = vadd.f32 %v5572_v51, %v2799_v55  ;;  %v2801_v11 = vadd.f32 %v2800_v38, %v2688_v34  ;;  %v2690_v3 = vadd.f32 %v2689_v6, %v5522_v21  ;;  %3840 = vmatmul.mubr.bf16.gmra.mxu1 %v3262_v43 }
 0x217   :  { %v3151_v33 = vmul.f32 0.2, %v3087_v0  ;;  %v2691_v24 = vpop.f32.mrf.mxu0  ;;  %v2589_v55 = vadd.f32 %v5536_v26, %v5534_v53 }
 0x218   :  { %v2804_v63 = vpop.f32.mrf.mxu1  ;;  %v3266_v14 = vpack.c.bf16 %v3214_v35, %v3210_v50  ;;  %v3091_v39 = vadd.f32 %v5578_v41, %v2801_v11  ;;  %v2803_v45 = vadd.f32 %v2802_v37, %v2690_v3  ;;  %v3154_v56 = vmul.f32 0.2, %v3090_v30 }
 0x219   :  { %v3215_v52 = vmax.f32 %v3087_v0, %v3151_v33  ;;  %v2692_v20 = vadd.f32 %v2691_v24, %v2579_v46  ;;  %v2695_v57 = vpop.f32.mrf.mxu0 }
 0x21a   :  { %v2808_v15 = vpop.f32.mrf.mxu1  ;;  %v3094_v9 = vadd.f32 %v5572_v51, %v2803_v45  ;;  %v2696_v21 = vadd.f32 %v2695_v57, %v5528_v13  ;;  %v3155_v54 = vmul.f32 0.2, %v3091_v39  ;;  %v3218_v23 = vmax.f32 %v3090_v30, %v3154_v56 }
 0x21b   :  { %v2805_v43 = vadd.f32 %v2804_v63, %v2692_v20  ;;  %v2697_v28 = vpop.f32.mrf.mxu0  ;;  %v3267_v10 = vpack.c.bf16 %v3215_v52, %v3211_v60 }
 0x21c   :  { %v2810_v32 = vpop.f32.mrf.mxu1  ;;  %v3158_v12 = vmul.f32 0.2, %v3094_v9  ;;  %v2809_v8 = vadd.f32 %v2808_v15, %v2696_v21  ;;  %v2698_v17 = vadd.f32 %v2697_v28, %v5530_v40  ;;  %v3219_v40 = vmax.f32 %v3091_v39, %v3155_v54 }
 0x21d   :  { %v3095_v18 = vadd.f32 %v5578_v41, %v2805_v43  ;;  %3849 = vmatprep.mubr.bf16.mxu1 %v3267_v10  ;;  %v2699_v48 = vpop.f32.mrf.mxu0  ;;  %v2599_v43 = vadd.f32 %v5546_v36, %v5544_v25 }
 0x21e   :  { %v2812_v1 = vpop.f32.mrf.mxu1  ;;  %v3222_v38 = vmax.f32 %v3094_v9, %v3158_v12  ;;  %v3098_v44 = vadd.f32 %v5572_v51, %v2809_v8  ;;  %v2811_v5 = vadd.f32 %v2810_v32, %v2698_v17  ;;  %v2700_v13 = vadd.f32 %v2699_v48, %v5532_v42  ;;  %3850 = vmatmul.mubr.bf16.gmra.mxu1 %v3266_v14 }
 0x21f   :  { %v3159_v34 = vmul.f32 0.2, %v3095_v18  ;;  %v2701_v50 = vpop.f32.mrf.mxu0 }
 0x220   :  { %v2814_v62 = vpop.f32.mrf.mxu1  ;;  %v3270_v0 = vpack.c.bf16 %v3222_v38, %v3218_v23  ;;  %v2813_v6 = vadd.f32 %v2812_v1, %v2700_v13  ;;  %v3162_v35 = vmul.f32 0.2, %v3098_v44  ;;  %v3099_v30 = vadd.f32 %v5578_v41, %v2811_v5 }
 0x221   :  { %v3223_v37 = vmax.f32 %v3095_v18, %v3159_v34  ;;  %v2702_v11 = vadd.f32 %v2701_v50, %v2589_v55  ;;  %v2705_v3 = vpop.f32.mrf.mxu0 }
 0x222   :  { %v2818_v46 = vpop.f32.mrf.mxu1  ;;  %v3102_v33 = vadd.f32 %v5572_v51, %v2813_v6  ;;  %v2706_v42 = vadd.f32 %v2705_v3, %v5538_v4  ;;  %v3226_v60 = vmax.f32 %v3098_v44, %v3162_v35  ;;  %v3163_v52 = vmul.f32 0.2, %v3099_v30 }
 0x223   :  { %v2815_v24 = vadd.f32 %v2814_v62, %v2702_v11  ;;  %v2707_v63 = vpop.f32.mrf.mxu0  ;;  %v3271_v26 = vpack.c.bf16 %v3223_v37, %v3219_v40  ;;  %v2609_v11 = vadd.f32 %v5556_v29, %v5554_v7 }
 0x224   :  { %v2820_v53 = vpop.f32.mrf.mxu1  ;;  %v3166_v14 = vmul.f32 0.2, %v3102_v33  ;;  %v2819_v45 = vadd.f32 %v2818_v46, %v2706_v42  ;;  %v2708_v39 = vadd.f32 %v2707_v63, %v5540_v47  ;;  %v3227_v8 = vmax.f32 %v3099_v30, %v3163_v52 }
 0x225   :  { %v3103_v56 = vadd.f32 %v5578_v41, %v2815_v24  ;;  %3859 = vmatprep.mubr.bf16.mxu1 %v3271_v26  ;;  %v2709_v20 = vpop.f32.mrf.mxu0 }
 0x226   :  { %v2822_v57 = vpop.f32.mrf.mxu1  ;;  %v3230_v15 = vmax.f32 %v3102_v33, %v3166_v14  ;;  %v3106_v9 = vadd.f32 %v5572_v51, %v2819_v45  ;;  %v2821_v21 = vadd.f32 %v2820_v53, %v2708_v39  ;;  %v2710_v4 = vadd.f32 %v2709_v20, %v5542_v61  ;;  %3860 = vmatmul.mubr.bf16.gmra.mxu1 %v3270_v0 }
 0x227   :  { %v3167_v28 = vmul.f32 0.2, %v3103_v56  ;;  %v2711_v32 = vpop.f32.mrf.mxu0 }
 0x228   :  { %v2824_v47 = vpop.f32.mrf.mxu1  ;;  %v3274_v10 = vpack.c.bf16 %v3230_v15, %v3226_v60  ;;  %v3107_v54 = vadd.f32 %v5578_v41, %v2821_v21  ;;  %v2823_v12 = vadd.f32 %v2822_v57, %v2710_v4  ;;  %v3170_v23 = vmul.f32 0.2, %v3106_v9 }
 0x229   :  { %v3231_v17 = vmax.f32 %v3103_v56, %v3167_v28  ;;  %v2712_v18 = vadd.f32 %v2711_v32, %v2599_v43  ;;  %v2715_v48 = vpop.f32.mrf.mxu0 }
 0x22a   :  { %v2828_v1 = vpop.f32.mrf.mxu1  ;;  %v3110_v38 = vadd.f32 %v5572_v51, %v2823_v12  ;;  %v2716_v61 = vadd.f32 %v2715_v48, %v5548_v59  ;;  %v3171_v13 = vmul.f32 0.2, %v3107_v54  ;;  %v3234_v62 = vmax.f32 %v3106_v9, %v3170_v23 }
 0x22b   :  { %v2825_v44 = vadd.f32 %v2824_v47, %v2712_v18  ;;  %v2717_v5 = vpop.f32.mrf.mxu0  ;;  %v3275_v36 = vpack.c.bf16 %v3231_v17, %v3227_v8 }
 0x22c   :  { %v2830_v25 = vpop.f32.mrf.mxu1  ;;  %v3174_v55 = vmul.f32 0.2, %v3110_v38  ;;  %v2829_v34 = vadd.f32 %v2828_v1, %v2716_v61  ;;  %v2718_v50 = vadd.f32 %v2717_v5, %v5550_v2  ;;  %v3235_v2 = vmax.f32 %v3107_v54, %v3171_v13 }
 0x22d   :  { %v3111_v40 = vadd.f32 %v5578_v41, %v2825_v44  ;;  %3869 = vmatprep.mubr.bf16.mxu1 %v3275_v36  ;;  %v2719_v0 = vpop.f32.mrf.mxu0  ;;  %v2619_v54 = vadd.f32 %v5567_v27, %v5565_v31 }
 0x22e   :  { %v2832_v6 = vpop.f32.mrf.mxu1  ;;  %v3238_v37 = vmax.f32 %v3110_v38, %v3174_v55  ;;  %v3114_v35 = vadd.f32 %v5572_v51, %v2829_v34  ;;  %v2831_v30 = vadd.f32 %v2830_v25, %v2718_v50  ;;  %v2720_v59 = vadd.f32 %v2719_v0, %v5552_v19  ;;  %3870 = vmatmul.mubr.bf16.gmra.mxu1 %v3274_v10 }
 0x22f   :  { %v3175_v3 = vmul.f32 0.2, %v3111_v40  ;;  %v2721_v46 = vpop.f32.mrf.mxu0 }
 0x230   :  { %v2834_v33 = vpop.f32.mrf.mxu1  ;;  %v3278_v42 = vpack.c.bf16 %v3238_v37, %v3234_v62  ;;  %v2833_v24 = vadd.f32 %v2832_v6, %v2720_v59  ;;  %v3178_v53 = vmul.f32 0.2, %v3114_v35  ;;  %v3115_v26 = vadd.f32 %v5578_v41, %v2831_v30 }
 0x231   :  { %v3239_v63 = vmax.f32 %v3111_v40, %v3175_v3  ;;  %v2722_v14 = vadd.f32 %v2721_v46, %v2609_v11  ;;  %v2725_v45 = vpop.f32.mrf.mxu0 }
 0x232   :  { %v2838_v39 = vpop.f32.mrf.mxu1  ;;  %v3118_v60 = vadd.f32 %v5572_v51, %v2833_v24  ;;  %v2726_v19 = vadd.f32 %v2725_v45, %v5558_v58  ;;  %v3242_v9 = vmax.f32 %v3114_v35, %v3178_v53  ;;  %v3179_v21 = vmul.f32 0.2, %v3115_v26 }
 0x233   :  { %v2835_v52 = vadd.f32 %v2834_v33, %v2722_v14  ;;  %v2727_v56 = vpop.f32.mrf.mxu0  ;;  %v3279_v29 = vpack.c.bf16 %v3239_v63, %v3235_v2  ;;  %v3352_v63 = vld [vmem:[%s5789_s4] sm:$0x3]  ;;  %v5849_v53 = vsub.s32 0, %v5389_v49  ;;  %v5850_v45 = vsub.s32 1, %v5389_v49 }
 0x234   :  { %v2840_v7 = vpop.f32.mrf.mxu1  ;;  %v3182_v20 = vmul.f32 0.2, %v3118_v60  ;;  %v2839_v57 = vadd.f32 %v2838_v39, %v2726_v19  ;;  %v2728_v15 = vadd.f32 %v2727_v56, %v5560_v16  ;;  %v3243_v23 = vmax.f32 %v3115_v26, %v3179_v21 }
 0x235   :  { %v3119_v4 = vadd.f32 %v5578_v41, %v2835_v52  ;;  %3879 = vmatprep.mubr.bf16.mxu1 %v3279_v29  ;;  %v2729_v43 = vpop.f32.mrf.mxu0  ;;  %v5664_v26 = vrot.slane %v3352_v63, %v5849_v53  ;;  %v5670_v39 = vrot.slane %v3352_v63, %v5850_v45  ;;  %v5679_v29 = vld [vmem:[%s5790_s5] sm:$0xff]  ;;  %s5003_s5 = smov [#allocation12]  }
 0x236   :  { %v3246_v28 = vmax.f32 %v3118_v60, %v3182_v20  ;;  %v3122_v32 = vadd.f32 %v5572_v51, %v2839_v57  ;;  %v2841_v47 = vadd.f32 %v2840_v7, %v2728_v15  ;;  %v2730_v58 = vadd.f32 %v2729_v43, %v5562_v22  ;;  %v2842_v10 = vpop.f32.mrf.mxu1  ;;  %3880 = vmatmul.mubr.bf16.gmra.mxu1 %v3278_v42  ;;  %s4055_s27 = sshll.u32 %s5003_s5, 4  ;;  %s4056_s27 = int_to_ptr.vmem [resolvable:$true] %s4055_s27 }
 0x237   :  { %v3183_v12 = vmul.f32 0.2, %v3119_v4  ;;  %v2731_v8 = vpop.f32.mrf.mxu0  ;;  %v4388_v57 = vcombine.high %v5679_v29, %v5679_v29  ;;  %s4964_s28 = scalar_lea.vmem %s4056_s27, 128  ;;  %p4969_p7 = scmp.lt.s32.totalorder %s4056_s27, %s4056_s27 }
 0x238   :  { %v3282_v16 = vpack.c.bf16 %v3246_v28, %v3242_v9  ;;  %v2843_v17 = vadd.f32 %v2842_v10, %v2730_v58  ;;  %v3123_v48 = vadd.f32 %v5578_v41, %v2841_v47  ;;  %v2732_v1 = vadd.f32 %v2731_v8, %v2619_v54  ;;  %v2844_v44 = vpop.f32.mrf.mxu1  ;;  %v4386_v8 = vld [vmem:[#allocation3] ss:$0 sm:$0xff]  ;;  %p4965_p6 = scmp.ne.s32.totalorder %s4056_s27, %s4964_s28  ;;  %p4970_p8 = scmp.lt.s32.totalorder %s4964_s28, %s4964_s28 }
 0x239   :  { %v3247_v18 = vmax.f32 %v3119_v4, %v3183_v12  ;;  %v3186_v38 = vmul.f32 0.2, %v3122_v32  ;;  %4040 = vmatprep.mubr.bf16.mxu0 %v4388_v57 }
 0x23a   :  { %v3126_v61 = vadd.f32 %v5572_v51, %v2843_v17  ;;  %v2845_v5 = vadd.f32 %v2844_v44, %v2732_v1  ;;  %v3187_v36 = vmul.f32 0.2, %v3123_v48  ;;  %p4971_p9 = por %p4970_p8, %p4969_p7 }
 0x23b   :  { %v3283_v22 = vpack.c.bf16 %v3247_v18, %v3243_v23  ;;  %v3250_v31 = vmax.f32 %v3122_v32, %v3186_v38 }
 0x23c   :  { %v3190_v25 = vmul.f32 0.2, %v3126_v61  ;;  %v3127_v13 = vadd.f32 %v5578_v41, %v2845_v5  ;;  %v3251_v50 = vmax.f32 %v3123_v48, %v3187_v36  ;;  %v5002_v48 = vmov 0   ;;  %p4972_p10 = pnand %p4971_p9, %p4965_p6 }
 0x23d   :  { %3889 = vmatprep.mubr.bf16.mxu1 %v3283_v22  ;;  %4401 = vset.pattern.permute.xlu0 %v5002_v48 }
 0x23e   :  { %v3254_v27 = vmax.f32 %v3126_v61, %v3190_v25  ;;  %3890 = vmatmul.mubr.bf16.gmra.mxu1 %v3282_v16  ;;  %v3191_v55 = vmul.f32 0.2, %v3127_v13  ;;  %3998 = vperm.xlu0 %4401, %v4386_v8  }
 0x240   :  { %v3286_v34 = vpack.c.bf16 %v3254_v27, %v3250_v31  ;;  %v3255_v62 = vmax.f32 %v3127_v13, %v3191_v55 }
 0x242   :  { %v3287_v40 = vpack.c.bf16 %v3255_v62, %v3251_v50 }
 0x244   :  { %3899 = vmatprep.mubr.bf16.mxu1 %v3287_v40 }
 0x246   :  { %3900 = vmatmul.mubr.bf16.gmra.mxu1 %v3286_v34 }
 0x24d   :  { %v3718_v0 = vpop.f32.mrf.mxu0 }
 0x24e   :  { %v3719_v60 = vadd.f32 %v3718_v0, %v5664_v26 }
 0x24f   :  { %v3720_v51 = vpop.f32.mrf.mxu0 }
 0x250   :  { %v3721_v56 = vadd.f32 %v3720_v51, %v5670_v39 }
 0x251   :  { %v3722_v6 = vpop.f32.mrf.mxu0 }
 0x252   :  { %v3723_v49 = vadd.f32 %v3722_v6, %v5664_v26 }
 0x253   :  { %v3724_v37 = vpop.f32.mrf.mxu0 }
 0x254   :  { %v3725_v4 = vadd.f32 %v3724_v37, %v5670_v39 }
 0x256   :  { %v3728_v35 = vpop.f32.mrf.mxu0 }
 0x257   :  { %v3729_v12 = vadd.f32 %v3728_v35, %v5664_v26 }
 0x258   :  { %v3730_v30 = vpop.f32.mrf.mxu0 }
 0x259   :  { %v3731_v1 = vadd.f32 %v3730_v30, %v5670_v39 }
 0x25a   :  { %v3732_v59 = vpop.f32.mrf.mxu0 }
 0x25b   :  { %v3733_v36 = vadd.f32 %v3732_v59, %v5664_v26 }
 0x25c   :  { %v3734_v11 = vpop.f32.mrf.mxu0 }
 0x25d   :  { %v3735_v55 = vadd.f32 %v3734_v11, %v5670_v39 }
 0x25e   :  { %v3738_v41 = vpop.f32.mrf.mxu0 }
 0x25f   :  { %v3739_v0 = vadd.f32 %v3738_v41, %v5664_v26 }
 0x260   :  { %v3740_v3 = vpop.f32.mrf.mxu0 }
 0x261   :  { %v3741_v35 = vadd.f32 %v3740_v3, %v5670_v39 }
 0x262   :  { %v5649_v46 = vpop.f32.mrf.mxu0 }
 0x263   :  { %v3743_v11 = vadd.f32 %v5649_v46, %v5664_v26 }
 0x264   :  { %v5651_v33 = vpop.f32.mrf.mxu0 }
 0x265   :  { %v3745_v3 = vadd.f32 %v5651_v33, %v5670_v39 }
 0x266   :  { %v5653_v2 = vpop.f32.mrf.mxu0 }
 0x267   :  { %v3749_v46 = vadd.f32 %v5653_v2, %v5664_v26 }
 0x268   :  { %v5655_v42 = vpop.f32.mrf.mxu0 }
 0x26a   :  { %v5657_v24 = vpop.f32.mrf.mxu0 }
 0x26c   :  { %v5666_v14 = vpop.f32.mrf.mxu0 }
 0x26e   :  { %v5673_v19 = vpop.f32.mrf.mxu0 }
 0x270   :  { %v5684_v15 = vpop.f32.mrf.mxu0 }
 0x272   :  { %v5687_v47 = vpop.f32.mrf.mxu0 }
 0x274   :  { %v5691_v61 = vpop.f32.mrf.mxu0 }
 0x276   :  { %v5699_v62 = vpop.f32.mrf.mxu0 }
 0x2cd   :  { %v3831_v52 = vpop.f32.mrf.mxu1 }
 0x2ce   :  { %v3832_v7 = vadd.f32 %v3831_v52, %v3719_v60  ;;  %v5705_v60 = vpop.f32.mrf.mxu0 }
 0x2cf   :  { %v3833_v20 = vpop.f32.mrf.mxu1 }
 0x2d0   :  { %v3834_v9 = vadd.f32 %v3833_v20, %v3721_v56  ;;  %v3910_v43 = vmul.f32 0.2, %v3832_v7 }
 0x2d1   :  { %v3835_v21 = vpop.f32.mrf.mxu1 }
 0x2d2   :  { %v3836_v28 = vadd.f32 %v3835_v21, %v3723_v49  ;;  %v3911_v58 = vmul.f32 0.2, %v3834_v9  ;;  %v3942_v16 = vmax.f32 %v3832_v7, %v3910_v43 }
 0x2d3   :  { %v3837_v32 = vpop.f32.mrf.mxu1 }
 0x2d4   :  { %v3912_v10 = vmul.f32 0.2, %v3836_v28  ;;  %v3838_v54 = vadd.f32 %v3837_v32, %v3725_v4  ;;  %v3943_v44 = vmax.f32 %v3834_v9, %v3911_v58  ;;  %v5713_v4 = vpop.f32.mrf.mxu0 }
 0x2d6   :  { %v3944_v17 = vmax.f32 %v3836_v28, %v3912_v10  ;;  %v3913_v23 = vmul.f32 0.2, %v3838_v54  ;;  %v3841_v18 = vpop.f32.mrf.mxu1 }
 0x2d7   :  { %v3842_v38 = vadd.f32 %v3841_v18, %v3729_v12 }
 0x2d8   :  { %v5693_v5 = vpack.c.bf16 %v3944_v17, %v3942_v16  ;;  %v3945_v22 = vmax.f32 %v3838_v54, %v3913_v23  ;;  %v3843_v25 = vpop.f32.mrf.mxu1  ;;  %v3774_v17 = vpop.f32.mrf.mxu0  ;;  %v3753_v23 = vadd.f32 %v5657_v24, %v5664_v26 }
 0x2d9   :  { %v3844_v13 = vadd.f32 %v3843_v25, %v3731_v1  ;;  %v3914_v34 = vmul.f32 0.2, %v3842_v38 }
 0x2da   :  { %v3845_v31 = vpop.f32.mrf.mxu1  ;;  %v5696_v27 = vpack.c.bf16 %v3945_v22, %v3943_v44  ;;  %v3778_v25 = vpop.f32.mrf.mxu0 }
 0x2db   :  { %v3846_v50 = vadd.f32 %v3845_v31, %v3733_v36  ;;  %v3915_v51 = vmul.f32 0.2, %v3844_v13  ;;  %v3946_v59 = vmax.f32 %v3842_v38, %v3914_v34 }
 0x2dc   :  { %v3847_v40 = vpop.f32.mrf.mxu1 }
 0x2dd   :  { %v3916_v6 = vmul.f32 0.2, %v3846_v50  ;;  %v3848_v37 = vadd.f32 %v3847_v40, %v3735_v55  ;;  %v3947_v56 = vmax.f32 %v3844_v13, %v3915_v51 }
 0x2de   :  { %v3851_v30 = vpop.f32.mrf.mxu1 }
 0x2df   :  { %v3948_v63 = vmax.f32 %v3846_v50, %v3916_v6  ;;  %v3917_v53 = vmul.f32 0.2, %v3848_v37  ;;  %v3852_v45 = vadd.f32 %v3851_v30, %v3739_v0  ;;  %v3780_v50 = vpop.f32.mrf.mxu0 }
 0x2e0   :  { %v3853_v52 = vpop.f32.mrf.mxu1 }
 0x2e1   :  { %v5707_v7 = vpack.c.bf16 %v3948_v63, %v3946_v59  ;;  %v3949_v41 = vmax.f32 %v3848_v37, %v3917_v53  ;;  %v3854_v20 = vadd.f32 %v3853_v52, %v3741_v35  ;;  %v3918_v49 = vmul.f32 0.2, %v3852_v45  ;;  %v3782_v51 = vpop.f32.mrf.mxu0 }
 0x2e2   :  { %v3855_v57 = vpop.f32.mrf.mxu1 }
 0x2e3   :  { %v3856_v9 = vadd.f32 %v3855_v57, %v3743_v11  ;;  %v5711_v21 = vpack.c.bf16 %v3949_v41, %v3947_v56  ;;  %v3919_v28 = vmul.f32 0.2, %v3854_v20  ;;  %v3950_v54 = vmax.f32 %v3852_v45, %v3918_v49  ;;  %v3784_v35 = vpop.f32.mrf.mxu0 }
 0x2e4   :  { %v3857_v43 = vpop.f32.mrf.mxu1 }
 0x2e5   :  { %v3920_v32 = vmul.f32 0.2, %v3856_v9  ;;  %v3858_v58 = vadd.f32 %v3857_v43, %v3745_v3  ;;  %v3951_v18 = vmax.f32 %v3854_v20, %v3919_v28  ;;  %v3788_v63 = vpop.f32.mrf.mxu0  ;;  %v3785_v3 = vadd.f32 %v3784_v35, %v5670_v39 }
 0x2e6   :  { %v3861_v10 = vpop.f32.mrf.mxu1  ;;  %v3781_v28 = vadd.f32 %v3780_v50, %v5670_v39 }
 0x2e7   :  { %v3952_v12 = vmax.f32 %v3856_v9, %v3920_v32  ;;  %v3921_v8 = vmul.f32 0.2, %v3858_v58  ;;  %v3862_v16 = vadd.f32 %v3861_v10, %v3749_v46  ;;  %v3790_v11 = vpop.f32.mrf.mxu0  ;;  %v3789_v9 = vadd.f32 %v3788_v63, %v5664_v26 }
 0x2e8   :  { %v5717_v33 = vpop.f32.mrf.mxu1  ;;  %v3791_v49 = vadd.f32 %v3790_v11, %v5670_v39  ;;  %v3771_v63 = vadd.f32 %v5705_v60, %v5670_v39  ;;  %v3779_v11 = vadd.f32 %v3778_v25, %v5664_v26  ;;  %v3773_v60 = vadd.f32 %v5713_v4, %v5664_v26 }
 0x2e9   :  { %v5721_v48 = vpack.c.bf16 %v3952_v12, %v3950_v54  ;;  %v3953_v1 = vmax.f32 %v3858_v58, %v3921_v8  ;;  %v3922_v2 = vmul.f32 0.2, %v3862_v16  ;;  %v3792_v41 = vpop.f32.mrf.mxu0 }
 0x2ea   :  { %v3865_v38 = vpop.f32.mrf.mxu1  ;;  %v3793_v32 = vadd.f32 %v3792_v41, %v5664_v26 }
 0x2eb   :  { %v3866_v44 = vadd.f32 %v3865_v38, %v3753_v23  ;;  %v5723_v22 = vpack.c.bf16 %v3953_v1, %v3951_v18  ;;  %v3954_v55 = vmax.f32 %v3862_v16, %v3922_v2  ;;  %v3794_v43 = vpop.f32.mrf.mxu0 }
 0x2ec   :  { %v5725_v36 = vpop.f32.mrf.mxu1  ;;  %v3795_v8 = vadd.f32 %v3794_v43, %v5670_v39 }
 0x2ed   :  { %v3924_v13 = vmul.f32 0.2, %v3866_v44 }
 0x2ee   :  { %v5727_v31 = vpop.f32.mrf.mxu1 }
 0x2ef   :  { %v3956_v34 = vmax.f32 %v3866_v44, %v3924_v13  ;;  %v3783_v13 = vadd.f32 %v3782_v51, %v5664_v26 }
 0x2f0   :  { %v5729_v40 = vpop.f32.mrf.mxu1 }
 0x2f1   :  { %v5731_v24 = vpack.c.bf16 %v3956_v34, %v3954_v55  ;;  %v3775_v34 = vadd.f32 %v3774_v17, %v5670_v39 }
 0x2f2   :  { %v5733_v0 = vpop.f32.mrf.mxu1 }
 0x2f4   :  { %v5735_v6 = vpop.f32.mrf.mxu1 }
 0x2f6   :  { %v5737_v37 = vpop.f32.mrf.mxu1 }
 0x2f8   :  { %v3883_v30 = vpop.f32.mrf.mxu1 }
 0x2fa   :  { %v3885_v59 = vpop.f32.mrf.mxu1 }
 0x2fc   :  { %v3887_v53 = vpop.f32.mrf.mxu1 }
 0x2fe   :  { %v3891_v45 = vpop.f32.mrf.mxu1 }
 0x300   :  { %v3893_v52 = vpop.f32.mrf.mxu1 }
 0x301   :  { %v3894_v16 = vadd.f32 %v3893_v52, %v3781_v28 }
 0x302   :  { %v3895_v56 = vpop.f32.mrf.mxu1 }
 0x303   :  { %v3935_v50 = vmul.f32 0.2, %v3894_v16  ;;  %v3896_v41 = vadd.f32 %v3895_v56, %v3783_v13 }
 0x304   :  { %v3897_v20 = vpop.f32.mrf.mxu1 }
 0x305   :  { %v3898_v58 = vadd.f32 %v3897_v20, %v3785_v3  ;;  %v3888_v20 = vadd.f32 %v3887_v53, %v3775_v34  ;;  %v3967_v51 = vmax.f32 %v3894_v16, %v3935_v50  ;;  %v3765_v53 = vadd.f32 %v5691_v61, %v5670_v39 }
 0x306   :  { %v3901_v57 = vpop.f32.mrf.mxu1 }
 0x307   :  { %v3902_v54 = vadd.f32 %v3901_v57, %v3789_v9  ;;  %v3937_v1 = vmul.f32 0.2, %v3898_v58  ;;  %v3892_v9 = vadd.f32 %v3891_v45, %v3779_v11  ;;  %v3886_v45 = vadd.f32 %v3885_v59, %v3773_v60 }
 0x308   :  { %v3903_v46 = vpop.f32.mrf.mxu1 }
 0x309   :  { %v3904_v10 = vadd.f32 %v3903_v46, %v3791_v49  ;;  %v3938_v55 = vmul.f32 0.2, %v3902_v54  ;;  %v3969_v57 = vmax.f32 %v3898_v58, %v3937_v1  ;;  %v3884_v46 = vadd.f32 %v3883_v30, %v3771_v63 }
 0x30a   :  { %v3905_v12 = vpop.f32.mrf.mxu1  ;;  %v3934_v25 = vmul.f32 0.2, %v3892_v9  ;;  %v3769_v30 = vadd.f32 %v5699_v62, %v5664_v26  ;;  %v3932_v61 = vmul.f32 0.2, %v3886_v45  ;;  %v3763_v62 = vadd.f32 %v5687_v47, %v5664_v26 }
 0x30b   :  { %v3906_v23 = vadd.f32 %v3905_v12, %v3793_v32  ;;  %v3939_v38 = vmul.f32 0.2, %v3904_v10  ;;  %v3970_v43 = vmax.f32 %v3902_v54, %v3938_v55  ;;  %v3936_v32 = vmul.f32 0.2, %v3896_v41 }
 0x30c   :  { %v3907_v18 = vpop.f32.mrf.mxu1  ;;  %v3933_v12 = vmul.f32 0.2, %v3888_v20  ;;  %v3931_v56 = vmul.f32 0.2, %v3884_v46  ;;  %v3878_v54 = vadd.f32 %v5735_v6, %v3765_v53  ;;  %v3882_v4 = vadd.f32 %v5737_v37, %v3769_v30 }
 0x30d   :  { %v3940_v2 = vmul.f32 0.2, %v3906_v23  ;;  %v3908_v44 = vadd.f32 %v3907_v18, %v3795_v8  ;;  %v3971_v3 = vmax.f32 %v3904_v10, %v3939_v38  ;;  %v3988_v8 = vpack.c.bf16 %v3969_v57, %v3967_v51 }
 0x30e   :  { %v3968_v58 = vmax.f32 %v3896_v41, %v3936_v32  ;;  %v3761_v10 = vadd.f32 %v5684_v15, %v5670_v39  ;;  %v3965_v16 = vmax.f32 %v3888_v20, %v3933_v12  ;;  %v3963_v1 = vmax.f32 %v3884_v46, %v3931_v56 }
 0x30f   :  { %v3941_v35 = vmul.f32 0.2, %v3908_v44  ;;  %v3972_v52 = vmax.f32 %v3906_v23, %v3940_v2  ;;  %v3966_v23 = vmax.f32 %v3892_v9, %v3934_v25  ;;  %v3929_v2 = vmul.f32 0.2, %v3878_v54 }
 0x310   :  { %v3874_v18 = vadd.f32 %v5729_v40, %v3761_v10  ;;  %v3930_v59 = vmul.f32 0.2, %v3882_v4  ;;  %v3755_v15 = vadd.f32 %v5666_v14, %v5670_v39  ;;  %v3759_v37 = vadd.f32 %v5673_v19, %v5664_v26 }
 0x311   :  { %v3973_v49 = vmax.f32 %v3908_v44, %v3941_v35  ;;  %v3989_v17 = vpack.c.bf16 %v3972_v52, %v3970_v43  ;;  %v3987_v38 = vpack.c.bf16 %v3968_v58, %v3966_v23  ;;  %v3986_v44 = vpack.c.bf16 %v3965_v16, %v3963_v1 }
 0x312   :  { %v3927_v6 = vmul.f32 0.2, %v3874_v18  ;;  %v3876_v40 = vadd.f32 %v5733_v0, %v3763_v62  ;;  %v3964_v13 = vmax.f32 %v3886_v45, %v3932_v61  ;;  %v3751_v55 = vadd.f32 %v5655_v42, %v5670_v39 }
 0x313   :  { %v3990_v28 = vpack.c.bf16 %v3973_v49, %v3971_v3  ;;  %v3868_v34 = vadd.f32 %v5725_v36, %v3755_v15  ;;  %v3961_v50 = vmax.f32 %v3878_v54, %v3929_v2  ;;  %v3872_v47 = vadd.f32 %v5727_v31, %v3759_v37  ;;  %v3999_v31 = vpop.permute.xlu0 %3998 }
 0x314   :  { %v3962_v35 = vmax.f32 %v3882_v4, %v3930_v59  ;;  %v3864_v63 = vadd.f32 %v5717_v33, %v3751_v55  ;;  %v3959_v14 = vmax.f32 %v3874_v18, %v3927_v6  ;;  %v3928_v11 = vmul.f32 0.2, %v3876_v40 }
 0x315   :  { %4008 = vmatprep.subr.bf16.mxu0 %v3990_v28  ;;  %v3925_v52 = vmul.f32 0.2, %v3868_v34  ;;  %v3926_v26 = vmul.f32 0.2, %v3872_v47  ;;  %v4387_v33 = vcombine.low %v5679_v29, %v5679_v29 }
 0x316   :  { %4009 = vmatpush1.bf16.xpose.msra.mxu0 %v3989_v17  ;;  %v3985_v41 = vpack.c.bf16 %v3964_v13, %v3962_v35  ;;  %v3984_v20 = vpack.c.bf16 %v3961_v50, %v3959_v14  ;;  %v3923_v19 = vmul.f32 0.2, %v3864_v63  ;;  %v3960_v0 = vmax.f32 %v3876_v40, %v3928_v11 }
 0x317   :  { %4010 = vmatprep.subr.bf16.mxu0 %v3988_v8  ;;  %v3957_v57 = vmax.f32 %v3868_v34, %v3925_v52  ;;  %v3958_v42 = vmax.f32 %v3872_v47, %v3926_v26 }
 0x318   :  { %v3955_v39 = vmax.f32 %v3864_v63, %v3923_v19 }
 0x319   :  { %v3983_v36 = vpack.c.bf16 %v3960_v0, %v3958_v42 }
 0x31a   :  { %v3982_v3 = vpack.c.bf16 %v3957_v57, %v3955_v39 }
 0x31e   :  { %4011 = vmatpush1.bf16.xpose.msra.mxu0 %v3987_v38 }
 0x31f   :  { %4012 = vmatprep.subr.bf16.mxu0 %v3986_v44 }
 0x326   :  { %4013 = vmatpush1.bf16.xpose.msra.mxu0 %v3985_v41 }
 0x327   :  { %4014 = vmatprep.subr.bf16.mxu0 %v3984_v20 }
 0x32e   :  { %4015 = vmatpush1.bf16.xpose.msra.mxu0 %v3983_v36 }
 0x32f   :  { %4016 = vmatprep.subr.bf16.mxu0 %v3982_v3 }
 0x336   :  { %4017 = vmatpush1.bf16.xpose.msra.mxu0 %v5731_v24 }
 0x337   :  { %4018 = vmatprep.subr.bf16.mxu0 %v5723_v22 }
 0x33e   :  { %4019 = vmatpush1.bf16.xpose.msra.mxu0 %v5721_v48 }
 0x33f   :  { %4020 = vmatprep.subr.bf16.mxu0 %v5711_v21 }
 0x346   :  { %4021 = vmatpush1.bf16.xpose.msra.mxu0 %v5707_v7 }
 0x347   :  { %4022 = vmatprep.subr.bf16.mxu0 %v5696_v27 }
 0x34e   :  { %4023 = vmatpush1.bf16.xpose.msra.mxu0 %v5693_v5 }
 0x355   :  { %4041 = vmatmul.mubr.bf16.vlgmr.msra.gmra.mxu0 %v4387_v33 }
 0x415   :  { %v4042_v24 = vpop.f32.mrf.mxu0 }
 0x416   :  { %v4043_v49 = vadd.f32 %v4042_v24, %v3999_v31 }
 0x417   :  { %v4044_v22 = vpop.f32.mrf.mxu0 }
 0x418   :  { %4048 = vst [vmem:[#allocation12] sm:$0xff] %v4043_v49 }
 0x419   :  { %v4045_v48 = vpop.f32.mrf.mxu0 }
 0x41a   :  { %4975 = shalt.err (!%p4972_p10)
}
 0x41b   :  { %4058 = dma.vmem_to_hbm [thread:$0]  %s4056_s27, 128, %s5792_s7, [#allocation6]   ;;  %v4046_v29 = vpop.f32.mrf.mxu0 }
 0x41c   :  { %4990 = dma.done.wait [#allocation6], 128  }
 0x41d   :  { %4991 = vsyncadd [#allocation6], 4294967168 }
 0x41e   :  { %4062 = vsyncpa [#allocation5], 1 }
 0x41f   :  { %4063 = vsyncpa [#allocation8], 1 }
 0x420   :  { %4064 = vsyncpa [#allocation11], 1 }
 0x421   :  { %4065 = vsyncpa [#allocation6], 1 }

</bundles_post_ra>
